<compile_context>
chip_gen: v7x
topology: tpu7x:2x2x1
jax: 0.10.0
libtpu: 0.0.40
codegen_flags: <defaults>
</compile_context>

<pallas_src>
import functools

import jax
import jax.numpy as jnp
from jax import lax
from jax.experimental import pallas as pl
from jax.experimental.pallas import tpu as pltpu


def _round_up(x: int, m: int) -> int:
    return (x + m - 1) // m * m


# ---------------------------------------------------------------------------
# Pallas kernel: grid = (batch blocks [parallel], time chunks [arbitrary]).
# h/c carried in per-block VMEM scratch across time chunks.
# ---------------------------------------------------------------------------
def _lstm_chunk_kernel(gx_ref, w_hh_ref, len_ref, out_ref, h_scr, c_scr, *,
                       Tc, Hp, unroll):
    chunk = pl.program_id(1)           # time-chunk index (inner, "arbitrary")

    @pl.when(chunk == 0)
    def _init():
        h_scr[...] = jnp.zeros_like(h_scr)
        c_scr[...] = jnp.zeros_like(c_scr)

    w_hh = w_hh_ref[...]               # (Hp, 4Hp) bf16 — resident, hoisted
    lens = len_ref[...]                # (Bblk, 1) int32
    t0 = chunk * Tc                    # global time of first step in chunk

    def sig(x):                        # sigmoid via tanh: 1 EUP push per gate
        return 0.5 * (1.0 + jnp.tanh(0.5 * x))

    def step(s, carry):
        h, c = carry
        # gates = gates_x[t] + h_{t-1} @ W_hh^T      -> (Bblk, 4Hp) f32
        gates = gx_ref[s].astype(jnp.float32) + jnp.dot(
            h.astype(jnp.bfloat16), w_hh, preferred_element_type=jnp.float32)
        # PyTorch gate order [i, f, g, o]; slices on 128-lane boundaries.
        i_g = sig(gates[:, 0 * Hp:1 * Hp])
        f_g = sig(gates[:, 1 * Hp:2 * Hp])
        g_g = jnp.tanh(gates[:, 2 * Hp:3 * Hp])
        o_g = sig(gates[:, 3 * Hp:4 * Hp])
        c_new = f_g * c + i_g * g_g
        h_new = o_g * jnp.tanh(c_new)
        # pack/pad_packed emulation: zero outputs at t >= length.
        m = ((t0 + s) < lens).astype(jnp.float32)            # (Bblk, 1)
        out_ref[s] = (h_new * m).astype(out_ref.dtype)
        return h_new, c_new

    h_fin, c_fin = lax.fori_loop(0, Tc, step, (h_scr[...], c_scr[...]),
                                 unroll=unroll)
    h_scr[...] = h_fin
    c_scr[...] = c_fin


def _vmem_budget_bytes(Tc, Bblk, Hp):
    gates = 2 * Tc * Bblk * 4 * Hp * 2         # bf16, double-buffered
    out = 2 * Tc * Bblk * Hp * 4               # f32, double-buffered
    w_hh = 2 * Hp * 4 * Hp * 2                 # bf16 (x2 covers fallback path)
    state = 2 * Bblk * Hp * 4                  # h/c scratch, f32
    need = gates + out + w_hh + state + (1 << 20)
    return max(16 << 20, min(int(need * 1.5), 56 << 20))  # fits v7x's 64 MiB


def lstm_pallas(gates_x, w_hh_t, lengths, *, Tc, Bblk):
    """gates_x: (Tp, Bp, 4Hp) bf16 (x-projection + bias, precomputed);
    w_hh_t: (Hp, 4Hp) bf16; lengths: (Bp, 1) int32.
    Returns (Tp, Bp, Hp) f32 with zeros at t >= length."""
    Tp, Bp, Hp4 = gates_x.shape
    Hp = Hp4 // 4
    assert Tp % Tc == 0 and Bp % Bblk == 0 and Bblk % 8 == 0 and Hp % 128 == 0

    unroll = Tc if Tc <= 8 else 4
    kernel = functools.partial(_lstm_chunk_kernel, Tc=Tc, Hp=Hp, unroll=unroll)
    vmem_bytes = _vmem_budget_bytes(Tc, Bblk, Hp)

    def run(use_buffered):
        # Constant-index inputs are DMA'd once; single-buffer them to free VMEM.
        kw = {"pipeline_mode": pl.Buffered(1)} if use_buffered else {}
        grid_spec = pltpu.PrefetchScalarGridSpec(
            num_scalar_prefetch=0,
            grid=(Bp // Bblk, Tp // Tc),
            in_specs=[
                # Precomputed input-projection gates, streamed per time chunk.
                pl.BlockSpec((Tc, Bblk, 4 * Hp), lambda b, c: (c, b, 0)),
                # Recurrent weight: constant index_map -> resident in VMEM.
                pl.BlockSpec((Hp, 4 * Hp), lambda b, c: (0, 0), **kw),
                # Per-batch lengths (cheap per-step compare for the mask).
                pl.BlockSpec((Bblk, 1), lambda b, c: (b, 0), **kw),
            ],
            out_specs=pl.BlockSpec((Tc, Bblk, Hp), lambda b, c: (c, b, 0)),
            scratch_shapes=[
                pltpu.VMEM((Bblk, Hp), jnp.float32),        # h state
                pltpu.VMEM((Bblk, Hp), jnp.float32),        # c state
            ],
        )
        return pl.pallas_call(
            kernel,
            out_shape=jax.ShapeDtypeStruct((Tp, Bp, Hp), jnp.float32),
            grid_spec=grid_spec,
            compiler_params=pltpu.CompilerParams(
                # batch blocks are independent -> megacore; time is a true
                # recurrence -> arbitrary.
                dimension_semantics=("parallel", "arbitrary"),
                vmem_limit_bytes=vmem_bytes,
            ),
        )(gates_x, w_hh_t, lengths)

    try:
        return run(True)
    except Exception:
        # Fallback if this Pallas build rejects pipeline_mode=pl.Buffered(1).
        return run(False)


# ---------------------------------------------------------------------------
# Seq2SeqTagger forward (gather + hoisted projection in XLA, recurrence in
# Pallas).
# ---------------------------------------------------------------------------
def seq2seq_tagger_forward(params, sentences, lengths, *, time_chunk=8):
    """sentences: (T, B) int32 token ids (seq-first); lengths: (B,) int32.
    Returns hiddens (T, B, H) float32 (zeros at padded positions)."""
    T, B = sentences.shape
    H = params["w_hh"].shape[1]                     # w_hh is (4H, H)

    # --- TPU-friendly padded sizes -----------------------------------------
    Hp = _round_up(H, 128)                          # lane-dense gates/output
    Bp = _round_up(B, 8)                            # full f32 sublanes
    Tc = min(time_chunk, T)
    Tp = _round_up(T, Tc)
    # Split batch into two blocks when possible so both v7x cores get work.
    Bblk = Bp // 2 if (Bp >= 16 and Bp % 16 == 0) else Bp

    # --- pad weights per-gate so gate slices stay at Hp boundaries ----------
    def pad_gate_rows(w):                           # (4H, X) -> (4Hp, X)
        w4 = w.reshape(4, H, -1)
        return jnp.pad(w4, ((0, 0), (0, Hp - H), (0, 0))).reshape(4 * Hp, -1)

    w_ih_p = pad_gate_rows(params["w_ih"])                         # (4Hp, E)
    w_hh_p = jnp.pad(pad_gate_rows(params["w_hh"]),
                     ((0, 0), (0, Hp - H)))                        # (4Hp, Hp)
    bias = params["b_ih"] + params["b_hh"]                         # (4H,)
    bias_p = jnp.pad(bias.reshape(4, H),
                     ((0, 0), (0, Hp - H))).reshape(4 * Hp)        # (4Hp,)
    # Padded gate rows have zero weights & bias -> padded h/c lanes stay 0,
    # so the padded recurrence equals the unpadded one on the first H lanes.

    # --- embedding lookup (gather stays in XLA; PAD row is zero) ------------
    embed = jnp.take(params["embedding"], sentences, axis=0).astype(jnp.float32)

    # --- hoisted input projection: one big matmul, off the serial path ------
    gates_x = jnp.einsum("tbe,ge->tbg", embed, w_ih_p,
                         preferred_element_type=jnp.float32)
    gates_x = gates_x + bias_p[None, None, :]                      # (T, B, 4Hp)

    # --- pad time/batch to the kernel tile grid; cast stream to bf16 --------
    gates_x = jnp.pad(gates_x, ((0, Tp - T), (0, Bp - B), (0, 0)))
    gates_x = gates_x.astype(jnp.bfloat16)
    w_hh_t_bf16 = w_hh_p.T.astype(jnp.bfloat16)                    # (Hp, 4Hp)
    lengths_p = jnp.pad(lengths.astype(jnp.int32),
                        (0, Bp - B)).reshape(Bp, 1)

    out = lstm_pallas(gates_x, w_hh_t_bf16, lengths_p,
                      Tc=Tc, Bblk=Bblk)                            # (Tp,Bp,Hp)
    return out[:T, :B, :H]


# ---------------------------------------------------------------------------
# Deterministic parameter init (PyTorch layouts, shapes follow __init__).
# ---------------------------------------------------------------------------
def init_params(key, vocab_size, tagset_size, embedding_dim, hidden_dim):
    keys = jax.random.split(key, 7)
    scale = 1.0 / jnp.sqrt(hidden_dim)
    emb = jax.random.normal(keys[0], (vocab_size, embedding_dim), jnp.float32)
    emb = emb.at[0].set(0.0)                                       # padding_idx
    w_ih = jax.random.uniform(keys[1], (4 * hidden_dim, embedding_dim),
                              jnp.float32, -scale, scale)
    w_hh = jax.random.uniform(keys[2], (4 * hidden_dim, hidden_dim),
                              jnp.float32, -scale, scale)
    b_ih = jax.random.uniform(keys[3], (4 * hidden_dim,), jnp.float32,
                              -scale, scale)
    b_hh = jax.random.uniform(keys[4], (4 * hidden_dim,), jnp.float32,
                              -scale, scale)
    # decoder exists on the module but forward() does not use it.
    dec_w = jax.random.uniform(keys[5], (tagset_size, hidden_dim), jnp.float32,
                               -scale, scale)
    dec_b = jax.random.uniform(keys[6], (tagset_size,), jnp.float32,
                               -scale, scale)
    return {"embedding": emb, "w_ih": w_ih, "w_hh": w_hh,
            "b_ih": b_ih, "b_hh": b_hh,
            "decoder_w": dec_w, "decoder_b": dec_b}


# ---------------------------------------------------------------------------
# Pure-JAX reference (unpadded lax.scan LSTM) matched to the kernel's bf16
# numerics (bf16 gates_x + bf16 W_hh matmul with f32 accumulation).
# ---------------------------------------------------------------------------
def reference_forward(params, sentences, lengths):
    T, B = sentences.shape
    H = params["w_hh"].shape[1]
    embed = jnp.take(params["embedding"], sentences, axis=0).astype(jnp.float32)
    bias = params["b_ih"] + params["b_hh"]
    gx = jnp.einsum("tbe,ge->tbg", embed, params["w_ih"],
                    preferred_element_type=jnp.float32) + bias
    gx = gx.astype(jnp.bfloat16)                                   # (T, B, 4H)
    w_hh_t = params["w_hh"].T.astype(jnp.bfloat16)                 # (H, 4H)
    t_idx = jnp.arange(T, dtype=jnp.int32)[:, None]
    mask = (t_idx < lengths[None, :]).astype(jnp.float32)[..., None]

    def sig(x):
        return 0.5 * (1.0 + jnp.tanh(0.5 * x))

    def step(carry, inp):
        h, c = carry
        gx_t, m_t = inp
        gates = gx_t.astype(jnp.float32) + jnp.dot(
            h.astype(jnp.bfloat16), w_hh_t, preferred_element_type=jnp.float32)
        i = sig(gates[:, 0 * H:1 * H])
        f = sig(gates[:, 1 * H:2 * H])
        g = jnp.tanh(gates[:, 2 * H:3 * H])
        o = sig(gates[:, 3 * H:4 * H])
        c_new = f * c + i * g
        h_new = o * jnp.tanh(c_new)
        return (h_new, c_new), h_new * m_t

    init = (jnp.zeros((B, H), jnp.float32), jnp.zeros((B, H), jnp.float32))
    _, outs = lax.scan(step, init, (gx, mask))
    return outs


if __name__ == "__main__":
    # Small, deterministic setup.
    vocab_size, tagset_size = 50, 10
    embedding_dim, hidden_dim = 16, 32
    T, B = 8, 2

    key = jax.random.PRNGKey(0)
    k_params, k_tokens = jax.random.split(key)
    params = init_params(k_params, vocab_size, tagset_size,
                         embedding_dim, hidden_dim)

    lengths = jnp.array([8, 5], dtype=jnp.int32)
    tokens = jax.random.randint(k_tokens, (T, B), 2, vocab_size,
                                dtype=jnp.int32)
    # Zero-pad (token id 0 == PAD) past each sequence's length.
    t_idx = jnp.arange(T, dtype=jnp.int32)[:, None]
    sentences = jnp.where(t_idx < lengths[None, :], tokens, 0)

    hiddens = seq2seq_tagger_forward(params, sentences, lengths, time_chunk=8)
    hiddens = jax.block_until_ready(hiddens)

    ref = jax.block_until_ready(reference_forward(params, sentences, lengths))
    assert hiddens.shape == (T, B, hidden_dim)
    # bf16 weight/gates path: compare against the bf16-matched reference.
    assert jnp.allclose(hiddens, ref, atol=1e-3, rtol=1e-3), (
        float(jnp.max(jnp.abs(hiddens - ref))))

    # TODO(synk): final (h, c) states past each length diverge from PyTorch's
    # packed-LSTM final states; forward() never exposes them, so not returned.
    print("KERNEL_OK")
</pallas_src>

<mosaic_0001>
module attributes {stable_mosaic.version = 11 : i64} {
  func.func @_lstm_chunk_kernel(%arg0: i32, %arg1: i32, %arg2: memref<8x8x512xbf16, #tpu.memory_space<vmem>>, %arg3: memref<128x512xbf16, #tpu.memory_space<vmem>>, %arg4: memref<8x1xi32, #tpu.memory_space<vmem>>, %arg5: memref<8x8x128xf32, #tpu.memory_space<vmem>>, %arg6: memref<8x128xf32, #tpu.memory_space<vmem>>, %arg7: memref<8x128xf32, #tpu.memory_space<vmem>>) attributes {dimension_semantics = [#tpu.dimension_semantics<parallel>, #tpu.dimension_semantics<arbitrary>], iteration_bounds = array<i64: 1, 1>, scalar_prefetch = 0 : i64, scratch_operands = 2 : i64, tpu.core_type = #tpu.core_type<tc>, window_params = [{transform_indices = @transform_0, window_bounds = array<i64: 8, 8, 512>}, {pipeline_mode = #tpu.pipeline_mode<synchronous>, transform_indices = @transform_1, window_bounds = array<i64: 128, 512>}, {pipeline_mode = #tpu.pipeline_mode<synchronous>, transform_indices = @transform_2, window_bounds = array<i64: 8, 1>}, {transform_indices = @transform_3, window_bounds = array<i64: 8, 8, 128>}]} {
    %c0_i32 = arith.constant 0 : i32
    %0 = arith.cmpi eq, %arg1, %c0_i32 : i32
    %1 = arith.extui %0 : i1 to i32
    %c0_i32_0 = arith.constant 0 : i32
    %2 = arith.cmpi ne, %1, %c0_i32_0 : i32
    scf.if %2 {
      %cst_125 = arith.constant 0.000000e+00 : f32
      %402 = vector.broadcast %cst_125 : f32 to vector<8x128xf32>
      %c0_126 = arith.constant 0 : index
      %c0_127 = arith.constant 0 : index
      %403 = vector.load %arg6[%c0_126, %c0_127] : memref<8x128xf32, #tpu.memory_space<vmem>>, vector<8x128xf32>
      tpu.vector_store %arg6[%c0_126, %c0_127], %402 {strides = array<i32>} : memref<8x128xf32, #tpu.memory_space<vmem>>, vector<8x128xf32>,
      %cst_128 = arith.constant 0.000000e+00 : f32
      %404 = vector.broadcast %cst_128 : f32 to vector<8x128xf32>
      %c0_129 = arith.constant 0 : index
      %c0_130 = arith.constant 0 : index
      %405 = vector.load %arg7[%c0_129, %c0_130] : memref<8x128xf32, #tpu.memory_space<vmem>>, vector<8x128xf32>
      tpu.vector_store %arg7[%c0_129, %c0_130], %404 {strides = array<i32>} : memref<8x128xf32, #tpu.memory_space<vmem>>, vector<8x128xf32>,
    } else {
    }
    %c0 = arith.constant 0 : index
    %c0_1 = arith.constant 0 : index
    %3 = vector.load %arg3[%c0, %c0_1] : memref<128x512xbf16, #tpu.memory_space<vmem>>, vector<128x512xbf16>
    %c0_2 = arith.constant 0 : index
    %c0_3 = arith.constant 0 : index
    %4 = vector.load %arg4[%c0_2, %c0_3] : memref<8x1xi32, #tpu.memory_space<vmem>>, vector<8x1xi32>
    %c8_i32 = arith.constant 8 : i32
    %5 = arith.muli %arg1, %c8_i32 : i32
    %c0_4 = arith.constant 0 : index
    %c0_5 = arith.constant 0 : index
    %6 = vector.load %arg6[%c0_4, %c0_5] : memref<8x128xf32, #tpu.memory_space<vmem>>, vector<8x128xf32>
    %c0_6 = arith.constant 0 : index
    %c0_7 = arith.constant 0 : index
    %7 = vector.load %arg7[%c0_6, %c0_7] : memref<8x128xf32, #tpu.memory_space<vmem>>, vector<8x128xf32>
    %c0_i32_8 = arith.constant 0 : i32
    %8 = arith.index_cast %c0_i32_8 : i32 to index
    %c0_9 = arith.constant 0 : index
    %c0_10 = arith.constant 0 : index
    %9 = vector.load %arg2[%8, %c0_9, %c0_10] : memref<8x8x512xbf16, #tpu.memory_space<vmem>>, vector<1x8x512xbf16>
    %10 = vector.shape_cast %9 : vector<1x8x512xbf16> to vector<8x512xbf16>
    %11 = arith.extf %10 : vector<8x512xbf16> to vector<8x512xf32>
    %12 = arith.truncf %6 : vector<8x128xf32> to vector<8x128xbf16>
    %cst = arith.constant dense<0.000000e+00> : vector<8x512xf32>
    %13 = tpu.matmul %12, %3, %cst {dimension_numbers = #tpu.dot_dimension_numbers<[1], [0], [0], [1], [0, 0, 1, 1], [], []>} : vector<8x128xbf16>, vector<128x512xbf16>, vector<8x512xf32> -> vector<8x512xf32>
    %14 = arith.addf %11, %13 : vector<8x512xf32>
    %15 = vector.extract_strided_slice %14 {offsets = [0, 0], sizes = [8, 128], strides = [1, 1]} : vector<8x512xf32> to vector<8x128xf32>
    %cst_11 = arith.constant 5.000000e-01 : f32
    %16 = vector.broadcast %cst_11 : f32 to vector<8x128xf32>
    %17 = arith.mulf %16, %15 : vector<8x128xf32>
    %18 = math.tanh %17 : vector<8x128xf32>
    %cst_12 = arith.constant 1.000000e+00 : f32
    %19 = vector.broadcast %cst_12 : f32 to vector<8x128xf32>
    %20 = arith.addf %19, %18 : vector<8x128xf32>
    %cst_13 = arith.constant 5.000000e-01 : f32
    %21 = vector.broadcast %cst_13 : f32 to vector<8x128xf32>
    %22 = arith.mulf %21, %20 : vector<8x128xf32>
    %23 = vector.extract_strided_slice %14 {offsets = [0, 128], sizes = [8, 128], strides = [1, 1]} : vector<8x512xf32> to vector<8x128xf32>
    %cst_14 = arith.constant 5.000000e-01 : f32
    %24 = vector.broadcast %cst_14 : f32 to vector<8x128xf32>
    %25 = arith.mulf %24, %23 : vector<8x128xf32>
    %26 = math.tanh %25 : vector<8x128xf32>
    %cst_15 = arith.constant 1.000000e+00 : f32
    %27 = vector.broadcast %cst_15 : f32 to vector<8x128xf32>
    %28 = arith.addf %27, %26 : vector<8x128xf32>
    %cst_16 = arith.constant 5.000000e-01 : f32
    %29 = vector.broadcast %cst_16 : f32 to vector<8x128xf32>
    %30 = arith.mulf %29, %28 : vector<8x128xf32>
    %31 = vector.extract_strided_slice %14 {offsets = [0, 256], sizes = [8, 128], strides = [1, 1]} : vector<8x512xf32> to vector<8x128xf32>
    %32 = math.tanh %31 : vector<8x128xf32>
    %33 = vector.extract_strided_slice %14 {offsets = [0, 384], sizes = [8, 128], strides = [1, 1]} : vector<8x512xf32> to vector<8x128xf32>
    %cst_17 = arith.constant 5.000000e-01 : f32
    %34 = vector.broadcast %cst_17 : f32 to vector<8x128xf32>
    %35 = arith.mulf %34, %33 : vector<8x128xf32>
    %36 = math.tanh %35 : vector<8x128xf32>
    %cst_18 = arith.constant 1.000000e+00 : f32
    %37 = vector.broadcast %cst_18 : f32 to vector<8x128xf32>
    %38 = arith.addf %37, %36 : vector<8x128xf32>
    %cst_19 = arith.constant 5.000000e-01 : f32
    %39 = vector.broadcast %cst_19 : f32 to vector<8x128xf32>
    %40 = arith.mulf %39, %38 : vector<8x128xf32>
    %41 = arith.mulf %30, %7 : vector<8x128xf32>
    %42 = arith.mulf %22, %32 : vector<8x128xf32>
    %43 = arith.addf %41, %42 : vector<8x128xf32>
    %44 = math.tanh %43 : vector<8x128xf32>
    %45 = arith.mulf %40, %44 : vector<8x128xf32>
    %46 = arith.addi %5, %c0_i32_8 : i32
    %47 = vector.broadcast %46 : i32 to vector<8x1xi32>
    %48 = arith.cmpi slt, %47, %4 : vector<8x1xi32>
    %49 = arith.extui %48 : vector<8x1xi1> to vector<8x1xi32>
    %50 = arith.sitofp %49 : vector<8x1xi32> to vector<8x1xf32>
    %51 = vector.broadcast %50 : vector<8x1xf32> to vector<8x128xf32>
    %52 = arith.mulf %45, %51 : vector<8x128xf32>
    %53 = arith.index_cast %c0_i32_8 : i32 to index
    %c0_20 = arith.constant 0 : index
    %c0_21 = arith.constant 0 : index
    %54 = vector.load %arg5[%53, %c0_20, %c0_21] : memref<8x8x128xf32, #tpu.memory_space<vmem>>, vector<1x8x128xf32>
    %55 = vector.shape_cast %54 : vector<1x8x128xf32> to vector<8x128xf32>
    %56 = vector.shape_cast %52 : vector<8x128xf32> to vector<1x8x128xf32>
    tpu.vector_store %arg5[%53, %c0_20, %c0_21], %56 {strides = array<i32>} : memref<8x8x128xf32, #tpu.memory_space<vmem>>, vector<1x8x128xf32>,
    %c1_i32 = arith.constant 1 : i32
    %57 = arith.index_cast %c1_i32 : i32 to index
    %c0_22 = arith.constant 0 : index
    %c0_23 = arith.constant 0 : index
    %58 = vector.load %arg2[%57, %c0_22, %c0_23] : memref<8x8x512xbf16, #tpu.memory_space<vmem>>, vector<1x8x512xbf16>
    %59 = vector.shape_cast %58 : vector<1x8x512xbf16> to vector<8x512xbf16>
    %60 = arith.extf %59 : vector<8x512xbf16> to vector<8x512xf32>
    %61 = arith.truncf %45 : vector<8x128xf32> to vector<8x128xbf16>
    %cst_24 = arith.constant dense<0.000000e+00> : vector<8x512xf32>
    %62 = tpu.matmul %61, %3, %cst_24 {dimension_numbers = #tpu.dot_dimension_numbers<[1], [0], [0], [1], [0, 0, 1, 1], [], []>} : vector<8x128xbf16>, vector<128x512xbf16>, vector<8x512xf32> -> vector<8x512xf32>
    %63 = arith.addf %60, %62 : vector<8x512xf32>
    %64 = vector.extract_strided_slice %63 {offsets = [0, 0], sizes = [8, 128], strides = [1, 1]} : vector<8x512xf32> to vector<8x128xf32>
    %cst_25 = arith.constant 5.000000e-01 : f32
    %65 = vector.broadcast %cst_25 : f32 to vector<8x128xf32>
    %66 = arith.mulf %65, %64 : vector<8x128xf32>
    %67 = math.tanh %66 : vector<8x128xf32>
    %cst_26 = arith.constant 1.000000e+00 : f32
    %68 = vector.broadcast %cst_26 : f32 to vector<8x128xf32>
    %69 = arith.addf %68, %67 : vector<8x128xf32>
    %cst_27 = arith.constant 5.000000e-01 : f32
    %70 = vector.broadcast %cst_27 : f32 to vector<8x128xf32>
    %71 = arith.mulf %70, %69 : vector<8x128xf32>
    %72 = vector.extract_strided_slice %63 {offsets = [0, 128], sizes = [8, 128], strides = [1, 1]} : vector<8x512xf32> to vector<8x128xf32>
    %cst_28 = arith.constant 5.000000e-01 : f32
    %73 = vector.broadcast %cst_28 : f32 to vector<8x128xf32>
    %74 = arith.mulf %73, %72 : vector<8x128xf32>
    %75 = math.tanh %74 : vector<8x128xf32>
    %cst_29 = arith.constant 1.000000e+00 : f32
    %76 = vector.broadcast %cst_29 : f32 to vector<8x128xf32>
    %77 = arith.addf %76, %75 : vector<8x128xf32>
    %cst_30 = arith.constant 5.000000e-01 : f32
    %78 = vector.broadcast %cst_30 : f32 to vector<8x128xf32>
    %79 = arith.mulf %78, %77 : vector<8x128xf32>
    %80 = vector.extract_strided_slice %63 {offsets = [0, 256], sizes = [8, 128], strides = [1, 1]} : vector<8x512xf32> to vector<8x128xf32>
    %81 = math.tanh %80 : vector<8x128xf32>
    %82 = vector.extract_strided_slice %63 {offsets = [0, 384], sizes = [8, 128], strides = [1, 1]} : vector<8x512xf32> to vector<8x128xf32>
    %cst_31 = arith.constant 5.000000e-01 : f32
    %83 = vector.broadcast %cst_31 : f32 to vector<8x128xf32>
    %84 = arith.mulf %83, %82 : vector<8x128xf32>
    %85 = math.tanh %84 : vector<8x128xf32>
    %cst_32 = arith.constant 1.000000e+00 : f32
    %86 = vector.broadcast %cst_32 : f32 to vector<8x128xf32>
    %87 = arith.addf %86, %85 : vector<8x128xf32>
    %cst_33 = arith.constant 5.000000e-01 : f32
    %88 = vector.broadcast %cst_33 : f32 to vector<8x128xf32>
    %89 = arith.mulf %88, %87 : vector<8x128xf32>
    %90 = arith.mulf %79, %43 : vector<8x128xf32>
    %91 = arith.mulf %71, %81 : vector<8x128xf32>
    %92 = arith.addf %90, %91 : vector<8x128xf32>
    %93 = math.tanh %92 : vector<8x128xf32>
    %94 = arith.mulf %89, %93 : vector<8x128xf32>
    %95 = arith.addi %5, %c1_i32 : i32
    %96 = vector.broadcast %95 : i32 to vector<8x1xi32>
    %97 = arith.cmpi slt, %96, %4 : vector<8x1xi32>
    %98 = arith.extui %97 : vector<8x1xi1> to vector<8x1xi32>
    %99 = arith.sitofp %98 : vector<8x1xi32> to vector<8x1xf32>
    %100 = vector.broadcast %99 : vector<8x1xf32> to vector<8x128xf32>
    %101 = arith.mulf %94, %100 : vector<8x128xf32>
    %102 = arith.index_cast %c1_i32 : i32 to index
    %c0_34 = arith.constant 0 : index
    %c0_35 = arith.constant 0 : index
    %103 = vector.load %arg5[%102, %c0_34, %c0_35] : memref<8x8x128xf32, #tpu.memory_space<vmem>>, vector<1x8x128xf32>
    %104 = vector.shape_cast %103 : vector<1x8x128xf32> to vector<8x128xf32>
    %105 = vector.shape_cast %101 : vector<8x128xf32> to vector<1x8x128xf32>
    tpu.vector_store %arg5[%102, %c0_34, %c0_35], %105 {strides = array<i32>} : memref<8x8x128xf32, #tpu.memory_space<vmem>>, vector<1x8x128xf32>,
    %c2_i32 = arith.constant 2 : i32
    %106 = arith.index_cast %c2_i32 : i32 to index
    %c0_36 = arith.constant 0 : index
    %c0_37 = arith.constant 0 : index
    %107 = vector.load %arg2[%106, %c0_36, %c0_37] : memref<8x8x512xbf16, #tpu.memory_space<vmem>>, vector<1x8x512xbf16>
    %108 = vector.shape_cast %107 : vector<1x8x512xbf16> to vector<8x512xbf16>
    %109 = arith.extf %108 : vector<8x512xbf16> to vector<8x512xf32>
    %110 = arith.truncf %94 : vector<8x128xf32> to vector<8x128xbf16>
    %cst_38 = arith.constant dense<0.000000e+00> : vector<8x512xf32>
    %111 = tpu.matmul %110, %3, %cst_38 {dimension_numbers = #tpu.dot_dimension_numbers<[1], [0], [0], [1], [0, 0, 1, 1], [], []>} : vector<8x128xbf16>, vector<128x512xbf16>, vector<8x512xf32> -> vector<8x512xf32>
    %112 = arith.addf %109, %111 : vector<8x512xf32>
    %113 = vector.extract_strided_slice %112 {offsets = [0, 0], sizes = [8, 128], strides = [1, 1]} : vector<8x512xf32> to vector<8x128xf32>
    %cst_39 = arith.constant 5.000000e-01 : f32
    %114 = vector.broadcast %cst_39 : f32 to vector<8x128xf32>
    %115 = arith.mulf %114, %113 : vector<8x128xf32>
    %116 = math.tanh %115 : vector<8x128xf32>
    %cst_40 = arith.constant 1.000000e+00 : f32
    %117 = vector.broadcast %cst_40 : f32 to vector<8x128xf32>
    %118 = arith.addf %117, %116 : vector<8x128xf32>
    %cst_41 = arith.constant 5.000000e-01 : f32
    %119 = vector.broadcast %cst_41 : f32 to vector<8x128xf32>
    %120 = arith.mulf %119, %118 : vector<8x128xf32>
    %121 = vector.extract_strided_slice %112 {offsets = [0, 128], sizes = [8, 128], strides = [1, 1]} : vector<8x512xf32> to vector<8x128xf32>
    %cst_42 = arith.constant 5.000000e-01 : f32
    %122 = vector.broadcast %cst_42 : f32 to vector<8x128xf32>
    %123 = arith.mulf %122, %121 : vector<8x128xf32>
    %124 = math.tanh %123 : vector<8x128xf32>
    %cst_43 = arith.constant 1.000000e+00 : f32
    %125 = vector.broadcast %cst_43 : f32 to vector<8x128xf32>
    %126 = arith.addf %125, %124 : vector<8x128xf32>
    %cst_44 = arith.constant 5.000000e-01 : f32
    %127 = vector.broadcast %cst_44 : f32 to vector<8x128xf32>
    %128 = arith.mulf %127, %126 : vector<8x128xf32>
    %129 = vector.extract_strided_slice %112 {offsets = [0, 256], sizes = [8, 128], strides = [1, 1]} : vector<8x512xf32> to vector<8x128xf32>
    %130 = math.tanh %129 : vector<8x128xf32>
    %131 = vector.extract_strided_slice %112 {offsets = [0, 384], sizes = [8, 128], strides = [1, 1]} : vector<8x512xf32> to vector<8x128xf32>
    %cst_45 = arith.constant 5.000000e-01 : f32
    %132 = vector.broadcast %cst_45 : f32 to vector<8x128xf32>
    %133 = arith.mulf %132, %131 : vector<8x128xf32>
    %134 = math.tanh %133 : vector<8x128xf32>
    %cst_46 = arith.constant 1.000000e+00 : f32
    %135 = vector.broadcast %cst_46 : f32 to vector<8x128xf32>
    %136 = arith.addf %135, %134 : vector<8x128xf32>
    %cst_47 = arith.constant 5.000000e-01 : f32
    %137 = vector.broadcast %cst_47 : f32 to vector<8x128xf32>
    %138 = arith.mulf %137, %136 : vector<8x128xf32>
    %139 = arith.mulf %128, %92 : vector<8x128xf32>
    %140 = arith.mulf %120, %130 : vector<8x128xf32>
    %141 = arith.addf %139, %140 : vector<8x128xf32>
    %142 = math.tanh %141 : vector<8x128xf32>
    %143 = arith.mulf %138, %142 : vector<8x128xf32>
    %144 = arith.addi %5, %c2_i32 : i32
    %145 = vector.broadcast %144 : i32 to vector<8x1xi32>
    %146 = arith.cmpi slt, %145, %4 : vector<8x1xi32>
    %147 = arith.extui %146 : vector<8x1xi1> to vector<8x1xi32>
    %148 = arith.sitofp %147 : vector<8x1xi32> to vector<8x1xf32>
    %149 = vector.broadcast %148 : vector<8x1xf32> to vector<8x128xf32>
    %150 = arith.mulf %143, %149 : vector<8x128xf32>
    %151 = arith.index_cast %c2_i32 : i32 to index
    %c0_48 = arith.constant 0 : index
    %c0_49 = arith.constant 0 : index
    %152 = vector.load %arg5[%151, %c0_48, %c0_49] : memref<8x8x128xf32, #tpu.memory_space<vmem>>, vector<1x8x128xf32>
    %153 = vector.shape_cast %152 : vector<1x8x128xf32> to vector<8x128xf32>
    %154 = vector.shape_cast %150 : vector<8x128xf32> to vector<1x8x128xf32>
    tpu.vector_store %arg5[%151, %c0_48, %c0_49], %154 {strides = array<i32>} : memref<8x8x128xf32, #tpu.memory_space<vmem>>, vector<1x8x128xf32>,
    %c3_i32 = arith.constant 3 : i32
    %155 = arith.index_cast %c3_i32 : i32 to index
    %c0_50 = arith.constant 0 : index
    %c0_51 = arith.constant 0 : index
    %156 = vector.load %arg2[%155, %c0_50, %c0_51] : memref<8x8x512xbf16, #tpu.memory_space<vmem>>, vector<1x8x512xbf16>
    %157 = vector.shape_cast %156 : vector<1x8x512xbf16> to vector<8x512xbf16>
    %158 = arith.extf %157 : vector<8x512xbf16> to vector<8x512xf32>
    %159 = arith.truncf %143 : vector<8x128xf32> to vector<8x128xbf16>
    %cst_52 = arith.constant dense<0.000000e+00> : vector<8x512xf32>
    %160 = tpu.matmul %159, %3, %cst_52 {dimension_numbers = #tpu.dot_dimension_numbers<[1], [0], [0], [1], [0, 0, 1, 1], [], []>} : vector<8x128xbf16>, vector<128x512xbf16>, vector<8x512xf32> -> vector<8x512xf32>
    %161 = arith.addf %158, %160 : vector<8x512xf32>
    %162 = vector.extract_strided_slice %161 {offsets = [0, 0], sizes = [8, 128], strides = [1, 1]} : vector<8x512xf32> to vector<8x128xf32>
    %cst_53 = arith.constant 5.000000e-01 : f32
    %163 = vector.broadcast %cst_53 : f32 to vector<8x128xf32>
    %164 = arith.mulf %163, %162 : vector<8x128xf32>
    %165 = math.tanh %164 : vector<8x128xf32>
    %cst_54 = arith.constant 1.000000e+00 : f32
    %166 = vector.broadcast %cst_54 : f32 to vector<8x128xf32>
    %167 = arith.addf %166, %165 : vector<8x128xf32>
    %cst_55 = arith.constant 5.000000e-01 : f32
    %168 = vector.broadcast %cst_55 : f32 to vector<8x128xf32>
    %169 = arith.mulf %168, %167 : vector<8x128xf32>
    %170 = vector.extract_strided_slice %161 {offsets = [0, 128], sizes = [8, 128], strides = [1, 1]} : vector<8x512xf32> to vector<8x128xf32>
    %cst_56 = arith.constant 5.000000e-01 : f32
    %171 = vector.broadcast %cst_56 : f32 to vector<8x128xf32>
    %172 = arith.mulf %171, %170 : vector<8x128xf32>
    %173 = math.tanh %172 : vector<8x128xf32>
    %cst_57 = arith.constant 1.000000e+00 : f32
    %174 = vector.broadcast %cst_57 : f32 to vector<8x128xf32>
    %175 = arith.addf %174, %173 : vector<8x128xf32>
    %cst_58 = arith.constant 5.000000e-01 : f32
    %176 = vector.broadcast %cst_58 : f32 to vector<8x128xf32>
    %177 = arith.mulf %176, %175 : vector<8x128xf32>
    %178 = vector.extract_strided_slice %161 {offsets = [0, 256], sizes = [8, 128], strides = [1, 1]} : vector<8x512xf32> to vector<8x128xf32>
    %179 = math.tanh %178 : vector<8x128xf32>
    %180 = vector.extract_strided_slice %161 {offsets = [0, 384], sizes = [8, 128], strides = [1, 1]} : vector<8x512xf32> to vector<8x128xf32>
    %cst_59 = arith.constant 5.000000e-01 : f32
    %181 = vector.broadcast %cst_59 : f32 to vector<8x128xf32>
    %182 = arith.mulf %181, %180 : vector<8x128xf32>
    %183 = math.tanh %182 : vector<8x128xf32>
    %cst_60 = arith.constant 1.000000e+00 : f32
    %184 = vector.broadcast %cst_60 : f32 to vector<8x128xf32>
    %185 = arith.addf %184, %183 : vector<8x128xf32>
    %cst_61 = arith.constant 5.000000e-01 : f32
    %186 = vector.broadcast %cst_61 : f32 to vector<8x128xf32>
    %187 = arith.mulf %186, %185 : vector<8x128xf32>
    %188 = arith.mulf %177, %141 : vector<8x128xf32>
    %189 = arith.mulf %169, %179 : vector<8x128xf32>
    %190 = arith.addf %188, %189 : vector<8x128xf32>
    %191 = math.tanh %190 : vector<8x128xf32>
    %192 = arith.mulf %187, %191 : vector<8x128xf32>
    %193 = arith.addi %5, %c3_i32 : i32
    %194 = vector.broadcast %193 : i32 to vector<8x1xi32>
    %195 = arith.cmpi slt, %194, %4 : vector<8x1xi32>
    %196 = arith.extui %195 : vector<8x1xi1> to vector<8x1xi32>
    %197 = arith.sitofp %196 : vector<8x1xi32> to vector<8x1xf32>
    %198 = vector.broadcast %197 : vector<8x1xf32> to vector<8x128xf32>
    %199 = arith.mulf %192, %198 : vector<8x128xf32>
    %200 = arith.index_cast %c3_i32 : i32 to index
    %c0_62 = arith.constant 0 : index
    %c0_63 = arith.constant 0 : index
    %201 = vector.load %arg5[%200, %c0_62, %c0_63] : memref<8x8x128xf32, #tpu.memory_space<vmem>>, vector<1x8x128xf32>
    %202 = vector.shape_cast %201 : vector<1x8x128xf32> to vector<8x128xf32>
    %203 = vector.shape_cast %199 : vector<8x128xf32> to vector<1x8x128xf32>
    tpu.vector_store %arg5[%200, %c0_62, %c0_63], %203 {strides = array<i32>} : memref<8x8x128xf32, #tpu.memory_space<vmem>>, vector<1x8x128xf32>,
    %c4_i32 = arith.constant 4 : i32
    %204 = arith.index_cast %c4_i32 : i32 to index
    %c0_64 = arith.constant 0 : index
    %c0_65 = arith.constant 0 : index
    %205 = vector.load %arg2[%204, %c0_64, %c0_65] : memref<8x8x512xbf16, #tpu.memory_space<vmem>>, vector<1x8x512xbf16>
    %206 = vector.shape_cast %205 : vector<1x8x512xbf16> to vector<8x512xbf16>
    %207 = arith.extf %206 : vector<8x512xbf16> to vector<8x512xf32>
    %208 = arith.truncf %192 : vector<8x128xf32> to vector<8x128xbf16>
    %cst_66 = arith.constant dense<0.000000e+00> : vector<8x512xf32>
    %209 = tpu.matmul %208, %3, %cst_66 {dimension_numbers = #tpu.dot_dimension_numbers<[1], [0], [0], [1], [0, 0, 1, 1], [], []>} : vector<8x128xbf16>, vector<128x512xbf16>, vector<8x512xf32> -> vector<8x512xf32>
    %210 = arith.addf %207, %209 : vector<8x512xf32>
    %211 = vector.extract_strided_slice %210 {offsets = [0, 0], sizes = [8, 128], strides = [1, 1]} : vector<8x512xf32> to vector<8x128xf32>
    %cst_67 = arith.constant 5.000000e-01 : f32
    %212 = vector.broadcast %cst_67 : f32 to vector<8x128xf32>
    %213 = arith.mulf %212, %211 : vector<8x128xf32>
    %214 = math.tanh %213 : vector<8x128xf32>
    %cst_68 = arith.constant 1.000000e+00 : f32
    %215 = vector.broadcast %cst_68 : f32 to vector<8x128xf32>
    %216 = arith.addf %215, %214 : vector<8x128xf32>
    %cst_69 = arith.constant 5.000000e-01 : f32
    %217 = vector.broadcast %cst_69 : f32 to vector<8x128xf32>
    %218 = arith.mulf %217, %216 : vector<8x128xf32>
    %219 = vector.extract_strided_slice %210 {offsets = [0, 128], sizes = [8, 128], strides = [1, 1]} : vector<8x512xf32> to vector<8x128xf32>
    %cst_70 = arith.constant 5.000000e-01 : f32
    %220 = vector.broadcast %cst_70 : f32 to vector<8x128xf32>
    %221 = arith.mulf %220, %219 : vector<8x128xf32>
    %222 = math.tanh %221 : vector<8x128xf32>
    %cst_71 = arith.constant 1.000000e+00 : f32
    %223 = vector.broadcast %cst_71 : f32 to vector<8x128xf32>
    %224 = arith.addf %223, %222 : vector<8x128xf32>
    %cst_72 = arith.constant 5.000000e-01 : f32
    %225 = vector.broadcast %cst_72 : f32 to vector<8x128xf32>
    %226 = arith.mulf %225, %224 : vector<8x128xf32>
    %227 = vector.extract_strided_slice %210 {offsets = [0, 256], sizes = [8, 128], strides = [1, 1]} : vector<8x512xf32> to vector<8x128xf32>
    %228 = math.tanh %227 : vector<8x128xf32>
    %229 = vector.extract_strided_slice %210 {offsets = [0, 384], sizes = [8, 128], strides = [1, 1]} : vector<8x512xf32> to vector<8x128xf32>
    %cst_73 = arith.constant 5.000000e-01 : f32
    %230 = vector.broadcast %cst_73 : f32 to vector<8x128xf32>
    %231 = arith.mulf %230, %229 : vector<8x128xf32>
    %232 = math.tanh %231 : vector<8x128xf32>
    %cst_74 = arith.constant 1.000000e+00 : f32
    %233 = vector.broadcast %cst_74 : f32 to vector<8x128xf32>
    %234 = arith.addf %233, %232 : vector<8x128xf32>
    %cst_75 = arith.constant 5.000000e-01 : f32
    %235 = vector.broadcast %cst_75 : f32 to vector<8x128xf32>
    %236 = arith.mulf %235, %234 : vector<8x128xf32>
    %237 = arith.mulf %226, %190 : vector<8x128xf32>
    %238 = arith.mulf %218, %228 : vector<8x128xf32>
    %239 = arith.addf %237, %238 : vector<8x128xf32>
    %240 = math.tanh %239 : vector<8x128xf32>
    %241 = arith.mulf %236, %240 : vector<8x128xf32>
    %242 = arith.addi %5, %c4_i32 : i32
    %243 = vector.broadcast %242 : i32 to vector<8x1xi32>
    %244 = arith.cmpi slt, %243, %4 : vector<8x1xi32>
    %245 = arith.extui %244 : vector<8x1xi1> to vector<8x1xi32>
    %246 = arith.sitofp %245 : vector<8x1xi32> to vector<8x1xf32>
    %247 = vector.broadcast %246 : vector<8x1xf32> to vector<8x128xf32>
    %248 = arith.mulf %241, %247 : vector<8x128xf32>
    %249 = arith.index_cast %c4_i32 : i32 to index
    %c0_76 = arith.constant 0 : index
    %c0_77 = arith.constant 0 : index
    %250 = vector.load %arg5[%249, %c0_76, %c0_77] : memref<8x8x128xf32, #tpu.memory_space<vmem>>, vector<1x8x128xf32>
    %251 = vector.shape_cast %250 : vector<1x8x128xf32> to vector<8x128xf32>
    %252 = vector.shape_cast %248 : vector<8x128xf32> to vector<1x8x128xf32>
    tpu.vector_store %arg5[%249, %c0_76, %c0_77], %252 {strides = array<i32>} : memref<8x8x128xf32, #tpu.memory_space<vmem>>, vector<1x8x128xf32>,
    %c5_i32 = arith.constant 5 : i32
    %253 = arith.index_cast %c5_i32 : i32 to index
    %c0_78 = arith.constant 0 : index
    %c0_79 = arith.constant 0 : index
    %254 = vector.load %arg2[%253, %c0_78, %c0_79] : memref<8x8x512xbf16, #tpu.memory_space<vmem>>, vector<1x8x512xbf16>
    %255 = vector.shape_cast %254 : vector<1x8x512xbf16> to vector<8x512xbf16>
    %256 = arith.extf %255 : vector<8x512xbf16> to vector<8x512xf32>
    %257 = arith.truncf %241 : vector<8x128xf32> to vector<8x128xbf16>
    %cst_80 = arith.constant dense<0.000000e+00> : vector<8x512xf32>
    %258 = tpu.matmul %257, %3, %cst_80 {dimension_numbers = #tpu.dot_dimension_numbers<[1], [0], [0], [1], [0, 0, 1, 1], [], []>} : vector<8x128xbf16>, vector<128x512xbf16>, vector<8x512xf32> -> vector<8x512xf32>
    %259 = arith.addf %256, %258 : vector<8x512xf32>
    %260 = vector.extract_strided_slice %259 {offsets = [0, 0], sizes = [8, 128], strides = [1, 1]} : vector<8x512xf32> to vector<8x128xf32>
    %cst_81 = arith.constant 5.000000e-01 : f32
    %261 = vector.broadcast %cst_81 : f32 to vector<8x128xf32>
    %262 = arith.mulf %261, %260 : vector<8x128xf32>
    %263 = math.tanh %262 : vector<8x128xf32>
    %cst_82 = arith.constant 1.000000e+00 : f32
    %264 = vector.broadcast %cst_82 : f32 to vector<8x128xf32>
    %265 = arith.addf %264, %263 : vector<8x128xf32>
    %cst_83 = arith.constant 5.000000e-01 : f32
    %266 = vector.broadcast %cst_83 : f32 to vector<8x128xf32>
    %267 = arith.mulf %266, %265 : vector<8x128xf32>
    %268 = vector.extract_strided_slice %259 {offsets = [0, 128], sizes = [8, 128], strides = [1, 1]} : vector<8x512xf32> to vector<8x128xf32>
    %cst_84 = arith.constant 5.000000e-01 : f32
    %269 = vector.broadcast %cst_84 : f32 to vector<8x128xf32>
    %270 = arith.mulf %269, %268 : vector<8x128xf32>
    %271 = math.tanh %270 : vector<8x128xf32>
    %cst_85 = arith.constant 1.000000e+00 : f32
    %272 = vector.broadcast %cst_85 : f32 to vector<8x128xf32>
    %273 = arith.addf %272, %271 : vector<8x128xf32>
    %cst_86 = arith.constant 5.000000e-01 : f32
    %274 = vector.broadcast %cst_86 : f32 to vector<8x128xf32>
    %275 = arith.mulf %274, %273 : vector<8x128xf32>
    %276 = vector.extract_strided_slice %259 {offsets = [0, 256], sizes = [8, 128], strides = [1, 1]} : vector<8x512xf32> to vector<8x128xf32>
    %277 = math.tanh %276 : vector<8x128xf32>
    %278 = vector.extract_strided_slice %259 {offsets = [0, 384], sizes = [8, 128], strides = [1, 1]} : vector<8x512xf32> to vector<8x128xf32>
    %cst_87 = arith.constant 5.000000e-01 : f32
    %279 = vector.broadcast %cst_87 : f32 to vector<8x128xf32>
    %280 = arith.mulf %279, %278 : vector<8x128xf32>
    %281 = math.tanh %280 : vector<8x128xf32>
    %cst_88 = arith.constant 1.000000e+00 : f32
    %282 = vector.broadcast %cst_88 : f32 to vector<8x128xf32>
    %283 = arith.addf %282, %281 : vector<8x128xf32>
    %cst_89 = arith.constant 5.000000e-01 : f32
    %284 = vector.broadcast %cst_89 : f32 to vector<8x128xf32>
    %285 = arith.mulf %284, %283 : vector<8x128xf32>
    %286 = arith.mulf %275, %239 : vector<8x128xf32>
    %287 = arith.mulf %267, %277 : vector<8x128xf32>
    %288 = arith.addf %286, %287 : vector<8x128xf32>
    %289 = math.tanh %288 : vector<8x128xf32>
    %290 = arith.mulf %285, %289 : vector<8x128xf32>
    %291 = arith.addi %5, %c5_i32 : i32
    %292 = vector.broadcast %291 : i32 to vector<8x1xi32>
    %293 = arith.cmpi slt, %292, %4 : vector<8x1xi32>
    %294 = arith.extui %293 : vector<8x1xi1> to vector<8x1xi32>
    %295 = arith.sitofp %294 : vector<8x1xi32> to vector<8x1xf32>
    %296 = vector.broadcast %295 : vector<8x1xf32> to vector<8x128xf32>
    %297 = arith.mulf %290, %296 : vector<8x128xf32>
    %298 = arith.index_cast %c5_i32 : i32 to index
    %c0_90 = arith.constant 0 : index
    %c0_91 = arith.constant 0 : index
    %299 = vector.load %arg5[%298, %c0_90, %c0_91] : memref<8x8x128xf32, #tpu.memory_space<vmem>>, vector<1x8x128xf32>
    %300 = vector.shape_cast %299 : vector<1x8x128xf32> to vector<8x128xf32>
    %301 = vector.shape_cast %297 : vector<8x128xf32> to vector<1x8x128xf32>
    tpu.vector_store %arg5[%298, %c0_90, %c0_91], %301 {strides = array<i32>} : memref<8x8x128xf32, #tpu.memory_space<vmem>>, vector<1x8x128xf32>,
    %c6_i32 = arith.constant 6 : i32
    %302 = arith.index_cast %c6_i32 : i32 to index
    %c0_92 = arith.constant 0 : index
    %c0_93 = arith.constant 0 : index
    %303 = vector.load %arg2[%302, %c0_92, %c0_93] : memref<8x8x512xbf16, #tpu.memory_space<vmem>>, vector<1x8x512xbf16>
    %304 = vector.shape_cast %303 : vector<1x8x512xbf16> to vector<8x512xbf16>
    %305 = arith.extf %304 : vector<8x512xbf16> to vector<8x512xf32>
    %306 = arith.truncf %290 : vector<8x128xf32> to vector<8x128xbf16>
    %cst_94 = arith.constant dense<0.000000e+00> : vector<8x512xf32>
    %307 = tpu.matmul %306, %3, %cst_94 {dimension_numbers = #tpu.dot_dimension_numbers<[1], [0], [0], [1], [0, 0, 1, 1], [], []>} : vector<8x128xbf16>, vector<128x512xbf16>, vector<8x512xf32> -> vector<8x512xf32>
    %308 = arith.addf %305, %307 : vector<8x512xf32>
    %309 = vector.extract_strided_slice %308 {offsets = [0, 0], sizes = [8, 128], strides = [1, 1]} : vector<8x512xf32> to vector<8x128xf32>
    %cst_95 = arith.constant 5.000000e-01 : f32
    %310 = vector.broadcast %cst_95 : f32 to vector<8x128xf32>
    %311 = arith.mulf %310, %309 : vector<8x128xf32>
    %312 = math.tanh %311 : vector<8x128xf32>
    %cst_96 = arith.constant 1.000000e+00 : f32
    %313 = vector.broadcast %cst_96 : f32 to vector<8x128xf32>
    %314 = arith.addf %313, %312 : vector<8x128xf32>
    %cst_97 = arith.constant 5.000000e-01 : f32
    %315 = vector.broadcast %cst_97 : f32 to vector<8x128xf32>
    %316 = arith.mulf %315, %314 : vector<8x128xf32>
    %317 = vector.extract_strided_slice %308 {offsets = [0, 128], sizes = [8, 128], strides = [1, 1]} : vector<8x512xf32> to vector<8x128xf32>
    %cst_98 = arith.constant 5.000000e-01 : f32
    %318 = vector.broadcast %cst_98 : f32 to vector<8x128xf32>
    %319 = arith.mulf %318, %317 : vector<8x128xf32>
    %320 = math.tanh %319 : vector<8x128xf32>
    %cst_99 = arith.constant 1.000000e+00 : f32
    %321 = vector.broadcast %cst_99 : f32 to vector<8x128xf32>
    %322 = arith.addf %321, %320 : vector<8x128xf32>
    %cst_100 = arith.constant 5.000000e-01 : f32
    %323 = vector.broadcast %cst_100 : f32 to vector<8x128xf32>
    %324 = arith.mulf %323, %322 : vector<8x128xf32>
    %325 = vector.extract_strided_slice %308 {offsets = [0, 256], sizes = [8, 128], strides = [1, 1]} : vector<8x512xf32> to vector<8x128xf32>
    %326 = math.tanh %325 : vector<8x128xf32>
    %327 = vector.extract_strided_slice %308 {offsets = [0, 384], sizes = [8, 128], strides = [1, 1]} : vector<8x512xf32> to vector<8x128xf32>
    %cst_101 = arith.constant 5.000000e-01 : f32
    %328 = vector.broadcast %cst_101 : f32 to vector<8x128xf32>
    %329 = arith.mulf %328, %327 : vector<8x128xf32>
    %330 = math.tanh %329 : vector<8x128xf32>
    %cst_102 = arith.constant 1.000000e+00 : f32
    %331 = vector.broadcast %cst_102 : f32 to vector<8x128xf32>
    %332 = arith.addf %331, %330 : vector<8x128xf32>
    %cst_103 = arith.constant 5.000000e-01 : f32
    %333 = vector.broadcast %cst_103 : f32 to vector<8x128xf32>
    %334 = arith.mulf %333, %332 : vector<8x128xf32>
    %335 = arith.mulf %324, %288 : vector<8x128xf32>
    %336 = arith.mulf %316, %326 : vector<8x128xf32>
    %337 = arith.addf %335, %336 : vector<8x128xf32>
    %338 = math.tanh %337 : vector<8x128xf32>
    %339 = arith.mulf %334, %338 : vector<8x128xf32>
    %340 = arith.addi %5, %c6_i32 : i32
    %341 = vector.broadcast %340 : i32 to vector<8x1xi32>
    %342 = arith.cmpi slt, %341, %4 : vector<8x1xi32>
    %343 = arith.extui %342 : vector<8x1xi1> to vector<8x1xi32>
    %344 = arith.sitofp %343 : vector<8x1xi32> to vector<8x1xf32>
    %345 = vector.broadcast %344 : vector<8x1xf32> to vector<8x128xf32>
    %346 = arith.mulf %339, %345 : vector<8x128xf32>
    %347 = arith.index_cast %c6_i32 : i32 to index
    %c0_104 = arith.constant 0 : index
    %c0_105 = arith.constant 0 : index
    %348 = vector.load %arg5[%347, %c0_104, %c0_105] : memref<8x8x128xf32, #tpu.memory_space<vmem>>, vector<1x8x128xf32>
    %349 = vector.shape_cast %348 : vector<1x8x128xf32> to vector<8x128xf32>
    %350 = vector.shape_cast %346 : vector<8x128xf32> to vector<1x8x128xf32>
    tpu.vector_store %arg5[%347, %c0_104, %c0_105], %350 {strides = array<i32>} : memref<8x8x128xf32, #tpu.memory_space<vmem>>, vector<1x8x128xf32>,
    %c7_i32 = arith.constant 7 : i32
    %351 = arith.index_cast %c7_i32 : i32 to index
    %c0_106 = arith.constant 0 : index
    %c0_107 = arith.constant 0 : index
    %352 = vector.load %arg2[%351, %c0_106, %c0_107] : memref<8x8x512xbf16, #tpu.memory_space<vmem>>, vector<1x8x512xbf16>
    %353 = vector.shape_cast %352 : vector<1x8x512xbf16> to vector<8x512xbf16>
    %354 = arith.extf %353 : vector<8x512xbf16> to vector<8x512xf32>
    %355 = arith.truncf %339 : vector<8x128xf32> to vector<8x128xbf16>
    %cst_108 = arith.constant dense<0.000000e+00> : vector<8x512xf32>
    %356 = tpu.matmul %355, %3, %cst_108 {dimension_numbers = #tpu.dot_dimension_numbers<[1], [0], [0], [1], [0, 0, 1, 1], [], []>} : vector<8x128xbf16>, vector<128x512xbf16>, vector<8x512xf32> -> vector<8x512xf32>
    %357 = arith.addf %354, %356 : vector<8x512xf32>
    %358 = vector.extract_strided_slice %357 {offsets = [0, 0], sizes = [8, 128], strides = [1, 1]} : vector<8x512xf32> to vector<8x128xf32>
    %cst_109 = arith.constant 5.000000e-01 : f32
    %359 = vector.broadcast %cst_109 : f32 to vector<8x128xf32>
    %360 = arith.mulf %359, %358 : vector<8x128xf32>
    %361 = math.tanh %360 : vector<8x128xf32>
    %cst_110 = arith.constant 1.000000e+00 : f32
    %362 = vector.broadcast %cst_110 : f32 to vector<8x128xf32>
    %363 = arith.addf %362, %361 : vector<8x128xf32>
    %cst_111 = arith.constant 5.000000e-01 : f32
    %364 = vector.broadcast %cst_111 : f32 to vector<8x128xf32>
    %365 = arith.mulf %364, %363 : vector<8x128xf32>
    %366 = vector.extract_strided_slice %357 {offsets = [0, 128], sizes = [8, 128], strides = [1, 1]} : vector<8x512xf32> to vector<8x128xf32>
    %cst_112 = arith.constant 5.000000e-01 : f32
    %367 = vector.broadcast %cst_112 : f32 to vector<8x128xf32>
    %368 = arith.mulf %367, %366 : vector<8x128xf32>
    %369 = math.tanh %368 : vector<8x128xf32>
    %cst_113 = arith.constant 1.000000e+00 : f32
    %370 = vector.broadcast %cst_113 : f32 to vector<8x128xf32>
    %371 = arith.addf %370, %369 : vector<8x128xf32>
    %cst_114 = arith.constant 5.000000e-01 : f32
    %372 = vector.broadcast %cst_114 : f32 to vector<8x128xf32>
    %373 = arith.mulf %372, %371 : vector<8x128xf32>
    %374 = vector.extract_strided_slice %357 {offsets = [0, 256], sizes = [8, 128], strides = [1, 1]} : vector<8x512xf32> to vector<8x128xf32>
    %375 = math.tanh %374 : vector<8x128xf32>
    %376 = vector.extract_strided_slice %357 {offsets = [0, 384], sizes = [8, 128], strides = [1, 1]} : vector<8x512xf32> to vector<8x128xf32>
    %cst_115 = arith.constant 5.000000e-01 : f32
    %377 = vector.broadcast %cst_115 : f32 to vector<8x128xf32>
    %378 = arith.mulf %377, %376 : vector<8x128xf32>
    %379 = math.tanh %378 : vector<8x128xf32>
    %cst_116 = arith.constant 1.000000e+00 : f32
    %380 = vector.broadcast %cst_116 : f32 to vector<8x128xf32>
    %381 = arith.addf %380, %379 : vector<8x128xf32>
    %cst_117 = arith.constant 5.000000e-01 : f32
    %382 = vector.broadcast %cst_117 : f32 to vector<8x128xf32>
    %383 = arith.mulf %382, %381 : vector<8x128xf32>
    %384 = arith.mulf %373, %337 : vector<8x128xf32>
    %385 = arith.mulf %365, %375 : vector<8x128xf32>
    %386 = arith.addf %384, %385 : vector<8x128xf32>
    %387 = math.tanh %386 : vector<8x128xf32>
    %388 = arith.mulf %383, %387 : vector<8x128xf32>
    %389 = arith.addi %5, %c7_i32 : i32
    %390 = vector.broadcast %389 : i32 to vector<8x1xi32>
    %391 = arith.cmpi slt, %390, %4 : vector<8x1xi32>
    %392 = arith.extui %391 : vector<8x1xi1> to vector<8x1xi32>
    %393 = arith.sitofp %392 : vector<8x1xi32> to vector<8x1xf32>
    %394 = vector.broadcast %393 : vector<8x1xf32> to vector<8x128xf32>
    %395 = arith.mulf %388, %394 : vector<8x128xf32>
    %396 = arith.index_cast %c7_i32 : i32 to index
    %c0_118 = arith.constant 0 : index
    %c0_119 = arith.constant 0 : index
    %397 = vector.load %arg5[%396, %c0_118, %c0_119] : memref<8x8x128xf32, #tpu.memory_space<vmem>>, vector<1x8x128xf32>
    %398 = vector.shape_cast %397 : vector<1x8x128xf32> to vector<8x128xf32>
    %399 = vector.shape_cast %395 : vector<8x128xf32> to vector<1x8x128xf32>
    tpu.vector_store %arg5[%396, %c0_118, %c0_119], %399 {strides = array<i32>} : memref<8x8x128xf32, #tpu.memory_space<vmem>>, vector<1x8x128xf32>,
    %c8_i32_120 = arith.constant 8 : i32
    %c0_121 = arith.constant 0 : index
    %c0_122 = arith.constant 0 : index
    %400 = vector.load %arg6[%c0_121, %c0_122] : memref<8x128xf32, #tpu.memory_space<vmem>>, vector<8x128xf32>
    tpu.vector_store %arg6[%c0_121, %c0_122], %388 {strides = array<i32>} : memref<8x128xf32, #tpu.memory_space<vmem>>, vector<8x128xf32>,
    %c0_123 = arith.constant 0 : index
    %c0_124 = arith.constant 0 : index
    %401 = vector.load %arg7[%c0_123, %c0_124] : memref<8x128xf32, #tpu.memory_space<vmem>>, vector<8x128xf32>
    tpu.vector_store %arg7[%c0_123, %c0_124], %386 {strides = array<i32>} : memref<8x128xf32, #tpu.memory_space<vmem>>, vector<8x128xf32>,
    return
  }
  func.func @transform_0(%arg0: i32, %arg1: i32) -> (i32, i32, i32) {
    %c0_i32 = arith.constant 0 : i32
    %c0_i32_0 = arith.constant 0 : i32
    return %arg1, %arg0, %c0_i32 : i32, i32, i32
  }
  func.func @transform_1(%arg0: i32, %arg1: i32) -> (i32, i32) {
    %c0_i32 = arith.constant 0 : i32
    %c0_i32_0 = arith.constant 0 : i32
    %c0_i32_1 = arith.constant 0 : i32
    return %c0_i32, %c0_i32_0 : i32, i32
  }
  func.func @transform_2(%arg0: i32, %arg1: i32) -> (i32, i32) {
    %c0_i32 = arith.constant 0 : i32
    %c0_i32_0 = arith.constant 0 : i32
    return %arg0, %c0_i32 : i32, i32
  }
  func.func @transform_3(%arg0: i32, %arg1: i32) -> (i32, i32, i32) {
    %c0_i32 = arith.constant 0 : i32
    %c0_i32_0 = arith.constant 0 : i32
    return %arg1, %arg0, %c0_i32 : i32, i32, i32
  }
}

module attributes {stable_mosaic.version = 11 : i64} {
  func.func @_lstm_chunk_kernel(%arg0: i32, %arg1: i32, %arg2: memref<8x8x512xbf16, #tpu.memory_space<vmem>>, %arg3: memref<128x512xbf16, #tpu.memory_space<vmem>>, %arg4: memref<8x1xi32, #tpu.memory_space<vmem>>, %arg5: memref<8x8x128xf32, #tpu.memory_space<vmem>>, %arg6: memref<8x128xf32, #tpu.memory_space<vmem>>, %arg7: memref<8x128xf32, #tpu.memory_space<vmem>>) attributes {dimension_semantics = [#tpu.dimension_semantics<parallel>, #tpu.dimension_semantics<arbitrary>], iteration_bounds = array<i64: 1, 1>, scalar_prefetch = 0 : i64, scratch_operands = 2 : i64, tpu.core_type = #tpu.core_type<tc>, window_params = [{transform_indices = @transform_0, window_bounds = array<i64: 8, 8, 512>}, {pipeline_mode = #tpu.pipeline_mode<synchronous>, transform_indices = @transform_1, window_bounds = array<i64: 128, 512>}, {transform_indices = @transform_2, window_bounds = array<i64: 8, 1>}, {transform_indices = @transform_3, window_bounds = array<i64: 8, 8, 128>}]} {
    %c0_i32 = arith.constant 0 : i32
    %0 = arith.cmpi eq, %arg1, %c0_i32 : i32
    %1 = arith.extui %0 : i1 to i32
    %c0_i32_0 = arith.constant 0 : i32
    %2 = arith.cmpi ne, %1, %c0_i32_0 : i32
    scf.if %2 {
      %cst_125 = arith.constant 0.000000e+00 : f32
      %402 = vector.broadcast %cst_125 : f32 to vector<8x128xf32>
      %c0_126 = arith.constant 0 : index
      %c0_127 = arith.constant 0 : index
      %403 = vector.load %arg6[%c0_126, %c0_127] : memref<8x128xf32, #tpu.memory_space<vmem>>, vector<8x128xf32>
      tpu.vector_store %arg6[%c0_126, %c0_127], %402 {strides = array<i32>} : memref<8x128xf32, #tpu.memory_space<vmem>>, vector<8x128xf32>,
      %cst_128 = arith.constant 0.000000e+00 : f32
      %404 = vector.broadcast %cst_128 : f32 to vector<8x128xf32>
      %c0_129 = arith.constant 0 : index
      %c0_130 = arith.constant 0 : index
      %405 = vector.load %arg7[%c0_129, %c0_130] : memref<8x128xf32, #tpu.memory_space<vmem>>, vector<8x128xf32>
      tpu.vector_store %arg7[%c0_129, %c0_130], %404 {strides = array<i32>} : memref<8x128xf32, #tpu.memory_space<vmem>>, vector<8x128xf32>,
    } else {
    }
    %c0 = arith.constant 0 : index
    %c0_1 = arith.constant 0 : index
    %3 = vector.load %arg3[%c0, %c0_1] : memref<128x512xbf16, #tpu.memory_space<vmem>>, vector<128x512xbf16>
    %c0_2 = arith.constant 0 : index
    %c0_3 = arith.constant 0 : index
    %4 = vector.load %arg4[%c0_2, %c0_3] : memref<8x1xi32, #tpu.memory_space<vmem>>, vector<8x1xi32>
    %c8_i32 = arith.constant 8 : i32
    %5 = arith.muli %arg1, %c8_i32 : i32
    %c0_4 = arith.constant 0 : index
    %c0_5 = arith.constant 0 : index
    %6 = vector.load %arg6[%c0_4, %c0_5] : memref<8x128xf32, #tpu.memory_space<vmem>>, vector<8x128xf32>
    %c0_6 = arith.constant 0 : index
    %c0_7 = arith.constant 0 : index
    %7 = vector.load %arg7[%c0_6, %c0_7] : memref<8x128xf32, #tpu.memory_space<vmem>>, vector<8x128xf32>
    %c0_i32_8 = arith.constant 0 : i32
    %8 = arith.index_cast %c0_i32_8 : i32 to index
    %c0_9 = arith.constant 0 : index
    %c0_10 = arith.constant 0 : index
    %9 = vector.load %arg2[%8, %c0_9, %c0_10] : memref<8x8x512xbf16, #tpu.memory_space<vmem>>, vector<1x8x512xbf16>
    %10 = vector.shape_cast %9 : vector<1x8x512xbf16> to vector<8x512xbf16>
    %11 = arith.extf %10 : vector<8x512xbf16> to vector<8x512xf32>
    %12 = arith.truncf %6 : vector<8x128xf32> to vector<8x128xbf16>
    %cst = arith.constant dense<0.000000e+00> : vector<8x512xf32>
    %13 = tpu.matmul %12, %3, %cst {dimension_numbers = #tpu.dot_dimension_numbers<[1], [0], [0], [1], [0, 0, 1, 1], [], []>} : vector<8x128xbf16>, vector<128x512xbf16>, vector<8x512xf32> -> vector<8x512xf32>
    %14 = arith.addf %11, %13 : vector<8x512xf32>
    %15 = vector.extract_strided_slice %14 {offsets = [0, 0], sizes = [8, 128], strides = [1, 1]} : vector<8x512xf32> to vector<8x128xf32>
    %cst_11 = arith.constant 5.000000e-01 : f32
    %16 = vector.broadcast %cst_11 : f32 to vector<8x128xf32>
    %17 = arith.mulf %16, %15 : vector<8x128xf32>
    %18 = math.tanh %17 : vector<8x128xf32>
    %cst_12 = arith.constant 1.000000e+00 : f32
    %19 = vector.broadcast %cst_12 : f32 to vector<8x128xf32>
    %20 = arith.addf %19, %18 : vector<8x128xf32>
    %cst_13 = arith.constant 5.000000e-01 : f32
    %21 = vector.broadcast %cst_13 : f32 to vector<8x128xf32>
    %22 = arith.mulf %21, %20 : vector<8x128xf32>
    %23 = vector.extract_strided_slice %14 {offsets = [0, 128], sizes = [8, 128], strides = [1, 1]} : vector<8x512xf32> to vector<8x128xf32>
    %cst_14 = arith.constant 5.000000e-01 : f32
    %24 = vector.broadcast %cst_14 : f32 to vector<8x128xf32>
    %25 = arith.mulf %24, %23 : vector<8x128xf32>
    %26 = math.tanh %25 : vector<8x128xf32>
    %cst_15 = arith.constant 1.000000e+00 : f32
    %27 = vector.broadcast %cst_15 : f32 to vector<8x128xf32>
    %28 = arith.addf %27, %26 : vector<8x128xf32>
    %cst_16 = arith.constant 5.000000e-01 : f32
    %29 = vector.broadcast %cst_16 : f32 to vector<8x128xf32>
    %30 = arith.mulf %29, %28 : vector<8x128xf32>
    %31 = vector.extract_strided_slice %14 {offsets = [0, 256], sizes = [8, 128], strides = [1, 1]} : vector<8x512xf32> to vector<8x128xf32>
    %32 = math.tanh %31 : vector<8x128xf32>
    %33 = vector.extract_strided_slice %14 {offsets = [0, 384], sizes = [8, 128], strides = [1, 1]} : vector<8x512xf32> to vector<8x128xf32>
    %cst_17 = arith.constant 5.000000e-01 : f32
    %34 = vector.broadcast %cst_17 : f32 to vector<8x128xf32>
    %35 = arith.mulf %34, %33 : vector<8x128xf32>
    %36 = math.tanh %35 : vector<8x128xf32>
    %cst_18 = arith.constant 1.000000e+00 : f32
    %37 = vector.broadcast %cst_18 : f32 to vector<8x128xf32>
    %38 = arith.addf %37, %36 : vector<8x128xf32>
    %cst_19 = arith.constant 5.000000e-01 : f32
    %39 = vector.broadcast %cst_19 : f32 to vector<8x128xf32>
    %40 = arith.mulf %39, %38 : vector<8x128xf32>
    %41 = arith.mulf %30, %7 : vector<8x128xf32>
    %42 = arith.mulf %22, %32 : vector<8x128xf32>
    %43 = arith.addf %41, %42 : vector<8x128xf32>
    %44 = math.tanh %43 : vector<8x128xf32>
    %45 = arith.mulf %40, %44 : vector<8x128xf32>
    %46 = arith.addi %5, %c0_i32_8 : i32
    %47 = vector.broadcast %46 : i32 to vector<8x1xi32>
    %48 = arith.cmpi slt, %47, %4 : vector<8x1xi32>
    %49 = arith.extui %48 : vector<8x1xi1> to vector<8x1xi32>
    %50 = arith.sitofp %49 : vector<8x1xi32> to vector<8x1xf32>
    %51 = vector.broadcast %50 : vector<8x1xf32> to vector<8x128xf32>
    %52 = arith.mulf %45, %51 : vector<8x128xf32>
    %53 = arith.index_cast %c0_i32_8 : i32 to index
    %c0_20 = arith.constant 0 : index
    %c0_21 = arith.constant 0 : index
    %54 = vector.load %arg5[%53, %c0_20, %c0_21] : memref<8x8x128xf32, #tpu.memory_space<vmem>>, vector<1x8x128xf32>
    %55 = vector.shape_cast %54 : vector<1x8x128xf32> to vector<8x128xf32>
    %56 = vector.shape_cast %52 : vector<8x128xf32> to vector<1x8x128xf32>
    tpu.vector_store %arg5[%53, %c0_20, %c0_21], %56 {strides = array<i32>} : memref<8x8x128xf32, #tpu.memory_space<vmem>>, vector<1x8x128xf32>,
    %c1_i32 = arith.constant 1 : i32
    %57 = arith.index_cast %c1_i32 : i32 to index
    %c0_22 = arith.constant 0 : index
    %c0_23 = arith.constant 0 : index
    %58 = vector.load %arg2[%57, %c0_22, %c0_23] : memref<8x8x512xbf16, #tpu.memory_space<vmem>>, vector<1x8x512xbf16>
    %59 = vector.shape_cast %58 : vector<1x8x512xbf16> to vector<8x512xbf16>
    %60 = arith.extf %59 : vector<8x512xbf16> to vector<8x512xf32>
    %61 = arith.truncf %45 : vector<8x128xf32> to vector<8x128xbf16>
    %cst_24 = arith.constant dense<0.000000e+00> : vector<8x512xf32>
    %62 = tpu.matmul %61, %3, %cst_24 {dimension_numbers = #tpu.dot_dimension_numbers<[1], [0], [0], [1], [0, 0, 1, 1], [], []>} : vector<8x128xbf16>, vector<128x512xbf16>, vector<8x512xf32> -> vector<8x512xf32>
    %63 = arith.addf %60, %62 : vector<8x512xf32>
    %64 = vector.extract_strided_slice %63 {offsets = [0, 0], sizes = [8, 128], strides = [1, 1]} : vector<8x512xf32> to vector<8x128xf32>
    %cst_25 = arith.constant 5.000000e-01 : f32
    %65 = vector.broadcast %cst_25 : f32 to vector<8x128xf32>
    %66 = arith.mulf %65, %64 : vector<8x128xf32>
    %67 = math.tanh %66 : vector<8x128xf32>
    %cst_26 = arith.constant 1.000000e+00 : f32
    %68 = vector.broadcast %cst_26 : f32 to vector<8x128xf32>
    %69 = arith.addf %68, %67 : vector<8x128xf32>
    %cst_27 = arith.constant 5.000000e-01 : f32
    %70 = vector.broadcast %cst_27 : f32 to vector<8x128xf32>
    %71 = arith.mulf %70, %69 : vector<8x128xf32>
    %72 = vector.extract_strided_slice %63 {offsets = [0, 128], sizes = [8, 128], strides = [1, 1]} : vector<8x512xf32> to vector<8x128xf32>
    %cst_28 = arith.constant 5.000000e-01 : f32
    %73 = vector.broadcast %cst_28 : f32 to vector<8x128xf32>
    %74 = arith.mulf %73, %72 : vector<8x128xf32>
    %75 = math.tanh %74 : vector<8x128xf32>
    %cst_29 = arith.constant 1.000000e+00 : f32
    %76 = vector.broadcast %cst_29 : f32 to vector<8x128xf32>
    %77 = arith.addf %76, %75 : vector<8x128xf32>
    %cst_30 = arith.constant 5.000000e-01 : f32
    %78 = vector.broadcast %cst_30 : f32 to vector<8x128xf32>
    %79 = arith.mulf %78, %77 : vector<8x128xf32>
    %80 = vector.extract_strided_slice %63 {offsets = [0, 256], sizes = [8, 128], strides = [1, 1]} : vector<8x512xf32> to vector<8x128xf32>
    %81 = math.tanh %80 : vector<8x128xf32>
    %82 = vector.extract_strided_slice %63 {offsets = [0, 384], sizes = [8, 128], strides = [1, 1]} : vector<8x512xf32> to vector<8x128xf32>
    %cst_31 = arith.constant 5.000000e-01 : f32
    %83 = vector.broadcast %cst_31 : f32 to vector<8x128xf32>
    %84 = arith.mulf %83, %82 : vector<8x128xf32>
    %85 = math.tanh %84 : vector<8x128xf32>
    %cst_32 = arith.constant 1.000000e+00 : f32
    %86 = vector.broadcast %cst_32 : f32 to vector<8x128xf32>
    %87 = arith.addf %86, %85 : vector<8x128xf32>
    %cst_33 = arith.constant 5.000000e-01 : f32
    %88 = vector.broadcast %cst_33 : f32 to vector<8x128xf32>
    %89 = arith.mulf %88, %87 : vector<8x128xf32>
    %90 = arith.mulf %79, %43 : vector<8x128xf32>
    %91 = arith.mulf %71, %81 : vector<8x128xf32>
    %92 = arith.addf %90, %91 : vector<8x128xf32>
    %93 = math.tanh %92 : vector<8x128xf32>
    %94 = arith.mulf %89, %93 : vector<8x128xf32>
    %95 = arith.addi %5, %c1_i32 : i32
    %96 = vector.broadcast %95 : i32 to vector<8x1xi32>
    %97 = arith.cmpi slt, %96, %4 : vector<8x1xi32>
    %98 = arith.extui %97 : vector<8x1xi1> to vector<8x1xi32>
    %99 = arith.sitofp %98 : vector<8x1xi32> to vector<8x1xf32>
    %100 = vector.broadcast %99 : vector<8x1xf32> to vector<8x128xf32>
    %101 = arith.mulf %94, %100 : vector<8x128xf32>
    %102 = arith.index_cast %c1_i32 : i32 to index
    %c0_34 = arith.constant 0 : index
    %c0_35 = arith.constant 0 : index
    %103 = vector.load %arg5[%102, %c0_34, %c0_35] : memref<8x8x128xf32, #tpu.memory_space<vmem>>, vector<1x8x128xf32>
    %104 = vector.shape_cast %103 : vector<1x8x128xf32> to vector<8x128xf32>
    %105 = vector.shape_cast %101 : vector<8x128xf32> to vector<1x8x128xf32>
    tpu.vector_store %arg5[%102, %c0_34, %c0_35], %105 {strides = array<i32>} : memref<8x8x128xf32, #tpu.memory_space<vmem>>, vector<1x8x128xf32>,
    %c2_i32 = arith.constant 2 : i32
    %106 = arith.index_cast %c2_i32 : i32 to index
    %c0_36 = arith.constant 0 : index
    %c0_37 = arith.constant 0 : index
    %107 = vector.load %arg2[%106, %c0_36, %c0_37] : memref<8x8x512xbf16, #tpu.memory_space<vmem>>, vector<1x8x512xbf16>
    %108 = vector.shape_cast %107 : vector<1x8x512xbf16> to vector<8x512xbf16>
    %109 = arith.extf %108 : vector<8x512xbf16> to vector<8x512xf32>
    %110 = arith.truncf %94 : vector<8x128xf32> to vector<8x128xbf16>
    %cst_38 = arith.constant dense<0.000000e+00> : vector<8x512xf32>
    %111 = tpu.matmul %110, %3, %cst_38 {dimension_numbers = #tpu.dot_dimension_numbers<[1], [0], [0], [1], [0, 0, 1, 1], [], []>} : vector<8x128xbf16>, vector<128x512xbf16>, vector<8x512xf32> -> vector<8x512xf32>
    %112 = arith.addf %109, %111 : vector<8x512xf32>
    %113 = vector.extract_strided_slice %112 {offsets = [0, 0], sizes = [8, 128], strides = [1, 1]} : vector<8x512xf32> to vector<8x128xf32>
    %cst_39 = arith.constant 5.000000e-01 : f32
    %114 = vector.broadcast %cst_39 : f32 to vector<8x128xf32>
    %115 = arith.mulf %114, %113 : vector<8x128xf32>
    %116 = math.tanh %115 : vector<8x128xf32>
    %cst_40 = arith.constant 1.000000e+00 : f32
    %117 = vector.broadcast %cst_40 : f32 to vector<8x128xf32>
    %118 = arith.addf %117, %116 : vector<8x128xf32>
    %cst_41 = arith.constant 5.000000e-01 : f32
    %119 = vector.broadcast %cst_41 : f32 to vector<8x128xf32>
    %120 = arith.mulf %119, %118 : vector<8x128xf32>
    %121 = vector.extract_strided_slice %112 {offsets = [0, 128], sizes = [8, 128], strides = [1, 1]} : vector<8x512xf32> to vector<8x128xf32>
    %cst_42 = arith.constant 5.000000e-01 : f32
    %122 = vector.broadcast %cst_42 : f32 to vector<8x128xf32>
    %123 = arith.mulf %122, %121 : vector<8x128xf32>
    %124 = math.tanh %123 : vector<8x128xf32>
    %cst_43 = arith.constant 1.000000e+00 : f32
    %125 = vector.broadcast %cst_43 : f32 to vector<8x128xf32>
    %126 = arith.addf %125, %124 : vector<8x128xf32>
    %cst_44 = arith.constant 5.000000e-01 : f32
    %127 = vector.broadcast %cst_44 : f32 to vector<8x128xf32>
    %128 = arith.mulf %127, %126 : vector<8x128xf32>
    %129 = vector.extract_strided_slice %112 {offsets = [0, 256], sizes = [8, 128], strides = [1, 1]} : vector<8x512xf32> to vector<8x128xf32>
    %130 = math.tanh %129 : vector<8x128xf32>
    %131 = vector.extract_strided_slice %112 {offsets = [0, 384], sizes = [8, 128], strides = [1, 1]} : vector<8x512xf32> to vector<8x128xf32>
    %cst_45 = arith.constant 5.000000e-01 : f32
    %132 = vector.broadcast %cst_45 : f32 to vector<8x128xf32>
    %133 = arith.mulf %132, %131 : vector<8x128xf32>
    %134 = math.tanh %133 : vector<8x128xf32>
    %cst_46 = arith.constant 1.000000e+00 : f32
    %135 = vector.broadcast %cst_46 : f32 to vector<8x128xf32>
    %136 = arith.addf %135, %134 : vector<8x128xf32>
    %cst_47 = arith.constant 5.000000e-01 : f32
    %137 = vector.broadcast %cst_47 : f32 to vector<8x128xf32>
    %138 = arith.mulf %137, %136 : vector<8x128xf32>
    %139 = arith.mulf %128, %92 : vector<8x128xf32>
    %140 = arith.mulf %120, %130 : vector<8x128xf32>
    %141 = arith.addf %139, %140 : vector<8x128xf32>
    %142 = math.tanh %141 : vector<8x128xf32>
    %143 = arith.mulf %138, %142 : vector<8x128xf32>
    %144 = arith.addi %5, %c2_i32 : i32
    %145 = vector.broadcast %144 : i32 to vector<8x1xi32>
    %146 = arith.cmpi slt, %145, %4 : vector<8x1xi32>
    %147 = arith.extui %146 : vector<8x1xi1> to vector<8x1xi32>
    %148 = arith.sitofp %147 : vector<8x1xi32> to vector<8x1xf32>
    %149 = vector.broadcast %148 : vector<8x1xf32> to vector<8x128xf32>
    %150 = arith.mulf %143, %149 : vector<8x128xf32>
    %151 = arith.index_cast %c2_i32 : i32 to index
    %c0_48 = arith.constant 0 : index
    %c0_49 = arith.constant 0 : index
    %152 = vector.load %arg5[%151, %c0_48, %c0_49] : memref<8x8x128xf32, #tpu.memory_space<vmem>>, vector<1x8x128xf32>
    %153 = vector.shape_cast %152 : vector<1x8x128xf32> to vector<8x128xf32>
    %154 = vector.shape_cast %150 : vector<8x128xf32> to vector<1x8x128xf32>
    tpu.vector_store %arg5[%151, %c0_48, %c0_49], %154 {strides = array<i32>} : memref<8x8x128xf32, #tpu.memory_space<vmem>>, vector<1x8x128xf32>,
    %c3_i32 = arith.constant 3 : i32
    %155 = arith.index_cast %c3_i32 : i32 to index
    %c0_50 = arith.constant 0 : index
    %c0_51 = arith.constant 0 : index
    %156 = vector.load %arg2[%155, %c0_50, %c0_51] : memref<8x8x512xbf16, #tpu.memory_space<vmem>>, vector<1x8x512xbf16>
    %157 = vector.shape_cast %156 : vector<1x8x512xbf16> to vector<8x512xbf16>
    %158 = arith.extf %157 : vector<8x512xbf16> to vector<8x512xf32>
    %159 = arith.truncf %143 : vector<8x128xf32> to vector<8x128xbf16>
    %cst_52 = arith.constant dense<0.000000e+00> : vector<8x512xf32>
    %160 = tpu.matmul %159, %3, %cst_52 {dimension_numbers = #tpu.dot_dimension_numbers<[1], [0], [0], [1], [0, 0, 1, 1], [], []>} : vector<8x128xbf16>, vector<128x512xbf16>, vector<8x512xf32> -> vector<8x512xf32>
    %161 = arith.addf %158, %160 : vector<8x512xf32>
    %162 = vector.extract_strided_slice %161 {offsets = [0, 0], sizes = [8, 128], strides = [1, 1]} : vector<8x512xf32> to vector<8x128xf32>
    %cst_53 = arith.constant 5.000000e-01 : f32
    %163 = vector.broadcast %cst_53 : f32 to vector<8x128xf32>
    %164 = arith.mulf %163, %162 : vector<8x128xf32>
    %165 = math.tanh %164 : vector<8x128xf32>
    %cst_54 = arith.constant 1.000000e+00 : f32
    %166 = vector.broadcast %cst_54 : f32 to vector<8x128xf32>
    %167 = arith.addf %166, %165 : vector<8x128xf32>
    %cst_55 = arith.constant 5.000000e-01 : f32
    %168 = vector.broadcast %cst_55 : f32 to vector<8x128xf32>
    %169 = arith.mulf %168, %167 : vector<8x128xf32>
    %170 = vector.extract_strided_slice %161 {offsets = [0, 128], sizes = [8, 128], strides = [1, 1]} : vector<8x512xf32> to vector<8x128xf32>
    %cst_56 = arith.constant 5.000000e-01 : f32
    %171 = vector.broadcast %cst_56 : f32 to vector<8x128xf32>
    %172 = arith.mulf %171, %170 : vector<8x128xf32>
    %173 = math.tanh %172 : vector<8x128xf32>
    %cst_57 = arith.constant 1.000000e+00 : f32
    %174 = vector.broadcast %cst_57 : f32 to vector<8x128xf32>
    %175 = arith.addf %174, %173 : vector<8x128xf32>
    %cst_58 = arith.constant 5.000000e-01 : f32
    %176 = vector.broadcast %cst_58 : f32 to vector<8x128xf32>
    %177 = arith.mulf %176, %175 : vector<8x128xf32>
    %178 = vector.extract_strided_slice %161 {offsets = [0, 256], sizes = [8, 128], strides = [1, 1]} : vector<8x512xf32> to vector<8x128xf32>
    %179 = math.tanh %178 : vector<8x128xf32>
    %180 = vector.extract_strided_slice %161 {offsets = [0, 384], sizes = [8, 128], strides = [1, 1]} : vector<8x512xf32> to vector<8x128xf32>
    %cst_59 = arith.constant 5.000000e-01 : f32
    %181 = vector.broadcast %cst_59 : f32 to vector<8x128xf32>
    %182 = arith.mulf %181, %180 : vector<8x128xf32>
    %183 = math.tanh %182 : vector<8x128xf32>
    %cst_60 = arith.constant 1.000000e+00 : f32
    %184 = vector.broadcast %cst_60 : f32 to vector<8x128xf32>
    %185 = arith.addf %184, %183 : vector<8x128xf32>
    %cst_61 = arith.constant 5.000000e-01 : f32
    %186 = vector.broadcast %cst_61 : f32 to vector<8x128xf32>
    %187 = arith.mulf %186, %185 : vector<8x128xf32>
    %188 = arith.mulf %177, %141 : vector<8x128xf32>
    %189 = arith.mulf %169, %179 : vector<8x128xf32>
    %190 = arith.addf %188, %189 : vector<8x128xf32>
    %191 = math.tanh %190 : vector<8x128xf32>
    %192 = arith.mulf %187, %191 : vector<8x128xf32>
    %193 = arith.addi %5, %c3_i32 : i32
    %194 = vector.broadcast %193 : i32 to vector<8x1xi32>
    %195 = arith.cmpi slt, %194, %4 : vector<8x1xi32>
    %196 = arith.extui %195 : vector<8x1xi1> to vector<8x1xi32>
    %197 = arith.sitofp %196 : vector<8x1xi32> to vector<8x1xf32>
    %198 = vector.broadcast %197 : vector<8x1xf32> to vector<8x128xf32>
    %199 = arith.mulf %192, %198 : vector<8x128xf32>
    %200 = arith.index_cast %c3_i32 : i32 to index
    %c0_62 = arith.constant 0 : index
    %c0_63 = arith.constant 0 : index
    %201 = vector.load %arg5[%200, %c0_62, %c0_63] : memref<8x8x128xf32, #tpu.memory_space<vmem>>, vector<1x8x128xf32>
    %202 = vector.shape_cast %201 : vector<1x8x128xf32> to vector<8x128xf32>
    %203 = vector.shape_cast %199 : vector<8x128xf32> to vector<1x8x128xf32>
    tpu.vector_store %arg5[%200, %c0_62, %c0_63], %203 {strides = array<i32>} : memref<8x8x128xf32, #tpu.memory_space<vmem>>, vector<1x8x128xf32>,
    %c4_i32 = arith.constant 4 : i32
    %204 = arith.index_cast %c4_i32 : i32 to index
    %c0_64 = arith.constant 0 : index
    %c0_65 = arith.constant 0 : index
    %205 = vector.load %arg2[%204, %c0_64, %c0_65] : memref<8x8x512xbf16, #tpu.memory_space<vmem>>, vector<1x8x512xbf16>
    %206 = vector.shape_cast %205 : vector<1x8x512xbf16> to vector<8x512xbf16>
    %207 = arith.extf %206 : vector<8x512xbf16> to vector<8x512xf32>
    %208 = arith.truncf %192 : vector<8x128xf32> to vector<8x128xbf16>
    %cst_66 = arith.constant dense<0.000000e+00> : vector<8x512xf32>
    %209 = tpu.matmul %208, %3, %cst_66 {dimension_numbers = #tpu.dot_dimension_numbers<[1], [0], [0], [1], [0, 0, 1, 1], [], []>} : vector<8x128xbf16>, vector<128x512xbf16>, vector<8x512xf32> -> vector<8x512xf32>
    %210 = arith.addf %207, %209 : vector<8x512xf32>
    %211 = vector.extract_strided_slice %210 {offsets = [0, 0], sizes = [8, 128], strides = [1, 1]} : vector<8x512xf32> to vector<8x128xf32>
    %cst_67 = arith.constant 5.000000e-01 : f32
    %212 = vector.broadcast %cst_67 : f32 to vector<8x128xf32>
    %213 = arith.mulf %212, %211 : vector<8x128xf32>
    %214 = math.tanh %213 : vector<8x128xf32>
    %cst_68 = arith.constant 1.000000e+00 : f32
    %215 = vector.broadcast %cst_68 : f32 to vector<8x128xf32>
    %216 = arith.addf %215, %214 : vector<8x128xf32>
    %cst_69 = arith.constant 5.000000e-01 : f32
    %217 = vector.broadcast %cst_69 : f32 to vector<8x128xf32>
    %218 = arith.mulf %217, %216 : vector<8x128xf32>
    %219 = vector.extract_strided_slice %210 {offsets = [0, 128], sizes = [8, 128], strides = [1, 1]} : vector<8x512xf32> to vector<8x128xf32>
    %cst_70 = arith.constant 5.000000e-01 : f32
    %220 = vector.broadcast %cst_70 : f32 to vector<8x128xf32>
    %221 = arith.mulf %220, %219 : vector<8x128xf32>
    %222 = math.tanh %221 : vector<8x128xf32>
    %cst_71 = arith.constant 1.000000e+00 : f32
    %223 = vector.broadcast %cst_71 : f32 to vector<8x128xf32>
    %224 = arith.addf %223, %222 : vector<8x128xf32>
    %cst_72 = arith.constant 5.000000e-01 : f32
    %225 = vector.broadcast %cst_72 : f32 to vector<8x128xf32>
    %226 = arith.mulf %225, %224 : vector<8x128xf32>
    %227 = vector.extract_strided_slice %210 {offsets = [0, 256], sizes = [8, 128], strides = [1, 1]} : vector<8x512xf32> to vector<8x128xf32>
    %228 = math.tanh %227 : vector<8x128xf32>
    %229 = vector.extract_strided_slice %210 {offsets = [0, 384], sizes = [8, 128], strides = [1, 1]} : vector<8x512xf32> to vector<8x128xf32>
    %cst_73 = arith.constant 5.000000e-01 : f32
    %230 = vector.broadcast %cst_73 : f32 to vector<8x128xf32>
    %231 = arith.mulf %230, %229 : vector<8x128xf32>
    %232 = math.tanh %231 : vector<8x128xf32>
    %cst_74 = arith.constant 1.000000e+00 : f32
    %233 = vector.broadcast %cst_74 : f32 to vector<8x128xf32>
    %234 = arith.addf %233, %232 : vector<8x128xf32>
    %cst_75 = arith.constant 5.000000e-01 : f32
    %235 = vector.broadcast %cst_75 : f32 to vector<8x128xf32>
    %236 = arith.mulf %235, %234 : vector<8x128xf32>
    %237 = arith.mulf %226, %190 : vector<8x128xf32>
    %238 = arith.mulf %218, %228 : vector<8x128xf32>
    %239 = arith.addf %237, %238 : vector<8x128xf32>
    %240 = math.tanh %239 : vector<8x128xf32>
    %241 = arith.mulf %236, %240 : vector<8x128xf32>
    %242 = arith.addi %5, %c4_i32 : i32
    %243 = vector.broadcast %242 : i32 to vector<8x1xi32>
    %244 = arith.cmpi slt, %243, %4 : vector<8x1xi32>
    %245 = arith.extui %244 : vector<8x1xi1> to vector<8x1xi32>
    %246 = arith.sitofp %245 : vector<8x1xi32> to vector<8x1xf32>
    %247 = vector.broadcast %246 : vector<8x1xf32> to vector<8x128xf32>
    %248 = arith.mulf %241, %247 : vector<8x128xf32>
    %249 = arith.index_cast %c4_i32 : i32 to index
    %c0_76 = arith.constant 0 : index
    %c0_77 = arith.constant 0 : index
    %250 = vector.load %arg5[%249, %c0_76, %c0_77] : memref<8x8x128xf32, #tpu.memory_space<vmem>>, vector<1x8x128xf32>
    %251 = vector.shape_cast %250 : vector<1x8x128xf32> to vector<8x128xf32>
    %252 = vector.shape_cast %248 : vector<8x128xf32> to vector<1x8x128xf32>
    tpu.vector_store %arg5[%249, %c0_76, %c0_77], %252 {strides = array<i32>} : memref<8x8x128xf32, #tpu.memory_space<vmem>>, vector<1x8x128xf32>,
    %c5_i32 = arith.constant 5 : i32
    %253 = arith.index_cast %c5_i32 : i32 to index
    %c0_78 = arith.constant 0 : index
    %c0_79 = arith.constant 0 : index
    %254 = vector.load %arg2[%253, %c0_78, %c0_79] : memref<8x8x512xbf16, #tpu.memory_space<vmem>>, vector<1x8x512xbf16>
    %255 = vector.shape_cast %254 : vector<1x8x512xbf16> to vector<8x512xbf16>
    %256 = arith.extf %255 : vector<8x512xbf16> to vector<8x512xf32>
    %257 = arith.truncf %241 : vector<8x128xf32> to vector<8x128xbf16>
    %cst_80 = arith.constant dense<0.000000e+00> : vector<8x512xf32>
    %258 = tpu.matmul %257, %3, %cst_80 {dimension_numbers = #tpu.dot_dimension_numbers<[1], [0], [0], [1], [0, 0, 1, 1], [], []>} : vector<8x128xbf16>, vector<128x512xbf16>, vector<8x512xf32> -> vector<8x512xf32>
    %259 = arith.addf %256, %258 : vector<8x512xf32>
    %260 = vector.extract_strided_slice %259 {offsets = [0, 0], sizes = [8, 128], strides = [1, 1]} : vector<8x512xf32> to vector<8x128xf32>
    %cst_81 = arith.constant 5.000000e-01 : f32
    %261 = vector.broadcast %cst_81 : f32 to vector<8x128xf32>
    %262 = arith.mulf %261, %260 : vector<8x128xf32>
    %263 = math.tanh %262 : vector<8x128xf32>
    %cst_82 = arith.constant 1.000000e+00 : f32
    %264 = vector.broadcast %cst_82 : f32 to vector<8x128xf32>
    %265 = arith.addf %264, %263 : vector<8x128xf32>
    %cst_83 = arith.constant 5.000000e-01 : f32
    %266 = vector.broadcast %cst_83 : f32 to vector<8x128xf32>
    %267 = arith.mulf %266, %265 : vector<8x128xf32>
    %268 = vector.extract_strided_slice %259 {offsets = [0, 128], sizes = [8, 128], strides = [1, 1]} : vector<8x512xf32> to vector<8x128xf32>
    %cst_84 = arith.constant 5.000000e-01 : f32
    %269 = vector.broadcast %cst_84 : f32 to vector<8x128xf32>
    %270 = arith.mulf %269, %268 : vector<8x128xf32>
    %271 = math.tanh %270 : vector<8x128xf32>
    %cst_85 = arith.constant 1.000000e+00 : f32
    %272 = vector.broadcast %cst_85 : f32 to vector<8x128xf32>
    %273 = arith.addf %272, %271 : vector<8x128xf32>
    %cst_86 = arith.constant 5.000000e-01 : f32
    %274 = vector.broadcast %cst_86 : f32 to vector<8x128xf32>
    %275 = arith.mulf %274, %273 : vector<8x128xf32>
    %276 = vector.extract_strided_slice %259 {offsets = [0, 256], sizes = [8, 128], strides = [1, 1]} : vector<8x512xf32> to vector<8x128xf32>
    %277 = math.tanh %276 : vector<8x128xf32>
    %278 = vector.extract_strided_slice %259 {offsets = [0, 384], sizes = [8, 128], strides = [1, 1]} : vector<8x512xf32> to vector<8x128xf32>
    %cst_87 = arith.constant 5.000000e-01 : f32
    %279 = vector.broadcast %cst_87 : f32 to vector<8x128xf32>
    %280 = arith.mulf %279, %278 : vector<8x128xf32>
    %281 = math.tanh %280 : vector<8x128xf32>
    %cst_88 = arith.constant 1.000000e+00 : f32
    %282 = vector.broadcast %cst_88 : f32 to vector<8x128xf32>
    %283 = arith.addf %282, %281 : vector<8x128xf32>
    %cst_89 = arith.constant 5.000000e-01 : f32
    %284 = vector.broadcast %cst_89 : f32 to vector<8x128xf32>
    %285 = arith.mulf %284, %283 : vector<8x128xf32>
    %286 = arith.mulf %275, %239 : vector<8x128xf32>
    %287 = arith.mulf %267, %277 : vector<8x128xf32>
    %288 = arith.addf %286, %287 : vector<8x128xf32>
    %289 = math.tanh %288 : vector<8x128xf32>
    %290 = arith.mulf %285, %289 : vector<8x128xf32>
    %291 = arith.addi %5, %c5_i32 : i32
    %292 = vector.broadcast %291 : i32 to vector<8x1xi32>
    %293 = arith.cmpi slt, %292, %4 : vector<8x1xi32>
    %294 = arith.extui %293 : vector<8x1xi1> to vector<8x1xi32>
    %295 = arith.sitofp %294 : vector<8x1xi32> to vector<8x1xf32>
    %296 = vector.broadcast %295 : vector<8x1xf32> to vector<8x128xf32>
    %297 = arith.mulf %290, %296 : vector<8x128xf32>
    %298 = arith.index_cast %c5_i32 : i32 to index
    %c0_90 = arith.constant 0 : index
    %c0_91 = arith.constant 0 : index
    %299 = vector.load %arg5[%298, %c0_90, %c0_91] : memref<8x8x128xf32, #tpu.memory_space<vmem>>, vector<1x8x128xf32>
    %300 = vector.shape_cast %299 : vector<1x8x128xf32> to vector<8x128xf32>
    %301 = vector.shape_cast %297 : vector<8x128xf32> to vector<1x8x128xf32>
    tpu.vector_store %arg5[%298, %c0_90, %c0_91], %301 {strides = array<i32>} : memref<8x8x128xf32, #tpu.memory_space<vmem>>, vector<1x8x128xf32>,
    %c6_i32 = arith.constant 6 : i32
    %302 = arith.index_cast %c6_i32 : i32 to index
    %c0_92 = arith.constant 0 : index
    %c0_93 = arith.constant 0 : index
    %303 = vector.load %arg2[%302, %c0_92, %c0_93] : memref<8x8x512xbf16, #tpu.memory_space<vmem>>, vector<1x8x512xbf16>
    %304 = vector.shape_cast %303 : vector<1x8x512xbf16> to vector<8x512xbf16>
    %305 = arith.extf %304 : vector<8x512xbf16> to vector<8x512xf32>
    %306 = arith.truncf %290 : vector<8x128xf32> to vector<8x128xbf16>
    %cst_94 = arith.constant dense<0.000000e+00> : vector<8x512xf32>
    %307 = tpu.matmul %306, %3, %cst_94 {dimension_numbers = #tpu.dot_dimension_numbers<[1], [0], [0], [1], [0, 0, 1, 1], [], []>} : vector<8x128xbf16>, vector<128x512xbf16>, vector<8x512xf32> -> vector<8x512xf32>
    %308 = arith.addf %305, %307 : vector<8x512xf32>
    %309 = vector.extract_strided_slice %308 {offsets = [0, 0], sizes = [8, 128], strides = [1, 1]} : vector<8x512xf32> to vector<8x128xf32>
    %cst_95 = arith.constant 5.000000e-01 : f32
    %310 = vector.broadcast %cst_95 : f32 to vector<8x128xf32>
    %311 = arith.mulf %310, %309 : vector<8x128xf32>
    %312 = math.tanh %311 : vector<8x128xf32>
    %cst_96 = arith.constant 1.000000e+00 : f32
    %313 = vector.broadcast %cst_96 : f32 to vector<8x128xf32>
    %314 = arith.addf %313, %312 : vector<8x128xf32>
    %cst_97 = arith.constant 5.000000e-01 : f32
    %315 = vector.broadcast %cst_97 : f32 to vector<8x128xf32>
    %316 = arith.mulf %315, %314 : vector<8x128xf32>
    %317 = vector.extract_strided_slice %308 {offsets = [0, 128], sizes = [8, 128], strides = [1, 1]} : vector<8x512xf32> to vector<8x128xf32>
    %cst_98 = arith.constant 5.000000e-01 : f32
    %318 = vector.broadcast %cst_98 : f32 to vector<8x128xf32>
    %319 = arith.mulf %318, %317 : vector<8x128xf32>
    %320 = math.tanh %319 : vector<8x128xf32>
    %cst_99 = arith.constant 1.000000e+00 : f32
    %321 = vector.broadcast %cst_99 : f32 to vector<8x128xf32>
    %322 = arith.addf %321, %320 : vector<8x128xf32>
    %cst_100 = arith.constant 5.000000e-01 : f32
    %323 = vector.broadcast %cst_100 : f32 to vector<8x128xf32>
    %324 = arith.mulf %323, %322 : vector<8x128xf32>
    %325 = vector.extract_strided_slice %308 {offsets = [0, 256], sizes = [8, 128], strides = [1, 1]} : vector<8x512xf32> to vector<8x128xf32>
    %326 = math.tanh %325 : vector<8x128xf32>
    %327 = vector.extract_strided_slice %308 {offsets = [0, 384], sizes = [8, 128], strides = [1, 1]} : vector<8x512xf32> to vector<8x128xf32>
    %cst_101 = arith.constant 5.000000e-01 : f32
    %328 = vector.broadcast %cst_101 : f32 to vector<8x128xf32>
    %329 = arith.mulf %328, %327 : vector<8x128xf32>
    %330 = math.tanh %329 : vector<8x128xf32>
    %cst_102 = arith.constant 1.000000e+00 : f32
    %331 = vector.broadcast %cst_102 : f32 to vector<8x128xf32>
    %332 = arith.addf %331, %330 : vector<8x128xf32>
    %cst_103 = arith.constant 5.000000e-01 : f32
    %333 = vector.broadcast %cst_103 : f32 to vector<8x128xf32>
    %334 = arith.mulf %333, %332 : vector<8x128xf32>
    %335 = arith.mulf %324, %288 : vector<8x128xf32>
    %336 = arith.mulf %316, %326 : vector<8x128xf32>
    %337 = arith.addf %335, %336 : vector<8x128xf32>
    %338 = math.tanh %337 : vector<8x128xf32>
    %339 = arith.mulf %334, %338 : vector<8x128xf32>
    %340 = arith.addi %5, %c6_i32 : i32
    %341 = vector.broadcast %340 : i32 to vector<8x1xi32>
    %342 = arith.cmpi slt, %341, %4 : vector<8x1xi32>
    %343 = arith.extui %342 : vector<8x1xi1> to vector<8x1xi32>
    %344 = arith.sitofp %343 : vector<8x1xi32> to vector<8x1xf32>
    %345 = vector.broadcast %344 : vector<8x1xf32> to vector<8x128xf32>
    %346 = arith.mulf %339, %345 : vector<8x128xf32>
    %347 = arith.index_cast %c6_i32 : i32 to index
    %c0_104 = arith.constant 0 : index
    %c0_105 = arith.constant 0 : index
    %348 = vector.load %arg5[%347, %c0_104, %c0_105] : memref<8x8x128xf32, #tpu.memory_space<vmem>>, vector<1x8x128xf32>
    %349 = vector.shape_cast %348 : vector<1x8x128xf32> to vector<8x128xf32>
    %350 = vector.shape_cast %346 : vector<8x128xf32> to vector<1x8x128xf32>
    tpu.vector_store %arg5[%347, %c0_104, %c0_105], %350 {strides = array<i32>} : memref<8x8x128xf32, #tpu.memory_space<vmem>>, vector<1x8x128xf32>,
    %c7_i32 = arith.constant 7 : i32
    %351 = arith.index_cast %c7_i32 : i32 to index
    %c0_106 = arith.constant 0 : index
    %c0_107 = arith.constant 0 : index
    %352 = vector.load %arg2[%351, %c0_106, %c0_107] : memref<8x8x512xbf16, #tpu.memory_space<vmem>>, vector<1x8x512xbf16>
    %353 = vector.shape_cast %352 : vector<1x8x512xbf16> to vector<8x512xbf16>
    %354 = arith.extf %353 : vector<8x512xbf16> to vector<8x512xf32>
    %355 = arith.truncf %339 : vector<8x128xf32> to vector<8x128xbf16>
    %cst_108 = arith.constant dense<0.000000e+00> : vector<8x512xf32>
    %356 = tpu.matmul %355, %3, %cst_108 {dimension_numbers = #tpu.dot_dimension_numbers<[1], [0], [0], [1], [0, 0, 1, 1], [], []>} : vector<8x128xbf16>, vector<128x512xbf16>, vector<8x512xf32> -> vector<8x512xf32>
    %357 = arith.addf %354, %356 : vector<8x512xf32>
    %358 = vector.extract_strided_slice %357 {offsets = [0, 0], sizes = [8, 128], strides = [1, 1]} : vector<8x512xf32> to vector<8x128xf32>
    %cst_109 = arith.constant 5.000000e-01 : f32
    %359 = vector.broadcast %cst_109 : f32 to vector<8x128xf32>
    %360 = arith.mulf %359, %358 : vector<8x128xf32>
    %361 = math.tanh %360 : vector<8x128xf32>
    %cst_110 = arith.constant 1.000000e+00 : f32
    %362 = vector.broadcast %cst_110 : f32 to vector<8x128xf32>
    %363 = arith.addf %362, %361 : vector<8x128xf32>
    %cst_111 = arith.constant 5.000000e-01 : f32
    %364 = vector.broadcast %cst_111 : f32 to vector<8x128xf32>
    %365 = arith.mulf %364, %363 : vector<8x128xf32>
    %366 = vector.extract_strided_slice %357 {offsets = [0, 128], sizes = [8, 128], strides = [1, 1]} : vector<8x512xf32> to vector<8x128xf32>
    %cst_112 = arith.constant 5.000000e-01 : f32
    %367 = vector.broadcast %cst_112 : f32 to vector<8x128xf32>
    %368 = arith.mulf %367, %366 : vector<8x128xf32>
    %369 = math.tanh %368 : vector<8x128xf32>
    %cst_113 = arith.constant 1.000000e+00 : f32
    %370 = vector.broadcast %cst_113 : f32 to vector<8x128xf32>
    %371 = arith.addf %370, %369 : vector<8x128xf32>
    %cst_114 = arith.constant 5.000000e-01 : f32
    %372 = vector.broadcast %cst_114 : f32 to vector<8x128xf32>
    %373 = arith.mulf %372, %371 : vector<8x128xf32>
    %374 = vector.extract_strided_slice %357 {offsets = [0, 256], sizes = [8, 128], strides = [1, 1]} : vector<8x512xf32> to vector<8x128xf32>
    %375 = math.tanh %374 : vector<8x128xf32>
    %376 = vector.extract_strided_slice %357 {offsets = [0, 384], sizes = [8, 128], strides = [1, 1]} : vector<8x512xf32> to vector<8x128xf32>
    %cst_115 = arith.constant 5.000000e-01 : f32
    %377 = vector.broadcast %cst_115 : f32 to vector<8x128xf32>
    %378 = arith.mulf %377, %376 : vector<8x128xf32>
    %379 = math.tanh %378 : vector<8x128xf32>
    %cst_116 = arith.constant 1.000000e+00 : f32
    %380 = vector.broadcast %cst_116 : f32 to vector<8x128xf32>
    %381 = arith.addf %380, %379 : vector<8x128xf32>
    %cst_117 = arith.constant 5.000000e-01 : f32
    %382 = vector.broadcast %cst_117 : f32 to vector<8x128xf32>
    %383 = arith.mulf %382, %381 : vector<8x128xf32>
    %384 = arith.mulf %373, %337 : vector<8x128xf32>
    %385 = arith.mulf %365, %375 : vector<8x128xf32>
    %386 = arith.addf %384, %385 : vector<8x128xf32>
    %387 = math.tanh %386 : vector<8x128xf32>
    %388 = arith.mulf %383, %387 : vector<8x128xf32>
    %389 = arith.addi %5, %c7_i32 : i32
    %390 = vector.broadcast %389 : i32 to vector<8x1xi32>
    %391 = arith.cmpi slt, %390, %4 : vector<8x1xi32>
    %392 = arith.extui %391 : vector<8x1xi1> to vector<8x1xi32>
    %393 = arith.sitofp %392 : vector<8x1xi32> to vector<8x1xf32>
    %394 = vector.broadcast %393 : vector<8x1xf32> to vector<8x128xf32>
    %395 = arith.mulf %388, %394 : vector<8x128xf32>
    %396 = arith.index_cast %c7_i32 : i32 to index
    %c0_118 = arith.constant 0 : index
    %c0_119 = arith.constant 0 : index
    %397 = vector.load %arg5[%396, %c0_118, %c0_119] : memref<8x8x128xf32, #tpu.memory_space<vmem>>, vector<1x8x128xf32>
    %398 = vector.shape_cast %397 : vector<1x8x128xf32> to vector<8x128xf32>
    %399 = vector.shape_cast %395 : vector<8x128xf32> to vector<1x8x128xf32>
    tpu.vector_store %arg5[%396, %c0_118, %c0_119], %399 {strides = array<i32>} : memref<8x8x128xf32, #tpu.memory_space<vmem>>, vector<1x8x128xf32>,
    %c8_i32_120 = arith.constant 8 : i32
    %c0_121 = arith.constant 0 : index
    %c0_122 = arith.constant 0 : index
    %400 = vector.load %arg6[%c0_121, %c0_122] : memref<8x128xf32, #tpu.memory_space<vmem>>, vector<8x128xf32>
    tpu.vector_store %arg6[%c0_121, %c0_122], %388 {strides = array<i32>} : memref<8x128xf32, #tpu.memory_space<vmem>>, vector<8x128xf32>,
    %c0_123 = arith.constant 0 : index
    %c0_124 = arith.constant 0 : index
    %401 = vector.load %arg7[%c0_123, %c0_124] : memref<8x128xf32, #tpu.memory_space<vmem>>, vector<8x128xf32>
    tpu.vector_store %arg7[%c0_123, %c0_124], %386 {strides = array<i32>} : memref<8x128xf32, #tpu.memory_space<vmem>>, vector<8x128xf32>,
    return
  }
  func.func @transform_0(%arg0: i32, %arg1: i32) -> (i32, i32, i32) {
    %c0_i32 = arith.constant 0 : i32
    %c0_i32_0 = arith.constant 0 : i32
    return %arg1, %arg0, %c0_i32 : i32, i32, i32
  }
  func.func @transform_1(%arg0: i32, %arg1: i32) -> (i32, i32) {
    %c0_i32 = arith.constant 0 : i32
    %c0_i32_0 = arith.constant 0 : i32
    %c0_i32_1 = arith.constant 0 : i32
    return %c0_i32, %c0_i32_0 : i32, i32
  }
  func.func @transform_2(%arg0: i32, %arg1: i32) -> (i32, i32) {
    %c0_i32 = arith.constant 0 : i32
    %c0_i32_0 = arith.constant 0 : i32
    return %arg0, %c0_i32 : i32, i32
  }
  func.func @transform_3(%arg0: i32, %arg1: i32) -> (i32, i32, i32) {
    %c0_i32 = arith.constant 0 : i32
    %c0_i32_0 = arith.constant 0 : i32
    return %arg1, %arg0, %c0_i32 : i32, i32, i32
  }
}

</mosaic_0001>

<bundles_post_ra>
// kernel: tpu_custom_call.1
= control target key start
LH: loop header
LB: loop body
LE: loop exit
PB: predicated region body
PF: predicated region fallthrough
CT: control target
= control target key end

     0   :  { %8 = vsyncpa [#allocation5], 0  ;;  %s2025_s0 = inlined_call_operand.hbm [shape: bf16[8,8,512], index: 0, kind: input, shape index: {}]   ;;  %s2026_s1 = inlined_call_operand.hbm [shape: bf16[128,512], index: 1, kind: input, shape index: {}]   ;;  %s2027_s2 = inlined_call_operand.vmem [shape: s32[8,1], index: 2, kind: input, shape index: {}]   ;;  %s2028_s3 = inlined_call_operand.hbm [shape: f32[8,8,128], index: 3, kind: output, shape index: {}]  }
   0x1   :  { %9 = vsyncpa [#allocation8], 0 }
   0x2   :  { %10 = vsyncpa [#allocation6], 0  ;;  %s1575_s12 = smov [#allocation4]   ;;  %s1503_s16 = scalar_lea.hbm %s2025_s0, 2048 }
   0x3   :  { %s16_s13 = sshll.u32 %s1575_s12, 4  ;;  %p1504_p0 = scmp.ne.s32.totalorder %s2025_s0, %s1503_s16  ;;  %s17_s13 = int_to_ptr.vmem [resolvable:$true] %s16_s13 }
   0x4   :  { %p1507_p1 = scmp.lt.u32.totalorder %s1503_s16, %s2025_s0 }
   0x6   :  { %p1509_p2 = pnand %p1507_p1, %p1504_p0 }
   0x8   :  { %1512 = shalt.err (!%p1509_p2)
}
   0x9   :  { %s1513_s21 = scalar_lea.vmem %s17_s13, 2048  ;;  %p1518_p4 = scmp.lt.s32.totalorder %s17_s13, %s17_s13 }
   0xa   :  { %p1514_p3 = scmp.ne.s32.totalorder %s17_s13, %s1513_s21  ;;  %p1519_p5 = scmp.lt.s32.totalorder %s1513_s21, %s1513_s21 }
   0xc   :  { %p1520_p6 = por %p1519_p5, %p1518_p4 }
   0xe   :  { %p1521_p7 = pnand %p1520_p6, %p1514_p3 }
  0x10   :  { %1524 = shalt.err (!%p1521_p7)
}
  0x11   :  { %s1576_s22 = smov 256   ;;  %s1577_s23 = smov 16  }
  0x12   :  { %22 = dma.hbm_to_vmem [thread:$0]  %s2025_s0, 2048, %s17_s13, [#allocation5], %s1576_s22, %s1576_s22, %s1577_s23  }
  0x13   :  { %s1578_s26 = smov [#allocation7]   ;;  %s1525_s30 = scalar_lea.hbm %s2026_s1, 4096 }
  0x14   :  { %s28_s27 = sshll.u32 %s1578_s26, 4  ;;  %p1526_p8 = scmp.ne.s32.totalorder %s2026_s1, %s1525_s30  ;;  %s29_s27 = int_to_ptr.vmem [resolvable:$true] %s28_s27 }
  0x15   :  { %p1529_p9 = scmp.lt.u32.totalorder %s1525_s30, %s2026_s1 }
  0x17   :  { %p1531_p10 = pnand %p1529_p9, %p1526_p8 }
  0x19   :  { %1534 = shalt.err (!%p1531_p10)
}
  0x1a   :  { %s1535_s8 = scalar_lea.vmem %s29_s27, 4096  ;;  %p1540_p12 = scmp.lt.s32.totalorder %s29_s27, %s29_s27 }
  0x1b   :  { %p1536_p11 = scmp.ne.s32.totalorder %s29_s27, %s1535_s8  ;;  %p1541_p13 = scmp.lt.s32.totalorder %s1535_s8, %s1535_s8 }
  0x1d   :  { %p1542_p0 = por %p1541_p13, %p1540_p12 }
  0x1f   :  { %p1543_p1 = pnand %p1542_p0, %p1536_p11 }
  0x21   :  { %1546 = shalt.err (!%p1543_p1)
}
  0x22   :  { %34 = dma.hbm_to_vmem [thread:$0]  %s2026_s1, 4096, %s29_s27, [#allocation8], %s1576_s22, %s1576_s22, %s1577_s23  }
  0x23   :  { %1569 = dma.done.wait [#allocation5], 2048  }
  0x24   :  { %1570 = vsyncadd [#allocation5], 4294965248 }
  0x25   :  { %1571 = dma.done.wait [#allocation8], 4096  }
  0x26   :  { %1572 = vsyncadd [#allocation8], 4294963200  ;;  %v1579_v0 = vmov 0   ;;  %v1633_v1 = vld [vmem:[#allocation7 + $0x4] ss:$16 sps:$4 sm:$0xff]   ;;  %v1580_v29 = vmov 0.0  }
  0x27   :  { %285 = vmatprep.mubr.bf16.mxu0 %v1579_v0  ;;  %326 = vmatprep.mubr.bf16.mxu1 %v1579_v0  ;;  %v1635_v2 = vld [vmem:[#allocation7] ss:$16 sps:$4 sm:$0xff]   ;;  %v1638_v3 = vld [vmem:[#allocation7 + $0x24] ss:$16 sps:$4 sm:$0xff]   ;;  %v1641_v4 = vld [vmem:[#allocation7 + $0xc] ss:$16 sps:$4 sm:$0xff]  }
  0x28   :  { %1321 = vset.pattern.permute.xlu0 %v1579_v0  ;;  %1332 = vset.pattern.permute.xlu1 %v1579_v0  ;;  %v1643_v5 = vld [vmem:[#allocation7 + $0x20] ss:$16 sps:$4 sm:$0xff]   ;;  %v1645_v6 = vld [vmem:[#allocation7 + $0x8] ss:$16 sps:$4 sm:$0xff]   ;;  %v1648_v7 = vld [vmem:[#allocation7 + $0x44] ss:$16 sps:$4 sm:$0xff]  }
  0x29   :  { %253 = vmatprep.subr.bf16.mxu0 %v1633_v1  ;;  %294 = vmatprep.subr.bf16.mxu1 %v1641_v4  ;;  %v1651_v8 = vld [vmem:[#allocation7 + $0x2c] ss:$16 sps:$4 sm:$0xff]   ;;  %v1654_v9 = vld [vmem:[#allocation7 + $0x28] ss:$16 sps:$4 sm:$0xff]   ;;  %v1658_v10 = vld [vmem:[#allocation7 + $0x40] ss:$16 sps:$4 sm:$0xff]  }
  0x2a   :  { %254 = vmatpush1.bf16.msra.mxu0 %v1635_v2  ;;  %295 = vmatpush1.bf16.msra.mxu1 %v1645_v6  ;;  %v1661_v11 = vld [vmem:[#allocation7 + $0x64] ss:$16 sps:$4 sm:$0xff]   ;;  %v1663_v12 = vld [vmem:[#allocation7 + $0x4c] ss:$16 sps:$4 sm:$0xff]   ;;  %v1666_v13 = vld [vmem:[#allocation7 + $0x48] ss:$16 sps:$4 sm:$0xff]  }
  0x2b   :  { %255 = vmatprep.subr.bf16.mxu0 %v1638_v3  ;;  %296 = vmatprep.subr.bf16.mxu1 %v1651_v8  ;;  %v1670_v14 = vld [vmem:[#allocation7 + $0x60] ss:$16 sps:$4 sm:$0xff]   ;;  %v1672_v15 = vld [vmem:[#allocation7 + $0x6c] ss:$16 sps:$4 sm:$0xff]   ;;  %v1675_v16 = vld [vmem:[#allocation7 + $0x84] ss:$16 sps:$4 sm:$0xff]  }
  0x2c   :  { %v1678_v17 = vld [vmem:[#allocation7 + $0x80] ss:$16 sps:$4 sm:$0xff]   ;;  %v1680_v18 = vld [vmem:[#allocation7 + $0x68] ss:$16 sps:$4 sm:$0xff]   ;;  %v1684_v19 = vld [vmem:[#allocation7 + $0x8c] ss:$16 sps:$4 sm:$0xff]  }
  0x2d   :  { %v1687_v20 = vld [vmem:[#allocation7 + $0xa4] ss:$16 sps:$4 sm:$0xff]   ;;  %v1690_v21 = vld [vmem:[#allocation7 + $0x88] ss:$16 sps:$4 sm:$0xff]   ;;  %v1694_v22 = vld [vmem:[#allocation7 + $0xa0] ss:$16 sps:$4 sm:$0xff]  }
  0x2e   :  { %256 = vmatpush1.bf16.msra.mxu0 %v1643_v5  ;;  %297 = vmatpush1.bf16.msra.mxu1 %v1654_v9  ;;  %v1696_v23 = vld [vmem:[#allocation7 + $0xac] ss:$16 sps:$4 sm:$0xff]   ;;  %v1699_v24 = vld [vmem:[#allocation7 + $0xc4] ss:$16 sps:$4 sm:$0xff]   ;;  %v1707_v26 = vld [vmem:[#allocation7 + $0xa8] ss:$16 sps:$4 sm:$0xff]  }
  0x2f   :  { %257 = vmatprep.subr.bf16.mxu0 %v1648_v7  ;;  %298 = vmatprep.subr.bf16.mxu1 %v1663_v12  ;;  %v1704_v25 = vld [vmem:[%s2027_s2] sm:$0xff]  ;;  %v1715_v28 = vld [vmem:[#allocation7 + $0xcc] ss:$16 sps:$4 sm:$0xff]   ;;  %v1723_v34 = vld [vmem:[#allocation7 + $0xc8] ss:$16 sps:$4 sm:$0xff]   ;;  %v1581_v38 = vmov 0.0|0.0  }
  0x30   :  { %vm1295_vm0 = vcmp.gt.s32.totalorder %v1704_v25, 0  ;;  %vm1297_vm1 = vcmp.gt.s32.totalorder %v1704_v25, 1  ;;  %v1713_v27 = vld [vmem:[#allocation7 + $0xc0] ss:$16 sps:$4 sm:$0xff]   ;;  %v1720_v32 = vld [vmem:[#allocation7 + $0xe4] ss:$16 sps:$4 sm:$0xff]  }
  0x31   :  { %v1296_v30 = vsel %vm1295_vm0, 1.0, %v1580_v29  ;;  %v1298_v31 = vsel %vm1297_vm1, 1.0, %v1580_v29  ;;  %v1727_v35 = vld [vmem:[#allocation7 + $0xe0] ss:$16 sps:$4 sm:$0xff]   ;;  %v1729_v36 = vld [vmem:[#allocation7 + $0xec] ss:$16 sps:$4 sm:$0xff]  }
  0x32   :  { %258 = vmatpush1.bf16.msra.mxu0 %v1658_v10  ;;  %299 = vmatpush1.bf16.msra.mxu1 %v1666_v13  ;;  %v1322_v33 = vpack.i.bf16 %v1298_v31, %v1296_v30  ;;  %v1733_v37 = vld [vmem:[#allocation7 + $0xe8] ss:$16 sps:$4 sm:$0xff]   ;;  %v86_v39 = vld [vmem:[#allocation4] sm:$0xff]  ;;  %vm1299_vm2 = vcmp.gt.s32.totalorder %v1704_v25, 2  ;;  %vm1301_vm3 = vcmp.gt.s32.totalorder %v1704_v25, 3  ;;  %vm1303_vm4 = vcmp.gt.s32.totalorder %v1704_v25, 4 }
  0x33   :  { %259 = vmatprep.subr.bf16.mxu0 %v1661_v11  ;;  %300 = vmatprep.subr.bf16.mxu1 %v1672_v15  ;;  %v88_v40 = vunpack.c.l.bf16 %v86_v39  ;;  %v87_v41 = vld [vmem:[#allocation4 + $0x8] sm:$0xff]  ;;  %v89_v42 = vunpack.c.h.bf16 %v86_v39  ;;  %vm1305_vm5 = vcmp.gt.s32.totalorder %v1704_v25, 5  ;;  %vm1307_vm6 = vcmp.gt.s32.totalorder %v1704_v25, 6  ;;  %s1582_s2 = smov [#allocation9]  }
  0x34   :  { %1323 = vperm.xlu0 %1321, %v1322_v33   ;;  %v90_v44 = vunpack.c.l.bf16 %v87_v41  ;;  %v91_v55 = vunpack.c.h.bf16 %v87_v41  ;;  %vm1309_vm7 = vcmp.gt.s32.totalorder %v1704_v25, 7  ;;  %s1250_s11 = sshll.u32 %s1582_s2, 4  ;;  %s1251_s11 = int_to_ptr.vmem [resolvable:$true] %s1250_s11 }
  0x35   :  { %s1547_s12 = scalar_lea.vmem %s1251_s11, 1024  ;;  %p1552_p3 = scmp.lt.s32.totalorder %s1251_s11, %s1251_s11 }
  0x36   :  { %260 = vmatpush1.bf16.msra.mxu0 %v1670_v14  ;;  %301 = vmatpush1.bf16.msra.mxu1 %v1680_v18  ;;  %p1548_p2 = scmp.ne.s32.totalorder %s1251_s11, %s1547_s12  ;;  %p1553_p4 = scmp.lt.s32.totalorder %s1547_s12, %s1547_s12 }
  0x37   :  { %261 = vmatprep.subr.bf16.mxu0 %v1675_v16  ;;  %302 = vmatprep.subr.bf16.mxu1 %v1684_v19 }
  0x38   :  { %p1554_p5 = por %p1553_p4, %p1552_p3 }
  0x3a   :  { %262 = vmatpush1.bf16.msra.mxu0 %v1678_v17  ;;  %303 = vmatpush1.bf16.msra.mxu1 %v1690_v21  ;;  %p1555_p6 = pnand %p1554_p5, %p1548_p2 }
  0x3b   :  { %263 = vmatprep.subr.bf16.mxu0 %v1687_v20  ;;  %304 = vmatprep.subr.bf16.mxu1 %v1696_v23 }
  0x3e   :  { %264 = vmatpush1.bf16.msra.mxu0 %v1694_v22  ;;  %305 = vmatpush1.bf16.msra.mxu1 %v1707_v26 }
  0x3f   :  { %265 = vmatprep.subr.bf16.mxu0 %v1699_v24  ;;  %306 = vmatprep.subr.bf16.mxu1 %v1715_v28 }
  0x42   :  { %266 = vmatpush1.bf16.msra.mxu0 %v1713_v27  ;;  %307 = vmatpush1.bf16.msra.mxu1 %v1723_v34 }
  0x43   :  { %267 = vmatprep.subr.bf16.mxu0 %v1720_v32  ;;  %308 = vmatprep.subr.bf16.mxu1 %v1729_v36 }
  0x46   :  { %268 = vmatpush1.bf16.msra.mxu0 %v1727_v35  ;;  %309 = vmatpush1.bf16.msra.mxu1 %v1733_v37 }
  0x47   :  { %376 = vmatprep.subr.bf16.mxu0 %v1633_v1  ;;  %417 = vmatprep.subr.bf16.mxu1 %v1641_v4 }
  0x49   :  { %286 = vmatmul.mubr.bf16.vlgmr.msra.gmra.mrb[0].mxu0 %v1581_v38  ;;  %327 = vmatmul.mubr.bf16.vlgmr.msra.gmra.mrb[0].mxu1 %v1581_v38 }
  0x4a   :  { %377 = vmatpush1.bf16.msra.mxu0 %v1635_v2  ;;  %408 = vmatprep.mubr.bf16.mxu0 %v1579_v0 }
  0x4b   :  { %378 = vmatprep.subr.bf16.mxu0 %v1638_v3  ;;  %418 = vmatpush1.bf16.msra.mxu1 %v1645_v6 }
  0x4c   :  { %449 = vmatprep.mubr.bf16.mxu1 %v1579_v0  ;;  %419 = vmatprep.subr.bf16.mxu1 %v1651_v8 }
  0x4e   :  { %379 = vmatpush1.bf16.msra.mxu0 %v1643_v5 }
  0x4f   :  { %380 = vmatprep.subr.bf16.mxu0 %v1648_v7  ;;  %420 = vmatpush1.bf16.msra.mxu1 %v1654_v9 }
  0x50   :  { %421 = vmatprep.subr.bf16.mxu1 %v1663_v12 }
  0x52   :  { %381 = vmatpush1.bf16.msra.mxu0 %v1658_v10 }
  0x53   :  { %382 = vmatprep.subr.bf16.mxu0 %v1661_v11  ;;  %422 = vmatpush1.bf16.msra.mxu1 %v1666_v13 }
  0x54   :  { %423 = vmatprep.subr.bf16.mxu1 %v1672_v15 }
  0x56   :  { %383 = vmatpush1.bf16.msra.mxu0 %v1670_v14 }
  0x57   :  { %384 = vmatprep.subr.bf16.mxu0 %v1675_v16  ;;  %424 = vmatpush1.bf16.msra.mxu1 %v1680_v18 }
  0x58   :  { %425 = vmatprep.subr.bf16.mxu1 %v1684_v19 }
  0x5a   :  { %385 = vmatpush1.bf16.msra.mxu0 %v1678_v17 }
  0x5b   :  { %386 = vmatprep.subr.bf16.mxu0 %v1687_v20  ;;  %426 = vmatpush1.bf16.msra.mxu1 %v1690_v21 }
  0x5c   :  { %427 = vmatprep.subr.bf16.mxu1 %v1696_v23 }
  0x5e   :  { %387 = vmatpush1.bf16.msra.mxu0 %v1694_v22 }
  0x5f   :  { %388 = vmatprep.subr.bf16.mxu0 %v1699_v24  ;;  %428 = vmatpush1.bf16.msra.mxu1 %v1707_v26 }
  0x60   :  { %429 = vmatprep.subr.bf16.mxu1 %v1715_v28 }
  0x62   :  { %389 = vmatpush1.bf16.msra.mxu0 %v1713_v27 }
  0x63   :  { %390 = vmatprep.subr.bf16.mxu0 %v1720_v32  ;;  %430 = vmatpush1.bf16.msra.mxu1 %v1723_v34 }
  0x64   :  { %431 = vmatprep.subr.bf16.mxu1 %v1729_v36 }
  0x66   :  { %391 = vmatpush1.bf16.msra.mxu0 %v1727_v35 }
  0x67   :  { %501 = vmatprep.subr.bf16.mxu0 %v1633_v1  ;;  %432 = vmatpush1.bf16.msra.mxu1 %v1733_v37 }
  0x68   :  { %542 = vmatprep.subr.bf16.mxu1 %v1641_v4 }
 0x11c   :  { %v287_v43 = vpop.f32.mrb[0].mxu0  ;;  %v328_v51 = vpop.f32.mrb[0].mxu1 }
 0x11d   :  { %v335_v45 = vadd.f32 %v287_v43, %v88_v40  ;;  %v289_v46 = vpop.f32.mrb[1].mxu0  ;;  %v337_v53 = vadd.f32 %v328_v51, %v90_v44  ;;  %v330_v54 = vpop.f32.mrb[1].mxu1  ;;  %v1302_v51 = vsel %vm1301_vm3, 1.0, %v1580_v29 }
 0x11e   :  { %v336_v47 = vadd.f32 %v289_v46, %v89_v42  ;;  %v291_v48 = vpop.f32.mrb[2].mxu0  ;;  %v332_v56 = vpop.f32.mrb[2].mxu1  ;;  %v338_v58 = vadd.f32 %v330_v54, %v91_v55  ;;  %v370_v55 = vld [vmem:[#allocation4 + $0x18] sm:$0xff] }
 0x11f   :  { %v339_v49 = vmul.f32 0.5, %v335_v45  ;;  %v292_v50 = vpop.f32.mrb[3].mxu0  ;;  %v333_v57 = vpop.f32.mrb[3].mxu1 }
 0x120   :  { %v343_v52 = vmul.f32 0.5, %v336_v47  ;;  %v348_v59 = vmul.f32 0.5, %v338_v58  ;;  %v1777_v43 = vpop.permute.xlu0 %1323  ;;  %v1300_v50 = vsel %vm1299_vm2, 1.0, %v1580_v29 }
 0x121   :  { %1391 = vtanh.f32 %v339_v49  ;;  %v1325_v45 = vunpack.i.l.bf16 %v1777_v43 }
 0x122   :  { %1393 = vtanh.f32 %v343_v52  ;;  %v1327_v52 = vpack.i.bf16 %v1302_v51, %v1300_v50 }
 0x123   :  { %1395 = vtanh.f32 %v337_v53  ;;  %v369_v53 = vld [vmem:[#allocation4 + $0x10] sm:$0xff] }
 0x124   :  { %1397 = vtanh.f32 %v348_v59  ;;  %1328 = vperm.xlu0 %1321, %v1327_v52   ;;  %v371_v54 = vunpack.c.l.bf16 %v369_v53  ;;  %v372_v56 = vunpack.c.h.bf16 %v369_v53 }
 0x12b   :  { %v1392_v60 = vpop.eup %1391 }
 0x12c   :  { %v1394_v61 = vpop.eup %1393  ;;  %v341_v62 = vadd.f32 1.0, %v1392_v60  ;;  %v373_v60 = vunpack.c.l.bf16 %v370_v55 }
 0x12d   :  { %v1396_v63 = vpop.eup %1395  ;;  %v345_v30 = vadd.f32 1.0, %v1394_v61 }
 0x12e   :  { %v342_v31 = vmul.f32 0.5, %v341_v62  ;;  %v1398_v41 = vpop.eup %1397 }
 0x12f   :  { %v346_v33 = vmul.f32 0.5, %v345_v30  ;;  %v350_v42 = vadd.f32 1.0, %v1398_v41 }
 0x130   :  { %v353_v38 = vmul.f32 %v1396_v63, %v342_v31 }
 0x131   :  { %v352_v39 = vmul.f32 0.0, %v346_v33  ;;  %v351_v44 = vmul.f32 0.5, %v350_v42 }
 0x133   :  { %v1774_v40 = vadd.f32 %v353_v38, %v352_v39 }
 0x135   :  { %1399 = vtanh.f32 %v1774_v40 }
 0x13f   :  { %v1400_v46 = vpop.eup %1399 }
 0x140   :  { %v356_v47 = vmul.f32 %v1400_v46, %v351_v44  ;;  %v374_v44 = vunpack.c.h.bf16 %v370_v55 }
 0x142   :  { %v366_v48 = vmul.f32 %v1325_v45, %v356_v47  ;;  %v375_v49 = vpack.c.bf16 %v356_v47, %v356_v47 }
 0x144   :  { %367 = vst [vmem:[#allocation9] sm:$0xff] %v366_v48  ;;  %409 = vmatmul.mubr.bf16.vlgmr.msra.gmra.mrb[4].mxu0 %v375_v49  ;;  %450 = vmatmul.mubr.bf16.vlgmr.msra.gmra.mrb[4].mxu1 %v375_v49 }
 0x145   :  { %502 = vmatpush1.bf16.msra.mxu0 %v1635_v2  ;;  %543 = vmatpush1.bf16.msra.mxu1 %v1645_v6 }
 0x146   :  { %503 = vmatprep.subr.bf16.mxu0 %v1638_v3  ;;  %544 = vmatprep.subr.bf16.mxu1 %v1651_v8 }
 0x147   :  { %533 = vmatprep.mubr.bf16.mxu0 %v1579_v0  ;;  %574 = vmatprep.mubr.bf16.mxu1 %v1579_v0 }
 0x149   :  { %504 = vmatpush1.bf16.msra.mxu0 %v1643_v5  ;;  %545 = vmatpush1.bf16.msra.mxu1 %v1654_v9 }
 0x14a   :  { %505 = vmatprep.subr.bf16.mxu0 %v1648_v7  ;;  %546 = vmatprep.subr.bf16.mxu1 %v1663_v12 }
 0x14d   :  { %506 = vmatpush1.bf16.msra.mxu0 %v1658_v10  ;;  %547 = vmatpush1.bf16.msra.mxu1 %v1666_v13 }
 0x14e   :  { %507 = vmatprep.subr.bf16.mxu0 %v1661_v11  ;;  %548 = vmatprep.subr.bf16.mxu1 %v1672_v15 }
 0x151   :  { %508 = vmatpush1.bf16.msra.mxu0 %v1670_v14  ;;  %549 = vmatpush1.bf16.msra.mxu1 %v1680_v18 }
 0x152   :  { %509 = vmatprep.subr.bf16.mxu0 %v1675_v16  ;;  %550 = vmatprep.subr.bf16.mxu1 %v1684_v19 }
 0x155   :  { %510 = vmatpush1.bf16.msra.mxu0 %v1678_v17  ;;  %551 = vmatpush1.bf16.msra.mxu1 %v1690_v21 }
 0x156   :  { %511 = vmatprep.subr.bf16.mxu0 %v1687_v20  ;;  %552 = vmatprep.subr.bf16.mxu1 %v1696_v23 }
 0x159   :  { %512 = vmatpush1.bf16.msra.mxu0 %v1694_v22  ;;  %553 = vmatpush1.bf16.msra.mxu1 %v1707_v26 }
 0x15a   :  { %513 = vmatprep.subr.bf16.mxu0 %v1699_v24  ;;  %554 = vmatprep.subr.bf16.mxu1 %v1715_v28 }
 0x15d   :  { %514 = vmatpush1.bf16.msra.mxu0 %v1713_v27  ;;  %555 = vmatpush1.bf16.msra.mxu1 %v1723_v34 }
 0x15e   :  { %515 = vmatprep.subr.bf16.mxu0 %v1720_v32  ;;  %556 = vmatprep.subr.bf16.mxu1 %v1729_v36 }
 0x161   :  { %516 = vmatpush1.bf16.msra.mxu0 %v1727_v35  ;;  %557 = vmatpush1.bf16.msra.mxu1 %v1733_v37 }
 0x162   :  { %626 = vmatprep.subr.bf16.mxu0 %v1633_v1  ;;  %667 = vmatprep.subr.bf16.mxu1 %v1641_v4 }
 0x217   :  { %v410_v57 = vpop.f32.mrb[4].mxu0  ;;  %v451_v58 = vpop.f32.mrb[4].mxu1 }
 0x218   :  { %v458_v59 = vadd.f32 %v410_v57, %v371_v54  ;;  %v412_v61 = vpop.f32.mrb[5].mxu0  ;;  %v453_v62 = vpop.f32.mrb[5].mxu1  ;;  %v460_v42 = vadd.f32 %v451_v58, %v373_v60 }
 0x219   :  { %v459_v63 = vadd.f32 %v412_v61, %v372_v56  ;;  %v414_v30 = vpop.f32.mrb[6].mxu0  ;;  %v455_v31 = vpop.f32.mrb[6].mxu1  ;;  %v461_v45 = vadd.f32 %v453_v62, %v374_v44 }
 0x21a   :  { %v462_v33 = vmul.f32 0.5, %v458_v59  ;;  %v415_v38 = vpop.f32.mrb[7].mxu0  ;;  %v456_v39 = vpop.f32.mrb[7].mxu1  ;;  %v1326_v59 = vunpack.i.h.bf16 %v1777_v43  ;;  %v495_v31 = vld [vmem:[#allocation4 + $0x28] sm:$0xff] }
 0x21b   :  { %v466_v41 = vmul.f32 0.5, %v459_v63  ;;  %v471_v46 = vmul.f32 0.5, %v461_v45 }
 0x21c   :  { %1401 = vtanh.f32 %v462_v33 }
 0x21d   :  { %1403 = vtanh.f32 %v466_v41 }
 0x21e   :  { %1405 = vtanh.f32 %v460_v42  ;;  %v498_v42 = vunpack.c.l.bf16 %v495_v31 }
 0x21f   :  { %1407 = vtanh.f32 %v471_v46 }
 0x226   :  { %v1402_v47 = vpop.eup %1401 }
 0x227   :  { %v1404_v48 = vpop.eup %1403  ;;  %v464_v49 = vadd.f32 1.0, %v1402_v47 }
 0x228   :  { %v468_v50 = vadd.f32 1.0, %v1404_v48  ;;  %v1406_v52 = vpop.eup %1405 }
 0x229   :  { %v465_v51 = vmul.f32 0.5, %v464_v49  ;;  %v1408_v55 = vpop.eup %1407 }
 0x22a   :  { %v469_v53 = vmul.f32 0.5, %v468_v50  ;;  %v473_v58 = vadd.f32 1.0, %v1408_v55 }
 0x22b   :  { %v476_v54 = vmul.f32 %v1406_v52, %v465_v51 }
 0x22c   :  { %v475_v56 = vmul.f32 %v469_v53, %v1774_v40  ;;  %v474_v60 = vmul.f32 0.5, %v473_v58  ;;  %v494_v40 = vld [vmem:[#allocation4 + $0x20] sm:$0xff] }
 0x22d   :  { %v496_v43 = vunpack.c.l.bf16 %v494_v40  ;;  %v497_v33 = vunpack.c.h.bf16 %v494_v40 }
 0x22e   :  { %v1819_v57 = vadd.f32 %v476_v54, %v475_v56  ;;  %v499_v54 = vunpack.c.h.bf16 %v495_v31 }
 0x230   :  { %1409 = vtanh.f32 %v1819_v57 }
 0x23a   :  { %v1410_v61 = vpop.eup %1409 }
 0x23b   :  { %v479_v62 = vmul.f32 %v1410_v61, %v474_v60 }
 0x23d   :  { %v490_v63 = vmul.f32 %v1326_v59, %v479_v62  ;;  %v500_v30 = vpack.c.bf16 %v479_v62, %v479_v62 }
 0x23f   :  { %492 = vst [vmem:[#allocation9 + $0x8] sm:$0xff] %v490_v63  ;;  %534 = vmatmul.mubr.bf16.vlgmr.msra.gmra.mrb[8].mxu0 %v500_v30  ;;  %575 = vmatmul.mubr.bf16.vlgmr.msra.gmra.mrb[8].mxu1 %v500_v30 }
 0x240   :  { %627 = vmatpush1.bf16.msra.mxu0 %v1635_v2  ;;  %668 = vmatpush1.bf16.msra.mxu1 %v1645_v6 }
 0x241   :  { %628 = vmatprep.subr.bf16.mxu0 %v1638_v3  ;;  %669 = vmatprep.subr.bf16.mxu1 %v1651_v8 }
 0x242   :  { %658 = vmatprep.mubr.bf16.mxu0 %v1579_v0  ;;  %699 = vmatprep.mubr.bf16.mxu1 %v1579_v0 }
 0x244   :  { %629 = vmatpush1.bf16.msra.mxu0 %v1643_v5  ;;  %670 = vmatpush1.bf16.msra.mxu1 %v1654_v9 }
 0x245   :  { %630 = vmatprep.subr.bf16.mxu0 %v1648_v7  ;;  %671 = vmatprep.subr.bf16.mxu1 %v1663_v12 }
 0x248   :  { %631 = vmatpush1.bf16.msra.mxu0 %v1658_v10  ;;  %672 = vmatpush1.bf16.msra.mxu1 %v1666_v13 }
 0x249   :  { %632 = vmatprep.subr.bf16.mxu0 %v1661_v11  ;;  %673 = vmatprep.subr.bf16.mxu1 %v1672_v15 }
 0x24c   :  { %633 = vmatpush1.bf16.msra.mxu0 %v1670_v14  ;;  %674 = vmatpush1.bf16.msra.mxu1 %v1680_v18 }
 0x24d   :  { %634 = vmatprep.subr.bf16.mxu0 %v1675_v16  ;;  %675 = vmatprep.subr.bf16.mxu1 %v1684_v19 }
 0x250   :  { %635 = vmatpush1.bf16.msra.mxu0 %v1678_v17  ;;  %676 = vmatpush1.bf16.msra.mxu1 %v1690_v21 }
 0x251   :  { %636 = vmatprep.subr.bf16.mxu0 %v1687_v20  ;;  %677 = vmatprep.subr.bf16.mxu1 %v1696_v23 }
 0x254   :  { %637 = vmatpush1.bf16.msra.mxu0 %v1694_v22  ;;  %678 = vmatpush1.bf16.msra.mxu1 %v1707_v26 }
 0x255   :  { %638 = vmatprep.subr.bf16.mxu0 %v1699_v24  ;;  %679 = vmatprep.subr.bf16.mxu1 %v1715_v28 }
 0x258   :  { %639 = vmatpush1.bf16.msra.mxu0 %v1713_v27  ;;  %680 = vmatpush1.bf16.msra.mxu1 %v1723_v34 }
 0x259   :  { %640 = vmatprep.subr.bf16.mxu0 %v1720_v32  ;;  %681 = vmatprep.subr.bf16.mxu1 %v1729_v36 }
 0x25c   :  { %641 = vmatpush1.bf16.msra.mxu0 %v1727_v35  ;;  %682 = vmatpush1.bf16.msra.mxu1 %v1733_v37 }
 0x25d   :  { %751 = vmatprep.subr.bf16.mxu0 %v1633_v1  ;;  %792 = vmatprep.subr.bf16.mxu1 %v1641_v4 }
 0x312   :  { %v535_v38 = vpop.f32.mrb[8].mxu0  ;;  %v576_v39 = vpop.f32.mrb[8].mxu1 }
 0x313   :  { %v583_v41 = vadd.f32 %v535_v38, %v496_v43  ;;  %v537_v44 = vpop.f32.mrb[9].mxu0  ;;  %v578_v45 = vpop.f32.mrb[9].mxu1  ;;  %v585_v53 = vadd.f32 %v576_v39, %v498_v42 }
 0x314   :  { %v584_v46 = vadd.f32 %v537_v44, %v497_v33  ;;  %v539_v47 = vpop.f32.mrb[10].mxu0  ;;  %v580_v48 = vpop.f32.mrb[10].mxu1  ;;  %v586_v56 = vadd.f32 %v578_v45, %v499_v54 }
 0x315   :  { %v587_v49 = vmul.f32 0.5, %v583_v41  ;;  %v540_v50 = vpop.f32.mrb[11].mxu0  ;;  %v581_v51 = vpop.f32.mrb[11].mxu1  ;;  %v1306_v48 = vsel %vm1305_vm5, 1.0, %v1580_v29 }
 0x316   :  { %v591_v52 = vmul.f32 0.5, %v584_v46  ;;  %v596_v55 = vmul.f32 0.5, %v586_v56  ;;  %v1861_v39 = vpop.permute.xlu0 %1328  ;;  %v619_v50 = vld [vmem:[#allocation4 + $0x30] sm:$0xff] }
 0x317   :  { %1411 = vtanh.f32 %v587_v49  ;;  %v1330_v42 = vunpack.i.l.bf16 %v1861_v39  ;;  %v621_v51 = vunpack.c.l.bf16 %v619_v50 }
 0x318   :  { %1413 = vtanh.f32 %v591_v52  ;;  %v620_v52 = vld [vmem:[#allocation4 + $0x38] sm:$0xff] }
 0x319   :  { %1415 = vtanh.f32 %v585_v53  ;;  %v622_v53 = vunpack.c.h.bf16 %v619_v50 }
 0x31a   :  { %1417 = vtanh.f32 %v596_v55 }
 0x321   :  { %v1412_v58 = vpop.eup %1411 }
 0x322   :  { %v1414_v59 = vpop.eup %1413  ;;  %v589_v60 = vadd.f32 1.0, %v1412_v58  ;;  %v623_v58 = vunpack.c.l.bf16 %v620_v52 }
 0x323   :  { %v593_v61 = vadd.f32 1.0, %v1414_v59  ;;  %v1416_v63 = vpop.eup %1415 }
 0x324   :  { %v590_v62 = vmul.f32 0.5, %v589_v60  ;;  %v1418_v31 = vpop.eup %1417 }
 0x325   :  { %v594_v30 = vmul.f32 0.5, %v593_v61  ;;  %v598_v38 = vadd.f32 1.0, %v1418_v31 }
 0x326   :  { %v601_v40 = vmul.f32 %v1416_v63, %v590_v62 }
 0x327   :  { %v600_v43 = vmul.f32 %v594_v30, %v1819_v57  ;;  %v599_v41 = vmul.f32 0.5, %v598_v38  ;;  %v1304_v57 = vsel %vm1303_vm4, 1.0, %v1580_v29 }
 0x328   :  { %v1333_v49 = vpack.i.bf16 %v1306_v48, %v1304_v57 }
 0x329   :  { %v1858_v33 = vadd.f32 %v601_v40, %v600_v43 }
 0x32a   :  { %1334 = vperm.xlu1 %1332, %v1333_v49  }
 0x32b   :  { %1419 = vtanh.f32 %v1858_v33 }
 0x335   :  { %v1420_v44 = vpop.eup %1419 }
 0x336   :  { %v604_v45 = vmul.f32 %v1420_v44, %v599_v41  ;;  %v624_v41 = vunpack.c.h.bf16 %v620_v52 }
 0x338   :  { %v615_v46 = vmul.f32 %v1330_v42, %v604_v45  ;;  %v625_v47 = vpack.c.bf16 %v604_v45, %v604_v45 }
 0x33a   :  { %617 = vst [vmem:[#allocation9 + $0x10] sm:$0xff] %v615_v46  ;;  %659 = vmatmul.mubr.bf16.vlgmr.msra.gmra.mrb[12].mxu0 %v625_v47  ;;  %700 = vmatmul.mubr.bf16.vlgmr.msra.gmra.mrb[12].mxu1 %v625_v47 }
 0x33b   :  { %752 = vmatpush1.bf16.msra.mxu0 %v1635_v2  ;;  %793 = vmatpush1.bf16.msra.mxu1 %v1645_v6 }
 0x33c   :  { %753 = vmatprep.subr.bf16.mxu0 %v1638_v3  ;;  %794 = vmatprep.subr.bf16.mxu1 %v1651_v8 }
 0x33d   :  { %783 = vmatprep.mubr.bf16.mxu0 %v1579_v0  ;;  %824 = vmatprep.mubr.bf16.mxu1 %v1579_v0 }
 0x33f   :  { %754 = vmatpush1.bf16.msra.mxu0 %v1643_v5  ;;  %795 = vmatpush1.bf16.msra.mxu1 %v1654_v9 }
 0x340   :  { %755 = vmatprep.subr.bf16.mxu0 %v1648_v7  ;;  %796 = vmatprep.subr.bf16.mxu1 %v1663_v12 }
 0x343   :  { %756 = vmatpush1.bf16.msra.mxu0 %v1658_v10  ;;  %797 = vmatpush1.bf16.msra.mxu1 %v1666_v13 }
 0x344   :  { %757 = vmatprep.subr.bf16.mxu0 %v1661_v11  ;;  %798 = vmatprep.subr.bf16.mxu1 %v1672_v15 }
 0x347   :  { %758 = vmatpush1.bf16.msra.mxu0 %v1670_v14  ;;  %799 = vmatpush1.bf16.msra.mxu1 %v1680_v18 }
 0x348   :  { %759 = vmatprep.subr.bf16.mxu0 %v1675_v16  ;;  %800 = vmatprep.subr.bf16.mxu1 %v1684_v19 }
 0x34b   :  { %760 = vmatpush1.bf16.msra.mxu0 %v1678_v17  ;;  %801 = vmatpush1.bf16.msra.mxu1 %v1690_v21 }
 0x34c   :  { %761 = vmatprep.subr.bf16.mxu0 %v1687_v20  ;;  %802 = vmatprep.subr.bf16.mxu1 %v1696_v23 }
 0x34f   :  { %762 = vmatpush1.bf16.msra.mxu0 %v1694_v22  ;;  %803 = vmatpush1.bf16.msra.mxu1 %v1707_v26 }
 0x350   :  { %763 = vmatprep.subr.bf16.mxu0 %v1699_v24  ;;  %804 = vmatprep.subr.bf16.mxu1 %v1715_v28 }
 0x353   :  { %764 = vmatpush1.bf16.msra.mxu0 %v1713_v27  ;;  %805 = vmatpush1.bf16.msra.mxu1 %v1723_v34 }
 0x354   :  { %765 = vmatprep.subr.bf16.mxu0 %v1720_v32  ;;  %806 = vmatprep.subr.bf16.mxu1 %v1729_v36 }
 0x357   :  { %766 = vmatpush1.bf16.msra.mxu0 %v1727_v35  ;;  %807 = vmatpush1.bf16.msra.mxu1 %v1733_v37 }
 0x358   :  { %876 = vmatprep.subr.bf16.mxu0 %v1633_v1  ;;  %917 = vmatprep.subr.bf16.mxu1 %v1641_v4 }
 0x40d   :  { %v660_v54 = vpop.f32.mrb[12].mxu0  ;;  %v701_v56 = vpop.f32.mrb[12].mxu1 }
 0x40e   :  { %v708_v55 = vadd.f32 %v660_v54, %v621_v51  ;;  %v662_v59 = vpop.f32.mrb[13].mxu0  ;;  %v703_v60 = vpop.f32.mrb[13].mxu1  ;;  %v710_v38 = vadd.f32 %v701_v56, %v623_v58 }
 0x40f   :  { %v709_v61 = vadd.f32 %v662_v59, %v622_v53  ;;  %v664_v62 = vpop.f32.mrb[14].mxu0  ;;  %v705_v63 = vpop.f32.mrb[14].mxu1  ;;  %v711_v42 = vadd.f32 %v703_v60, %v624_v41 }
 0x410   :  { %v712_v30 = vmul.f32 0.5, %v708_v55  ;;  %v665_v40 = vpop.f32.mrb[15].mxu0  ;;  %v706_v43 = vpop.f32.mrb[15].mxu1  ;;  %v1331_v55 = vunpack.i.h.bf16 %v1861_v39 }
 0x411   :  { %v716_v31 = vmul.f32 0.5, %v709_v61  ;;  %v721_v44 = vmul.f32 0.5, %v711_v42 }
 0x412   :  { %1421 = vtanh.f32 %v712_v30 }
 0x413   :  { %1423 = vtanh.f32 %v716_v31 }
 0x414   :  { %1425 = vtanh.f32 %v710_v38 }
 0x415   :  { %1427 = vtanh.f32 %v721_v44 }
 0x41c   :  { %v1422_v45 = vpop.eup %1421 }
 0x41d   :  { %v1424_v46 = vpop.eup %1423  ;;  %v714_v47 = vadd.f32 1.0, %v1422_v45 }
 0x41e   :  { %v718_v57 = vadd.f32 1.0, %v1424_v46  ;;  %v1426_v49 = vpop.eup %1425 }
 0x41f   :  { %v715_v48 = vmul.f32 0.5, %v714_v47  ;;  %v1428_v52 = vpop.eup %1427 }
 0x420   :  { %v719_v50 = vmul.f32 0.5, %v718_v57  ;;  %v723_v56 = vadd.f32 1.0, %v1428_v52 }
 0x421   :  { %v726_v51 = vmul.f32 %v1426_v49, %v715_v48 }
 0x422   :  { %v725_v53 = vmul.f32 %v719_v50, %v1858_v33  ;;  %v724_v58 = vmul.f32 0.5, %v723_v56 }
 0x424   :  { %v1903_v54 = vadd.f32 %v726_v51, %v725_v53 }
 0x426   :  { %1429 = vtanh.f32 %v1903_v54 }
 0x430   :  { %v1430_v59 = vpop.eup %1429 }
 0x431   :  { %v729_v60 = vmul.f32 %v1430_v59, %v724_v58  ;;  %v1945_v59 = vpop.permute.xlu1 %1334 }
 0x433   :  { %v740_v61 = vmul.f32 %v1331_v55, %v729_v60  ;;  %v750_v62 = vpack.c.bf16 %v729_v60, %v729_v60 }
 0x435   :  { %742 = vst [vmem:[#allocation9 + $0x18] sm:$0xff] %v740_v61  ;;  %784 = vmatmul.mubr.bf16.vlgmr.msra.gmra.mrb[16].mxu0 %v750_v62  ;;  %825 = vmatmul.mubr.bf16.vlgmr.msra.gmra.mrb[16].mxu1 %v750_v62  ;;  %v1336_v61 = vunpack.i.l.bf16 %v1945_v59 }
 0x436   :  { %877 = vmatpush1.bf16.msra.mxu0 %v1635_v2  ;;  %918 = vmatpush1.bf16.msra.mxu1 %v1645_v6  ;;  %v744_v2 = vld [vmem:[#allocation4 + $0x40] sm:$0xff] }
 0x437   :  { %878 = vmatprep.subr.bf16.mxu0 %v1638_v3  ;;  %919 = vmatprep.subr.bf16.mxu1 %v1651_v8  ;;  %v746_v3 = vunpack.c.l.bf16 %v744_v2  ;;  %v747_v6 = vunpack.c.h.bf16 %v744_v2 }
 0x438   :  { %908 = vmatprep.mubr.bf16.mxu0 %v1579_v0  ;;  %949 = vmatprep.mubr.bf16.mxu1 %v1579_v0 }
 0x43a   :  { %879 = vmatpush1.bf16.msra.mxu0 %v1643_v5  ;;  %920 = vmatpush1.bf16.msra.mxu1 %v1654_v9  ;;  %v745_v5 = vld [vmem:[#allocation4 + $0x48] sm:$0xff] }
 0x43b   :  { %880 = vmatprep.subr.bf16.mxu0 %v1648_v7  ;;  %921 = vmatprep.subr.bf16.mxu1 %v1663_v12  ;;  %v748_v33 = vunpack.c.l.bf16 %v745_v5 }
 0x43e   :  { %881 = vmatpush1.bf16.msra.mxu0 %v1658_v10  ;;  %922 = vmatpush1.bf16.msra.mxu1 %v1666_v13 }
 0x43f   :  { %882 = vmatprep.subr.bf16.mxu0 %v1661_v11  ;;  %923 = vmatprep.subr.bf16.mxu1 %v1672_v15 }
 0x442   :  { %883 = vmatpush1.bf16.msra.mxu0 %v1670_v14  ;;  %924 = vmatpush1.bf16.msra.mxu1 %v1680_v18 }
 0x443   :  { %884 = vmatprep.subr.bf16.mxu0 %v1675_v16  ;;  %925 = vmatprep.subr.bf16.mxu1 %v1684_v19 }
 0x446   :  { %885 = vmatpush1.bf16.msra.mxu0 %v1678_v17  ;;  %926 = vmatpush1.bf16.msra.mxu1 %v1690_v21 }
 0x447   :  { %886 = vmatprep.subr.bf16.mxu0 %v1687_v20  ;;  %927 = vmatprep.subr.bf16.mxu1 %v1696_v23 }
 0x44a   :  { %887 = vmatpush1.bf16.msra.mxu0 %v1694_v22  ;;  %928 = vmatpush1.bf16.msra.mxu1 %v1707_v26 }
 0x44b   :  { %888 = vmatprep.subr.bf16.mxu0 %v1699_v24  ;;  %929 = vmatprep.subr.bf16.mxu1 %v1715_v28 }
 0x44e   :  { %889 = vmatpush1.bf16.msra.mxu0 %v1713_v27  ;;  %930 = vmatpush1.bf16.msra.mxu1 %v1723_v34 }
 0x44f   :  { %890 = vmatprep.subr.bf16.mxu0 %v1720_v32  ;;  %931 = vmatprep.subr.bf16.mxu1 %v1729_v36 }
 0x452   :  { %891 = vmatpush1.bf16.msra.mxu0 %v1727_v35  ;;  %932 = vmatpush1.bf16.msra.mxu1 %v1733_v37 }
 0x453   :  { %1001 = vmatprep.subr.bf16.mxu0 %v1633_v1  ;;  %1042 = vmatprep.subr.bf16.mxu1 %v1641_v4  ;;  %v749_v4 = vunpack.c.h.bf16 %v745_v5 }
 0x508   :  { %v785_v7 = vpop.f32.mrb[16].mxu0  ;;  %v826_v9 = vpop.f32.mrb[16].mxu1 }
 0x509   :  { %v833_v10 = vadd.f32 %v785_v7, %v746_v3  ;;  %v787_v39 = vpop.f32.mrb[17].mxu0  ;;  %v828_v63 = vpop.f32.mrb[17].mxu1  ;;  %v835_v1 = vadd.f32 %v826_v9, %v748_v33  ;;  %v1954_v7 = vld [vmem:[#allocation7 + $0x24] ss:$16 sps:$4 sm:$0xff]   ;;  %v1960_v9 = vld [vmem:[#allocation7 + $0x20] ss:$16 sps:$4 sm:$0xff]  }
 0x50a   :  { %v834_v30 = vadd.f32 %v787_v39, %v747_v6  ;;  %v789_v40 = vpop.f32.mrb[18].mxu0  ;;  %v830_v43 = vpop.f32.mrb[18].mxu1  ;;  %v836_v44 = vadd.f32 %v828_v63, %v749_v4  ;;  %v1948_v6 = vld [vmem:[#allocation7] ss:$16 sps:$4 sm:$0xff]   ;;  %v1966_v33 = vld [vmem:[#allocation7 + $0x44] ss:$16 sps:$4 sm:$0xff]  }
 0x50b   :  { %v837_v31 = vmul.f32 0.5, %v833_v10  ;;  %v790_v38 = vpop.f32.mrb[19].mxu0  ;;  %v831_v41 = vpop.f32.mrb[19].mxu1  ;;  %v1963_v10 = vld [vmem:[#allocation7 + $0x28] ss:$16 sps:$4 sm:$0xff]  }
 0x50c   :  { %v841_v42 = vmul.f32 0.5, %v834_v30  ;;  %v846_v45 = vmul.f32 0.5, %v836_v44  ;;  %v1970_v39 = vld [vmem:[#allocation7 + $0x40] ss:$16 sps:$4 sm:$0xff]  }
 0x50d   :  { %1431 = vtanh.f32 %v837_v31 }
 0x50e   :  { %1433 = vtanh.f32 %v841_v42 }
 0x50f   :  { %1435 = vtanh.f32 %v835_v1 }
 0x510   :  { %1437 = vtanh.f32 %v846_v45 }
 0x517   :  { %v1432_v46 = vpop.eup %1431 }
 0x518   :  { %v1434_v47 = vpop.eup %1433  ;;  %v839_v57 = vadd.f32 1.0, %v1432_v46 }
 0x519   :  { %v843_v48 = vadd.f32 1.0, %v1434_v47  ;;  %v1436_v50 = vpop.eup %1435  ;;  %v1337_v47 = vunpack.i.h.bf16 %v1945_v59  ;;  %v1485_v59 = vld [vmem:[#allocation7 + $0x60] ss:$16 sps:$4 sm:$0xff]  }
 0x51a   :  { %v840_v49 = vmul.f32 0.5, %v839_v57  ;;  %v1438_v55 = vpop.eup %1437 }
 0x51b   :  { %v844_v51 = vmul.f32 0.5, %v843_v48  ;;  %v848_v58 = vadd.f32 1.0, %v1438_v55  ;;  %v1483_v55 = vld [vmem:[#allocation7 + $0x64] ss:$16 sps:$4 sm:$0xff]  }
 0x51c   :  { %v851_v53 = vmul.f32 %v1436_v50, %v840_v49 }
 0x51d   :  { %v850_v52 = vmul.f32 %v844_v51, %v1903_v54  ;;  %v849_v60 = vmul.f32 0.5, %v848_v58  ;;  %v1951_v54 = vld [vmem:[#allocation7 + $0x8] ss:$16 sps:$4 sm:$0xff]   ;;  %v1484_v58 = vld [vmem:[#allocation7 + $0x6c] ss:$16 sps:$4 sm:$0xff]  }
 0x51f   :  { %v1942_v56 = vadd.f32 %v851_v53, %v850_v52  ;;  %v1480_v53 = vld [vmem:[#allocation7 + $0x2c] ss:$16 sps:$4 sm:$0xff]  }
 0x520   :  { %v1481_v52 = vld [vmem:[#allocation7 + $0x4c] ss:$16 sps:$4 sm:$0xff]  }
 0x521   :  { %1439 = vtanh.f32 %v1942_v56 }
 0x52b   :  { %v1440_v62 = vpop.eup %1439 }
 0x52c   :  { %v854_v2 = vmul.f32 %v1440_v62, %v849_v60  ;;  %v1486_v60 = vld [vmem:[#allocation7 + $0x68] ss:$16 sps:$4 sm:$0xff]   ;;  %v1489_v62 = vld [vmem:[#allocation7 + $0x80] ss:$16 sps:$4 sm:$0xff]  }
 0x52e   :  { %v865_v3 = vmul.f32 %v1336_v61, %v854_v2  ;;  %v875_v5 = vpack.c.bf16 %v854_v2, %v854_v2  ;;  %v1488_v61 = vld [vmem:[#allocation7 + $0x8c] ss:$16 sps:$4 sm:$0xff]   ;;  %v1490_v2 = vld [vmem:[#allocation7 + $0x88] ss:$16 sps:$4 sm:$0xff]  }
 0x530   :  { %867 = vst [vmem:[#allocation9 + $0x20] sm:$0xff] %v865_v3  ;;  %909 = vmatmul.mubr.bf16.vlgmr.msra.gmra.mrb[20].mxu0 %v875_v5  ;;  %950 = vmatmul.mubr.bf16.vlgmr.msra.gmra.mrb[20].mxu1 %v875_v5  ;;  %v1491_v3 = vld [vmem:[#allocation7 + $0xa4] ss:$16 sps:$4 sm:$0xff]   ;;  %v1492_v5 = vld [vmem:[#allocation7 + $0xac] ss:$16 sps:$4 sm:$0xff]  }
 0x531   :  { %1002 = vmatpush1.bf16.msra.mxu0 %v1948_v6  ;;  %1043 = vmatpush1.bf16.msra.mxu1 %v1951_v54 }
 0x532   :  { %1003 = vmatprep.subr.bf16.mxu0 %v1954_v7  ;;  %1044 = vmatprep.subr.bf16.mxu1 %v1651_v8  ;;  %v1478_v8 = vld [vmem:[#allocation7 + $0x4] ss:$16 sps:$4 sm:$0xff]  }
 0x533   :  { %1033 = vmatprep.mubr.bf16.mxu0 %v1579_v0  ;;  %1074 = vmatprep.mubr.bf16.mxu1 %v1579_v0 }
 0x535   :  { %1004 = vmatpush1.bf16.msra.mxu0 %v1960_v9  ;;  %1045 = vmatpush1.bf16.msra.mxu1 %v1963_v10 }
 0x536   :  { %1005 = vmatprep.subr.bf16.mxu0 %v1966_v33  ;;  %1046 = vmatprep.subr.bf16.mxu1 %v1663_v12  ;;  %v1308_v12 = vsel %vm1307_vm6, 1.0, %v1580_v29 }
 0x539   :  { %1006 = vmatpush1.bf16.msra.mxu0 %v1970_v39  ;;  %1047 = vmatpush1.bf16.msra.mxu1 %v1666_v13  ;;  %v1310_v13 = vsel %vm1309_vm7, 1.0, %v1580_v29 }
 0x53a   :  { %1007 = vmatprep.subr.bf16.mxu0 %v1661_v11  ;;  %1048 = vmatprep.subr.bf16.mxu1 %v1672_v15  ;;  %v1479_v11 = vld [vmem:[#allocation7 + $0xc] ss:$16 sps:$4 sm:$0xff]   ;;  %v869_v15 = vld [vmem:[#allocation4 + $0x50] sm:$0xff] }
 0x53d   :  { %1008 = vmatpush1.bf16.msra.mxu0 %v1670_v14  ;;  %1049 = vmatpush1.bf16.msra.mxu1 %v1680_v18  ;;  %v1338_v14 = vpack.i.bf16 %v1310_v13, %v1308_v12  ;;  %v872_v18 = vunpack.c.h.bf16 %v869_v15  ;;  %v1502_v12 = vld [vmem:[#allocation7 + $0xe8] ss:$16 sps:$4 sm:$0xff]   ;;  %v994_v13 = vld [vmem:[#allocation4 + $0x60] sm:$0xff] }
 0x53e   :  { %1009 = vmatprep.subr.bf16.mxu0 %v1675_v16  ;;  %1050 = vmatprep.subr.bf16.mxu1 %v1684_v19  ;;  %v871_v16 = vunpack.c.l.bf16 %v869_v15  ;;  %v995_v15 = vld [vmem:[#allocation4 + $0x68] sm:$0xff] }
 0x53f   :  { %1339 = vperm.xlu1 %1332, %v1338_v14   ;;  %v996_v14 = vunpack.c.l.bf16 %v994_v13 }
 0x541   :  { %1010 = vmatpush1.bf16.msra.mxu0 %v1678_v17  ;;  %1051 = vmatpush1.bf16.msra.mxu1 %v1690_v21  ;;  %v870_v17 = vld [vmem:[#allocation4 + $0x58] sm:$0xff] }
 0x542   :  { %1011 = vmatprep.subr.bf16.mxu0 %v1687_v20  ;;  %1052 = vmatprep.subr.bf16.mxu1 %v1696_v23 }
 0x545   :  { %1012 = vmatpush1.bf16.msra.mxu0 %v1694_v22  ;;  %1053 = vmatpush1.bf16.msra.mxu1 %v1707_v26  ;;  %v873_v22 = vunpack.c.l.bf16 %v870_v17 }
 0x546   :  { %1013 = vmatprep.subr.bf16.mxu0 %v1699_v24  ;;  %1054 = vmatprep.subr.bf16.mxu1 %v1715_v28 }
 0x549   :  { %1014 = vmatpush1.bf16.msra.mxu0 %v1713_v27  ;;  %1055 = vmatpush1.bf16.msra.mxu1 %v1723_v34 }
 0x54a   :  { %1015 = vmatprep.subr.bf16.mxu0 %v1720_v32  ;;  %1056 = vmatprep.subr.bf16.mxu1 %v1729_v36  ;;  %v874_v36 = vunpack.c.h.bf16 %v870_v17 }
 0x54d   :  { %1016 = vmatpush1.bf16.msra.mxu0 %v1727_v35  ;;  %1057 = vmatpush1.bf16.msra.mxu1 %v1733_v37 }
 0x54e   :  { %1126 = vmatprep.subr.bf16.mxu0 %v1478_v8  ;;  %1167 = vmatprep.subr.bf16.mxu1 %v1479_v11  ;;  %v1500_v8 = vld [vmem:[#allocation7 + $0xec] ss:$16 sps:$4 sm:$0xff]   ;;  %v1501_v11 = vld [vmem:[#allocation7 + $0xe0] ss:$16 sps:$4 sm:$0xff]  }
 0x603   :  { %v910_v19 = vpop.f32.mrb[20].mxu0  ;;  %v951_v20 = vpop.f32.mrb[20].mxu1 }
 0x604   :  { %v958_v21 = vadd.f32 %v910_v19, %v871_v16  ;;  %v912_v23 = vpop.f32.mrb[21].mxu0  ;;  %v953_v24 = vpop.f32.mrb[21].mxu1  ;;  %v960_v29 = vadd.f32 %v951_v20, %v873_v22  ;;  %v997_v16 = vunpack.c.h.bf16 %v994_v13  ;;  %v998_v20 = vunpack.c.l.bf16 %v995_v15 }
 0x605   :  { %v959_v26 = vadd.f32 %v912_v23, %v872_v18  ;;  %v914_v27 = vpop.f32.mrb[22].mxu0  ;;  %v955_v28 = vpop.f32.mrb[22].mxu1  ;;  %v961_v37 = vadd.f32 %v953_v24, %v874_v36 }
 0x606   :  { %v962_v25 = vmul.f32 0.5, %v958_v21  ;;  %v915_v32 = vpop.f32.mrb[23].mxu0  ;;  %v956_v34 = vpop.f32.mrb[23].mxu1 }
 0x607   :  { %v966_v35 = vmul.f32 0.5, %v959_v26  ;;  %v971_v63 = vmul.f32 0.5, %v961_v37 }
 0x608   :  { %1441 = vtanh.f32 %v962_v25 }
 0x609   :  { %1443 = vtanh.f32 %v966_v35  ;;  %v999_v35 = vunpack.c.h.bf16 %v995_v15 }
 0x60a   :  { %1445 = vtanh.f32 %v960_v29 }
 0x60b   :  { %1447 = vtanh.f32 %v971_v63 }
 0x612   :  { %v1442_v30 = vpop.eup %1441 }
 0x613   :  { %v1444_v40 = vpop.eup %1443  ;;  %v964_v43 = vadd.f32 1.0, %v1442_v30 }
 0x614   :  { %v968_v31 = vadd.f32 1.0, %v1444_v40  ;;  %v1446_v41 = vpop.eup %1445 }
 0x615   :  { %v965_v38 = vmul.f32 0.5, %v964_v43  ;;  %v1448_v45 = vpop.eup %1447 }
 0x616   :  { %v969_v42 = vmul.f32 0.5, %v968_v31  ;;  %v973_v46 = vadd.f32 1.0, %v1448_v45 }
 0x617   :  { %v976_v1 = vmul.f32 %v1446_v41, %v965_v38 }
 0x618   :  { %v975_v4 = vmul.f32 %v969_v42, %v1942_v56  ;;  %v974_v57 = vmul.f32 0.5, %v973_v46  ;;  %v1482_v56 = vld [vmem:[#allocation7 + $0x48] ss:$16 sps:$4 sm:$0xff]   ;;  %v1340_v46 = vpop.permute.xlu1 %1339 }
 0x61a   :  { %v1999_v44 = vadd.f32 %v976_v1, %v975_v4 }
 0x61c   :  { %1449 = vtanh.f32 %v1999_v44 }
 0x626   :  { %v1450_v48 = vpop.eup %1449 }
 0x627   :  { %v979_v49 = vmul.f32 %v1450_v48, %v974_v57  ;;  %v1341_v57 = vunpack.i.l.bf16 %v1340_v46 }
 0x629   :  { %v990_v50 = vmul.f32 %v1337_v47, %v979_v49  ;;  %v1000_v51 = vpack.c.bf16 %v979_v49, %v979_v49 }
 0x62b   :  { %992 = vst [vmem:[#allocation9 + $0x28] sm:$0xff] %v990_v50  ;;  %1034 = vmatmul.mubr.bf16.vlgmr.msra.gmra.mrb[24].mxu0 %v1000_v51  ;;  %1075 = vmatmul.mubr.bf16.vlgmr.msra.gmra.mrb[24].mxu1 %v1000_v51 }
 0x62c   :  { %1127 = vmatpush1.bf16.msra.mxu0 %v1948_v6  ;;  %1168 = vmatpush1.bf16.msra.mxu1 %v1951_v54  ;;  %v1493_v6 = vld [vmem:[#allocation7 + $0xa0] ss:$16 sps:$4 sm:$0xff]   ;;  %v1494_v54 = vld [vmem:[#allocation7 + $0xa8] ss:$16 sps:$4 sm:$0xff]  }
 0x62d   :  { %1128 = vmatprep.subr.bf16.mxu0 %v1954_v7  ;;  %1169 = vmatprep.subr.bf16.mxu1 %v1480_v53  ;;  %v1495_v7 = vld [vmem:[#allocation7 + $0xc4] ss:$16 sps:$4 sm:$0xff]  }
 0x62e   :  { %1158 = vmatprep.mubr.bf16.mxu0 %v1579_v0  ;;  %1199 = vmatprep.mubr.bf16.mxu1 %v1579_v0  ;;  %v1487_v0 = vld [vmem:[#allocation7 + $0x84] ss:$16 sps:$4 sm:$0xff]  }
 0x62f   :  { %v1119_v53 = vld [vmem:[#allocation4 + $0x70] sm:$0xff] }
 0x630   :  { %1129 = vmatpush1.bf16.msra.mxu0 %v1960_v9  ;;  %1170 = vmatpush1.bf16.msra.mxu1 %v1963_v10  ;;  %v1496_v9 = vld [vmem:[#allocation7 + $0xcc] ss:$16 sps:$4 sm:$0xff]   ;;  %v1497_v10 = vld [vmem:[#allocation7 + $0xc0] ss:$16 sps:$4 sm:$0xff]  }
 0x631   :  { %1130 = vmatprep.subr.bf16.mxu0 %v1966_v33  ;;  %1171 = vmatprep.subr.bf16.mxu1 %v1481_v52  ;;  %v1498_v33 = vld [vmem:[#allocation7 + $0xc8] ss:$16 sps:$4 sm:$0xff]   ;;  %v1121_v52 = vunpack.c.l.bf16 %v1119_v53 }
 0x634   :  { %1131 = vmatpush1.bf16.msra.mxu0 %v1970_v39  ;;  %1172 = vmatpush1.bf16.msra.mxu1 %v1482_v56  ;;  %v1499_v39 = vld [vmem:[#allocation7 + $0xe4] ss:$16 sps:$4 sm:$0xff]   ;;  %v1120_v56 = vld [vmem:[#allocation4 + $0x78] sm:$0xff] }
 0x635   :  { %1132 = vmatprep.subr.bf16.mxu0 %v1483_v55  ;;  %1173 = vmatprep.subr.bf16.mxu1 %v1484_v58  ;;  %v1122_v55 = vunpack.c.h.bf16 %v1119_v53 }
 0x638   :  { %1133 = vmatpush1.bf16.msra.mxu0 %v1485_v59  ;;  %1174 = vmatpush1.bf16.msra.mxu1 %v1486_v60  ;;  %v1123_v60 = vunpack.c.l.bf16 %v1120_v56 }
 0x639   :  { %1134 = vmatprep.subr.bf16.mxu0 %v1487_v0  ;;  %1175 = vmatprep.subr.bf16.mxu1 %v1488_v61 }
 0x63c   :  { %1135 = vmatpush1.bf16.msra.mxu0 %v1489_v62  ;;  %1176 = vmatpush1.bf16.msra.mxu1 %v1490_v2 }
 0x63d   :  { %1136 = vmatprep.subr.bf16.mxu0 %v1491_v3  ;;  %1177 = vmatprep.subr.bf16.mxu1 %v1492_v5 }
 0x640   :  { %1137 = vmatpush1.bf16.msra.mxu0 %v1493_v6  ;;  %1178 = vmatpush1.bf16.msra.mxu1 %v1494_v54 }
 0x641   :  { %1138 = vmatprep.subr.bf16.mxu0 %v1495_v7  ;;  %1179 = vmatprep.subr.bf16.mxu1 %v1496_v9 }
 0x644   :  { %1139 = vmatpush1.bf16.msra.mxu0 %v1497_v10  ;;  %1180 = vmatpush1.bf16.msra.mxu1 %v1498_v33  ;;  %v1124_v10 = vunpack.c.h.bf16 %v1120_v56 }
 0x645   :  { %1140 = vmatprep.subr.bf16.mxu0 %v1499_v39  ;;  %1181 = vmatprep.subr.bf16.mxu1 %v1500_v8 }
 0x648   :  { %1141 = vmatpush1.bf16.msra.mxu0 %v1501_v11  ;;  %1182 = vmatpush1.bf16.msra.mxu1 %v1502_v12 }
 0x6fe   :  { %v1035_v17 = vpop.f32.mrb[24].mxu0  ;;  %v1076_v18 = vpop.f32.mrb[24].mxu1 }
 0x6ff   :  { %v1083_v19 = vadd.f32 %v1035_v17, %v996_v14  ;;  %v1037_v21 = vpop.f32.mrb[25].mxu0  ;;  %v1078_v22 = vpop.f32.mrb[25].mxu1  ;;  %v1085_v34 = vadd.f32 %v1076_v18, %v998_v20 }
 0x700   :  { %v1084_v23 = vadd.f32 %v1037_v21, %v997_v16  ;;  %v1039_v24 = vpop.f32.mrb[26].mxu0  ;;  %v1080_v26 = vpop.f32.mrb[26].mxu1  ;;  %v1086_v29 = vadd.f32 %v1078_v22, %v999_v35 }
 0x701   :  { %v1087_v27 = vmul.f32 0.5, %v1083_v19  ;;  %v1040_v28 = vpop.f32.mrb[27].mxu0  ;;  %v1081_v25 = vpop.f32.mrb[27].mxu1  ;;  %v1342_v24 = vunpack.i.h.bf16 %v1340_v46 }
 0x702   :  { %v1091_v32 = vmul.f32 0.5, %v1084_v23  ;;  %v1096_v36 = vmul.f32 0.5, %v1086_v29 }
 0x703   :  { %1451 = vtanh.f32 %v1087_v27 }
 0x704   :  { %1453 = vtanh.f32 %v1091_v32 }
 0x705   :  { %1455 = vtanh.f32 %v1085_v34 }
 0x706   :  { %1457 = vtanh.f32 %v1096_v36 }
 0x70d   :  { %v1452_v37 = vpop.eup %1451 }
 0x70e   :  { %v1454_v63 = vpop.eup %1453  ;;  %v1089_v30 = vadd.f32 1.0, %v1452_v37 }
 0x70f   :  { %v1093_v40 = vadd.f32 1.0, %v1454_v63  ;;  %v1456_v31 = vpop.eup %1455 }
 0x710   :  { %v1090_v43 = vmul.f32 0.5, %v1089_v30  ;;  %v1458_v4 = vpop.eup %1457 }
 0x711   :  { %v1094_v38 = vmul.f32 0.5, %v1093_v40  ;;  %v1098_v45 = vadd.f32 1.0, %v1458_v4 }
 0x712   :  { %v1101_v41 = vmul.f32 %v1456_v31, %v1090_v43 }
 0x713   :  { %v1100_v42 = vmul.f32 %v1094_v38, %v1999_v44  ;;  %v1099_v47 = vmul.f32 0.5, %v1098_v45 }
 0x715   :  { %v1102_v1 = vadd.f32 %v1101_v41, %v1100_v42 }
 0x717   :  { %1459 = vtanh.f32 %v1102_v1 }
 0x721   :  { %v1460_v48 = vpop.eup %1459 }
 0x722   :  { %v1104_v49 = vmul.f32 %v1460_v48, %v1099_v47 }
 0x724   :  { %v1115_v50 = vmul.f32 %v1341_v57, %v1104_v49  ;;  %v1125_v51 = vpack.c.bf16 %v1104_v49, %v1104_v49 }
 0x726   :  { %1117 = vst [vmem:[#allocation9 + $0x30] sm:$0xff] %v1115_v50  ;;  %1159 = vmatmul.mubr.bf16.vlgmr.msra.gmra.mrb[28].mxu0 %v1125_v51  ;;  %1200 = vmatmul.mubr.bf16.vlgmr.msra.gmra.mrb[28].mxu1 %v1125_v51 }
 0x7f9   :  { %v1160_v58 = vpop.f32.mrb[28].mxu0  ;;  %v1201_v44 = vpop.f32.mrb[28].mxu1 }
 0x7fa   :  { %v1208_v59 = vadd.f32 %v1160_v58, %v1121_v52  ;;  %v1162_v0 = vpop.f32.mrb[29].mxu0  ;;  %v1203_v61 = vpop.f32.mrb[29].mxu1  ;;  %v1210_v9 = vadd.f32 %v1201_v44, %v1123_v60 }
 0x7fb   :  { %v1209_v62 = vadd.f32 %v1162_v0, %v1122_v55  ;;  %v1164_v2 = vpop.f32.mrb[30].mxu0  ;;  %v1205_v3 = vpop.f32.mrb[30].mxu1  ;;  %v1211_v33 = vadd.f32 %v1203_v61, %v1124_v10 }
 0x7fc   :  { %v1212_v5 = vmul.f32 0.5, %v1208_v59  ;;  %v1165_v6 = vpop.f32.mrb[31].mxu0  ;;  %v1206_v54 = vpop.f32.mrb[31].mxu1 }
 0x7fd   :  { %v1216_v7 = vmul.f32 0.5, %v1209_v62  ;;  %v1221_v39 = vmul.f32 0.5, %v1211_v33 }
 0x7fe   :  { %1461 = vtanh.f32 %v1212_v5 }
 0x7ff   :  { %1463 = vtanh.f32 %v1216_v7 }
 0x800   :  { %1465 = vtanh.f32 %v1210_v9 }
 0x801   :  { %1467 = vtanh.f32 %v1221_v39 }
 0x808   :  { %v1462_v8 = vpop.eup %1461 }
 0x809   :  { %v1464_v11 = vpop.eup %1463  ;;  %v1214_v12 = vadd.f32 1.0, %v1462_v8 }
 0x80a   :  { %v1218_v13 = vadd.f32 1.0, %v1464_v11  ;;  %v1466_v15 = vpop.eup %1465 }
 0x80b   :  { %v1215_v14 = vmul.f32 0.5, %v1214_v12  ;;  %v1468_v20 = vpop.eup %1467 }
 0x80c   :  { %v1219_v16 = vmul.f32 0.5, %v1218_v13  ;;  %v1223_v21 = vadd.f32 1.0, %v1468_v20 }
 0x80d   :  { %v1226_v17 = vmul.f32 %v1466_v15, %v1215_v14 }
 0x80e   :  { %v1225_v18 = vmul.f32 %v1219_v16, %v1102_v1  ;;  %v1224_v22 = vmul.f32 0.5, %v1223_v21 }
 0x810   :  { %v1227_v19 = vadd.f32 %v1226_v17, %v1225_v18 }
 0x812   :  { %1469 = vtanh.f32 %v1227_v19 }
 0x81c   :  { %v1470_v23 = vpop.eup %1469 }
 0x81d   :  { %v1229_v26 = vmul.f32 %v1470_v23, %v1224_v22 }
 0x81f   :  { %v1240_v27 = vmul.f32 %v1342_v24, %v1229_v26 }
 0x821   :  { %1242 = vst [vmem:[#allocation9 + $0x38] sm:$0xff] %v1240_v27 }
 0x822   :  { %1558 = shalt.err (!%p1555_p6)
}
 0x823   :  { %s1559_s15 = scalar_lea.hbm %s2028_s3, 1024 }
 0x824   :  { %p1560_p7 = scmp.ne.s32.totalorder %s2028_s3, %s1559_s15  ;;  %p1563_p8 = scmp.lt.u32.totalorder %s1559_s15, %s2028_s3 }
 0x826   :  { %p1565_p9 = pnand %p1563_p8, %p1560_p7 }
 0x828   :  { %1568 = shalt.err (!%p1565_p9)
}
 0x829   :  { %s1583_s20 = smov 128   ;;  %s1584_s21 = smov 8  }
 0x82a   :  { %1256 = dma.vmem_to_hbm [thread:$0]  %s1251_s11, 1024, %s2028_s3, [#allocation6], %s1583_s20, %s1583_s20, %s1584_s21  }
 0x82b   :  { %1573 = dma.done.wait [#allocation6], 1024  }
 0x82c   :  { %1574 = vsyncadd [#allocation6], 4294966272 }
 0x82d   :  { %1260 = vsyncpa [#allocation5], 1 }
 0x82e   :  { %1261 = vsyncpa [#allocation8], 1 }
 0x82f   :  { %1262 = vsyncpa [#allocation6], 1 }

// kernel: tpu_custom_call.1
= control target key start
LH: loop header
LB: loop body
LE: loop exit
PB: predicated region body
PF: predicated region fallthrough
CT: control target
= control target key end

     0   :  { %8 = vsyncpa [#allocation5], 0  ;;  %s2025_s0 = inlined_call_operand.hbm [shape: bf16[8,8,512], index: 0, kind: input, shape index: {}]   ;;  %s2026_s1 = inlined_call_operand.hbm [shape: bf16[128,512], index: 1, kind: input, shape index: {}]   ;;  %s2027_s2 = inlined_call_operand.vmem [shape: s32[8,1], index: 2, kind: input, shape index: {}]   ;;  %s2028_s3 = inlined_call_operand.hbm [shape: f32[8,8,128], index: 3, kind: output, shape index: {}]  }
   0x1   :  { %9 = vsyncpa [#allocation8], 0 }
   0x2   :  { %10 = vsyncpa [#allocation6], 0  ;;  %s1575_s12 = smov [#allocation4]   ;;  %s1503_s16 = scalar_lea.hbm %s2025_s0, 2048 }
   0x3   :  { %s16_s13 = sshll.u32 %s1575_s12, 4  ;;  %p1504_p0 = scmp.ne.s32.totalorder %s2025_s0, %s1503_s16  ;;  %s17_s13 = int_to_ptr.vmem [resolvable:$true] %s16_s13 }
   0x4   :  { %p1507_p1 = scmp.lt.u32.totalorder %s1503_s16, %s2025_s0 }
   0x6   :  { %p1509_p2 = pnand %p1507_p1, %p1504_p0 }
   0x8   :  { %1512 = shalt.err (!%p1509_p2)
}
   0x9   :  { %s1513_s21 = scalar_lea.vmem %s17_s13, 2048  ;;  %p1518_p4 = scmp.lt.s32.totalorder %s17_s13, %s17_s13 }
   0xa   :  { %p1514_p3 = scmp.ne.s32.totalorder %s17_s13, %s1513_s21  ;;  %p1519_p5 = scmp.lt.s32.totalorder %s1513_s21, %s1513_s21 }
   0xc   :  { %p1520_p6 = por %p1519_p5, %p1518_p4 }
   0xe   :  { %p1521_p7 = pnand %p1520_p6, %p1514_p3 }
  0x10   :  { %1524 = shalt.err (!%p1521_p7)
}
  0x11   :  { %s1576_s22 = smov 256   ;;  %s1577_s23 = smov 16  }
  0x12   :  { %22 = dma.hbm_to_vmem [thread:$0]  %s2025_s0, 2048, %s17_s13, [#allocation5], %s1576_s22, %s1576_s22, %s1577_s23  }
  0x13   :  { %s1578_s26 = smov [#allocation7]   ;;  %s1525_s30 = scalar_lea.hbm %s2026_s1, 4096 }
  0x14   :  { %s28_s27 = sshll.u32 %s1578_s26, 4  ;;  %p1526_p8 = scmp.ne.s32.totalorder %s2026_s1, %s1525_s30  ;;  %s29_s27 = int_to_ptr.vmem [resolvable:$true] %s28_s27 }
  0x15   :  { %p1529_p9 = scmp.lt.u32.totalorder %s1525_s30, %s2026_s1 }
  0x17   :  { %p1531_p10 = pnand %p1529_p9, %p1526_p8 }
  0x19   :  { %1534 = shalt.err (!%p1531_p10)
}
  0x1a   :  { %s1535_s8 = scalar_lea.vmem %s29_s27, 4096  ;;  %p1540_p12 = scmp.lt.s32.totalorder %s29_s27, %s29_s27 }
  0x1b   :  { %p1536_p11 = scmp.ne.s32.totalorder %s29_s27, %s1535_s8  ;;  %p1541_p13 = scmp.lt.s32.totalorder %s1535_s8, %s1535_s8 }
  0x1d   :  { %p1542_p0 = por %p1541_p13, %p1540_p12 }
  0x1f   :  { %p1543_p1 = pnand %p1542_p0, %p1536_p11 }
  0x21   :  { %1546 = shalt.err (!%p1543_p1)
}
  0x22   :  { %34 = dma.hbm_to_vmem [thread:$0]  %s2026_s1, 4096, %s29_s27, [#allocation8], %s1576_s22, %s1576_s22, %s1577_s23  }
  0x23   :  { %1569 = dma.done.wait [#allocation5], 2048  }
  0x24   :  { %1570 = vsyncadd [#allocation5], 4294965248 }
  0x25   :  { %1571 = dma.done.wait [#allocation8], 4096  }
  0x26   :  { %1572 = vsyncadd [#allocation8], 4294963200  ;;  %v1579_v0 = vmov 0   ;;  %v1633_v1 = vld [vmem:[#allocation7 + $0x4] ss:$16 sps:$4 sm:$0xff]   ;;  %v1580_v29 = vmov 0.0  }
  0x27   :  { %285 = vmatprep.mubr.bf16.mxu0 %v1579_v0  ;;  %326 = vmatprep.mubr.bf16.mxu1 %v1579_v0  ;;  %v1635_v2 = vld [vmem:[#allocation7] ss:$16 sps:$4 sm:$0xff]   ;;  %v1638_v3 = vld [vmem:[#allocation7 + $0x24] ss:$16 sps:$4 sm:$0xff]   ;;  %v1641_v4 = vld [vmem:[#allocation7 + $0xc] ss:$16 sps:$4 sm:$0xff]  }
  0x28   :  { %1321 = vset.pattern.permute.xlu0 %v1579_v0  ;;  %1332 = vset.pattern.permute.xlu1 %v1579_v0  ;;  %v1643_v5 = vld [vmem:[#allocation7 + $0x20] ss:$16 sps:$4 sm:$0xff]   ;;  %v1645_v6 = vld [vmem:[#allocation7 + $0x8] ss:$16 sps:$4 sm:$0xff]   ;;  %v1648_v7 = vld [vmem:[#allocation7 + $0x44] ss:$16 sps:$4 sm:$0xff]  }
  0x29   :  { %253 = vmatprep.subr.bf16.mxu0 %v1633_v1  ;;  %294 = vmatprep.subr.bf16.mxu1 %v1641_v4  ;;  %v1651_v8 = vld [vmem:[#allocation7 + $0x2c] ss:$16 sps:$4 sm:$0xff]   ;;  %v1654_v9 = vld [vmem:[#allocation7 + $0x28] ss:$16 sps:$4 sm:$0xff]   ;;  %v1658_v10 = vld [vmem:[#allocation7 + $0x40] ss:$16 sps:$4 sm:$0xff]  }
  0x2a   :  { %254 = vmatpush1.bf16.msra.mxu0 %v1635_v2  ;;  %295 = vmatpush1.bf16.msra.mxu1 %v1645_v6  ;;  %v1661_v11 = vld [vmem:[#allocation7 + $0x64] ss:$16 sps:$4 sm:$0xff]   ;;  %v1663_v12 = vld [vmem:[#allocation7 + $0x4c] ss:$16 sps:$4 sm:$0xff]   ;;  %v1666_v13 = vld [vmem:[#allocation7 + $0x48] ss:$16 sps:$4 sm:$0xff]  }
  0x2b   :  { %255 = vmatprep.subr.bf16.mxu0 %v1638_v3  ;;  %296 = vmatprep.subr.bf16.mxu1 %v1651_v8  ;;  %v1670_v14 = vld [vmem:[#allocation7 + $0x60] ss:$16 sps:$4 sm:$0xff]   ;;  %v1672_v15 = vld [vmem:[#allocation7 + $0x6c] ss:$16 sps:$4 sm:$0xff]   ;;  %v1675_v16 = vld [vmem:[#allocation7 + $0x84] ss:$16 sps:$4 sm:$0xff]  }
  0x2c   :  { %v1678_v17 = vld [vmem:[#allocation7 + $0x80] ss:$16 sps:$4 sm:$0xff]   ;;  %v1680_v18 = vld [vmem:[#allocation7 + $0x68] ss:$16 sps:$4 sm:$0xff]   ;;  %v1684_v19 = vld [vmem:[#allocation7 + $0x8c] ss:$16 sps:$4 sm:$0xff]  }
  0x2d   :  { %v1687_v20 = vld [vmem:[#allocation7 + $0xa4] ss:$16 sps:$4 sm:$0xff]   ;;  %v1690_v21 = vld [vmem:[#allocation7 + $0x88] ss:$16 sps:$4 sm:$0xff]   ;;  %v1694_v22 = vld [vmem:[#allocation7 + $0xa0] ss:$16 sps:$4 sm:$0xff]  }
  0x2e   :  { %256 = vmatpush1.bf16.msra.mxu0 %v1643_v5  ;;  %297 = vmatpush1.bf16.msra.mxu1 %v1654_v9  ;;  %v1696_v23 = vld [vmem:[#allocation7 + $0xac] ss:$16 sps:$4 sm:$0xff]   ;;  %v1699_v24 = vld [vmem:[#allocation7 + $0xc4] ss:$16 sps:$4 sm:$0xff]   ;;  %v1707_v26 = vld [vmem:[#allocation7 + $0xa8] ss:$16 sps:$4 sm:$0xff]  }
  0x2f   :  { %257 = vmatprep.subr.bf16.mxu0 %v1648_v7  ;;  %298 = vmatprep.subr.bf16.mxu1 %v1663_v12  ;;  %v1704_v25 = vld [vmem:[%s2027_s2] sm:$0xff]  ;;  %v1715_v28 = vld [vmem:[#allocation7 + $0xcc] ss:$16 sps:$4 sm:$0xff]   ;;  %v1723_v34 = vld [vmem:[#allocation7 + $0xc8] ss:$16 sps:$4 sm:$0xff]   ;;  %v1581_v38 = vmov 0.0|0.0  }
  0x30   :  { %vm1295_vm0 = vcmp.gt.s32.totalorder %v1704_v25, 0  ;;  %vm1297_vm1 = vcmp.gt.s32.totalorder %v1704_v25, 1  ;;  %v1713_v27 = vld [vmem:[#allocation7 + $0xc0] ss:$16 sps:$4 sm:$0xff]   ;;  %v1720_v32 = vld [vmem:[#allocation7 + $0xe4] ss:$16 sps:$4 sm:$0xff]  }
  0x31   :  { %v1296_v30 = vsel %vm1295_vm0, 1.0, %v1580_v29  ;;  %v1298_v31 = vsel %vm1297_vm1, 1.0, %v1580_v29  ;;  %v1727_v35 = vld [vmem:[#allocation7 + $0xe0] ss:$16 sps:$4 sm:$0xff]   ;;  %v1729_v36 = vld [vmem:[#allocation7 + $0xec] ss:$16 sps:$4 sm:$0xff]  }
  0x32   :  { %258 = vmatpush1.bf16.msra.mxu0 %v1658_v10  ;;  %299 = vmatpush1.bf16.msra.mxu1 %v1666_v13  ;;  %v1322_v33 = vpack.i.bf16 %v1298_v31, %v1296_v30  ;;  %v1733_v37 = vld [vmem:[#allocation7 + $0xe8] ss:$16 sps:$4 sm:$0xff]   ;;  %v86_v39 = vld [vmem:[#allocation4] sm:$0xff]  ;;  %vm1299_vm2 = vcmp.gt.s32.totalorder %v1704_v25, 2  ;;  %vm1301_vm3 = vcmp.gt.s32.totalorder %v1704_v25, 3  ;;  %vm1303_vm4 = vcmp.gt.s32.totalorder %v1704_v25, 4 }
  0x33   :  { %259 = vmatprep.subr.bf16.mxu0 %v1661_v11  ;;  %300 = vmatprep.subr.bf16.mxu1 %v1672_v15  ;;  %v88_v40 = vunpack.c.l.bf16 %v86_v39  ;;  %v87_v41 = vld [vmem:[#allocation4 + $0x8] sm:$0xff]  ;;  %v89_v42 = vunpack.c.h.bf16 %v86_v39  ;;  %vm1305_vm5 = vcmp.gt.s32.totalorder %v1704_v25, 5  ;;  %vm1307_vm6 = vcmp.gt.s32.totalorder %v1704_v25, 6  ;;  %s1582_s2 = smov [#allocation9]  }
  0x34   :  { %1323 = vperm.xlu0 %1321, %v1322_v33   ;;  %v90_v44 = vunpack.c.l.bf16 %v87_v41  ;;  %v91_v55 = vunpack.c.h.bf16 %v87_v41  ;;  %vm1309_vm7 = vcmp.gt.s32.totalorder %v1704_v25, 7  ;;  %s1250_s11 = sshll.u32 %s1582_s2, 4  ;;  %s1251_s11 = int_to_ptr.vmem [resolvable:$true] %s1250_s11 }
  0x35   :  { %s1547_s12 = scalar_lea.vmem %s1251_s11, 1024  ;;  %p1552_p3 = scmp.lt.s32.totalorder %s1251_s11, %s1251_s11 }
  0x36   :  { %260 = vmatpush1.bf16.msra.mxu0 %v1670_v14  ;;  %301 = vmatpush1.bf16.msra.mxu1 %v1680_v18  ;;  %p1548_p2 = scmp.ne.s32.totalorder %s1251_s11, %s1547_s12  ;;  %p1553_p4 = scmp.lt.s32.totalorder %s1547_s12, %s1547_s12 }
  0x37   :  { %261 = vmatprep.subr.bf16.mxu0 %v1675_v16  ;;  %302 = vmatprep.subr.bf16.mxu1 %v1684_v19 }
  0x38   :  { %p1554_p5 = por %p1553_p4, %p1552_p3 }
  0x3a   :  { %262 = vmatpush1.bf16.msra.mxu0 %v1678_v17  ;;  %303 = vmatpush1.bf16.msra.mxu1 %v1690_v21  ;;  %p1555_p6 = pnand %p1554_p5, %p1548_p2 }
  0x3b   :  { %263 = vmatprep.subr.bf16.mxu0 %v1687_v20  ;;  %304 = vmatprep.subr.bf16.mxu1 %v1696_v23 }
  0x3e   :  { %264 = vmatpush1.bf16.msra.mxu0 %v1694_v22  ;;  %305 = vmatpush1.bf16.msra.mxu1 %v1707_v26 }
  0x3f   :  { %265 = vmatprep.subr.bf16.mxu0 %v1699_v24  ;;  %306 = vmatprep.subr.bf16.mxu1 %v1715_v28 }
  0x42   :  { %266 = vmatpush1.bf16.msra.mxu0 %v1713_v27  ;;  %307 = vmatpush1.bf16.msra.mxu1 %v1723_v34 }
  0x43   :  { %267 = vmatprep.subr.bf16.mxu0 %v1720_v32  ;;  %308 = vmatprep.subr.bf16.mxu1 %v1729_v36 }
  0x46   :  { %268 = vmatpush1.bf16.msra.mxu0 %v1727_v35  ;;  %309 = vmatpush1.bf16.msra.mxu1 %v1733_v37 }
  0x47   :  { %376 = vmatprep.subr.bf16.mxu0 %v1633_v1  ;;  %417 = vmatprep.subr.bf16.mxu1 %v1641_v4 }
  0x49   :  { %286 = vmatmul.mubr.bf16.vlgmr.msra.gmra.mrb[0].mxu0 %v1581_v38  ;;  %327 = vmatmul.mubr.bf16.vlgmr.msra.gmra.mrb[0].mxu1 %v1581_v38 }
  0x4a   :  { %377 = vmatpush1.bf16.msra.mxu0 %v1635_v2  ;;  %408 = vmatprep.mubr.bf16.mxu0 %v1579_v0 }
  0x4b   :  { %378 = vmatprep.subr.bf16.mxu0 %v1638_v3  ;;  %418 = vmatpush1.bf16.msra.mxu1 %v1645_v6 }
  0x4c   :  { %449 = vmatprep.mubr.bf16.mxu1 %v1579_v0  ;;  %419 = vmatprep.subr.bf16.mxu1 %v1651_v8 }
  0x4e   :  { %379 = vmatpush1.bf16.msra.mxu0 %v1643_v5 }
  0x4f   :  { %380 = vmatprep.subr.bf16.mxu0 %v1648_v7  ;;  %420 = vmatpush1.bf16.msra.mxu1 %v1654_v9 }
  0x50   :  { %421 = vmatprep.subr.bf16.mxu1 %v1663_v12 }
  0x52   :  { %381 = vmatpush1.bf16.msra.mxu0 %v1658_v10 }
  0x53   :  { %382 = vmatprep.subr.bf16.mxu0 %v1661_v11  ;;  %422 = vmatpush1.bf16.msra.mxu1 %v1666_v13 }
  0x54   :  { %423 = vmatprep.subr.bf16.mxu1 %v1672_v15 }
  0x56   :  { %383 = vmatpush1.bf16.msra.mxu0 %v1670_v14 }
  0x57   :  { %384 = vmatprep.subr.bf16.mxu0 %v1675_v16  ;;  %424 = vmatpush1.bf16.msra.mxu1 %v1680_v18 }
  0x58   :  { %425 = vmatprep.subr.bf16.mxu1 %v1684_v19 }
  0x5a   :  { %385 = vmatpush1.bf16.msra.mxu0 %v1678_v17 }
  0x5b   :  { %386 = vmatprep.subr.bf16.mxu0 %v1687_v20  ;;  %426 = vmatpush1.bf16.msra.mxu1 %v1690_v21 }
  0x5c   :  { %427 = vmatprep.subr.bf16.mxu1 %v1696_v23 }
  0x5e   :  { %387 = vmatpush1.bf16.msra.mxu0 %v1694_v22 }
  0x5f   :  { %388 = vmatprep.subr.bf16.mxu0 %v1699_v24  ;;  %428 = vmatpush1.bf16.msra.mxu1 %v1707_v26 }
  0x60   :  { %429 = vmatprep.subr.bf16.mxu1 %v1715_v28 }
  0x62   :  { %389 = vmatpush1.bf16.msra.mxu0 %v1713_v27 }
  0x63   :  { %390 = vmatprep.subr.bf16.mxu0 %v1720_v32  ;;  %430 = vmatpush1.bf16.msra.mxu1 %v1723_v34 }
  0x64   :  { %431 = vmatprep.subr.bf16.mxu1 %v1729_v36 }
  0x66   :  { %391 = vmatpush1.bf16.msra.mxu0 %v1727_v35 }
  0x67   :  { %501 = vmatprep.subr.bf16.mxu0 %v1633_v1  ;;  %432 = vmatpush1.bf16.msra.mxu1 %v1733_v37 }
  0x68   :  { %542 = vmatprep.subr.bf16.mxu1 %v1641_v4 }
 0x11c   :  { %v287_v43 = vpop.f32.mrb[0].mxu0  ;;  %v328_v51 = vpop.f32.mrb[0].mxu1 }
 0x11d   :  { %v335_v45 = vadd.f32 %v287_v43, %v88_v40  ;;  %v289_v46 = vpop.f32.mrb[1].mxu0  ;;  %v337_v53 = vadd.f32 %v328_v51, %v90_v44  ;;  %v330_v54 = vpop.f32.mrb[1].mxu1  ;;  %v1302_v51 = vsel %vm1301_vm3, 1.0, %v1580_v29 }
 0x11e   :  { %v336_v47 = vadd.f32 %v289_v46, %v89_v42  ;;  %v291_v48 = vpop.f32.mrb[2].mxu0  ;;  %v332_v56 = vpop.f32.mrb[2].mxu1  ;;  %v338_v58 = vadd.f32 %v330_v54, %v91_v55  ;;  %v370_v55 = vld [vmem:[#allocation4 + $0x18] sm:$0xff] }
 0x11f   :  { %v339_v49 = vmul.f32 0.5, %v335_v45  ;;  %v292_v50 = vpop.f32.mrb[3].mxu0  ;;  %v333_v57 = vpop.f32.mrb[3].mxu1 }
 0x120   :  { %v343_v52 = vmul.f32 0.5, %v336_v47  ;;  %v348_v59 = vmul.f32 0.5, %v338_v58  ;;  %v1777_v43 = vpop.permute.xlu0 %1323  ;;  %v1300_v50 = vsel %vm1299_vm2, 1.0, %v1580_v29 }
 0x121   :  { %1391 = vtanh.f32 %v339_v49  ;;  %v1325_v45 = vunpack.i.l.bf16 %v1777_v43 }
 0x122   :  { %1393 = vtanh.f32 %v343_v52  ;;  %v1327_v52 = vpack.i.bf16 %v1302_v51, %v1300_v50 }
 0x123   :  { %1395 = vtanh.f32 %v337_v53  ;;  %v369_v53 = vld [vmem:[#allocation4 + $0x10] sm:$0xff] }
 0x124   :  { %1397 = vtanh.f32 %v348_v59  ;;  %1328 = vperm.xlu0 %1321, %v1327_v52   ;;  %v371_v54 = vunpack.c.l.bf16 %v369_v53  ;;  %v372_v56 = vunpack.c.h.bf16 %v369_v53 }
 0x12b   :  { %v1392_v60 = vpop.eup %1391 }
 0x12c   :  { %v1394_v61 = vpop.eup %1393  ;;  %v341_v62 = vadd.f32 1.0, %v1392_v60  ;;  %v373_v60 = vunpack.c.l.bf16 %v370_v55 }
 0x12d   :  { %v1396_v63 = vpop.eup %1395  ;;  %v345_v30 = vadd.f32 1.0, %v1394_v61 }
 0x12e   :  { %v342_v31 = vmul.f32 0.5, %v341_v62  ;;  %v1398_v41 = vpop.eup %1397 }
 0x12f   :  { %v346_v33 = vmul.f32 0.5, %v345_v30  ;;  %v350_v42 = vadd.f32 1.0, %v1398_v41 }
 0x130   :  { %v353_v38 = vmul.f32 %v1396_v63, %v342_v31 }
 0x131   :  { %v352_v39 = vmul.f32 0.0, %v346_v33  ;;  %v351_v44 = vmul.f32 0.5, %v350_v42 }
 0x133   :  { %v1774_v40 = vadd.f32 %v353_v38, %v352_v39 }
 0x135   :  { %1399 = vtanh.f32 %v1774_v40 }
 0x13f   :  { %v1400_v46 = vpop.eup %1399 }
 0x140   :  { %v356_v47 = vmul.f32 %v1400_v46, %v351_v44  ;;  %v374_v44 = vunpack.c.h.bf16 %v370_v55 }
 0x142   :  { %v366_v48 = vmul.f32 %v1325_v45, %v356_v47  ;;  %v375_v49 = vpack.c.bf16 %v356_v47, %v356_v47 }
 0x144   :  { %367 = vst [vmem:[#allocation9] sm:$0xff] %v366_v48  ;;  %409 = vmatmul.mubr.bf16.vlgmr.msra.gmra.mrb[4].mxu0 %v375_v49  ;;  %450 = vmatmul.mubr.bf16.vlgmr.msra.gmra.mrb[4].mxu1 %v375_v49 }
 0x145   :  { %502 = vmatpush1.bf16.msra.mxu0 %v1635_v2  ;;  %543 = vmatpush1.bf16.msra.mxu1 %v1645_v6 }
 0x146   :  { %503 = vmatprep.subr.bf16.mxu0 %v1638_v3  ;;  %544 = vmatprep.subr.bf16.mxu1 %v1651_v8 }
 0x147   :  { %533 = vmatprep.mubr.bf16.mxu0 %v1579_v0  ;;  %574 = vmatprep.mubr.bf16.mxu1 %v1579_v0 }
 0x149   :  { %504 = vmatpush1.bf16.msra.mxu0 %v1643_v5  ;;  %545 = vmatpush1.bf16.msra.mxu1 %v1654_v9 }
 0x14a   :  { %505 = vmatprep.subr.bf16.mxu0 %v1648_v7  ;;  %546 = vmatprep.subr.bf16.mxu1 %v1663_v12 }
 0x14d   :  { %506 = vmatpush1.bf16.msra.mxu0 %v1658_v10  ;;  %547 = vmatpush1.bf16.msra.mxu1 %v1666_v13 }
 0x14e   :  { %507 = vmatprep.subr.bf16.mxu0 %v1661_v11  ;;  %548 = vmatprep.subr.bf16.mxu1 %v1672_v15 }
 0x151   :  { %508 = vmatpush1.bf16.msra.mxu0 %v1670_v14  ;;  %549 = vmatpush1.bf16.msra.mxu1 %v1680_v18 }
 0x152   :  { %509 = vmatprep.subr.bf16.mxu0 %v1675_v16  ;;  %550 = vmatprep.subr.bf16.mxu1 %v1684_v19 }
 0x155   :  { %510 = vmatpush1.bf16.msra.mxu0 %v1678_v17  ;;  %551 = vmatpush1.bf16.msra.mxu1 %v1690_v21 }
 0x156   :  { %511 = vmatprep.subr.bf16.mxu0 %v1687_v20  ;;  %552 = vmatprep.subr.bf16.mxu1 %v1696_v23 }
 0x159   :  { %512 = vmatpush1.bf16.msra.mxu0 %v1694_v22  ;;  %553 = vmatpush1.bf16.msra.mxu1 %v1707_v26 }
 0x15a   :  { %513 = vmatprep.subr.bf16.mxu0 %v1699_v24  ;;  %554 = vmatprep.subr.bf16.mxu1 %v1715_v28 }
 0x15d   :  { %514 = vmatpush1.bf16.msra.mxu0 %v1713_v27  ;;  %555 = vmatpush1.bf16.msra.mxu1 %v1723_v34 }
 0x15e   :  { %515 = vmatprep.subr.bf16.mxu0 %v1720_v32  ;;  %556 = vmatprep.subr.bf16.mxu1 %v1729_v36 }
 0x161   :  { %516 = vmatpush1.bf16.msra.mxu0 %v1727_v35  ;;  %557 = vmatpush1.bf16.msra.mxu1 %v1733_v37 }
 0x162   :  { %626 = vmatprep.subr.bf16.mxu0 %v1633_v1  ;;  %667 = vmatprep.subr.bf16.mxu1 %v1641_v4 }
 0x217   :  { %v410_v57 = vpop.f32.mrb[4].mxu0  ;;  %v451_v58 = vpop.f32.mrb[4].mxu1 }
 0x218   :  { %v458_v59 = vadd.f32 %v410_v57, %v371_v54  ;;  %v412_v61 = vpop.f32.mrb[5].mxu0  ;;  %v453_v62 = vpop.f32.mrb[5].mxu1  ;;  %v460_v42 = vadd.f32 %v451_v58, %v373_v60 }
 0x219   :  { %v459_v63 = vadd.f32 %v412_v61, %v372_v56  ;;  %v414_v30 = vpop.f32.mrb[6].mxu0  ;;  %v455_v31 = vpop.f32.mrb[6].mxu1  ;;  %v461_v45 = vadd.f32 %v453_v62, %v374_v44 }
 0x21a   :  { %v462_v33 = vmul.f32 0.5, %v458_v59  ;;  %v415_v38 = vpop.f32.mrb[7].mxu0  ;;  %v456_v39 = vpop.f32.mrb[7].mxu1  ;;  %v1326_v59 = vunpack.i.h.bf16 %v1777_v43  ;;  %v495_v31 = vld [vmem:[#allocation4 + $0x28] sm:$0xff] }
 0x21b   :  { %v466_v41 = vmul.f32 0.5, %v459_v63  ;;  %v471_v46 = vmul.f32 0.5, %v461_v45 }
 0x21c   :  { %1401 = vtanh.f32 %v462_v33 }
 0x21d   :  { %1403 = vtanh.f32 %v466_v41 }
 0x21e   :  { %1405 = vtanh.f32 %v460_v42  ;;  %v498_v42 = vunpack.c.l.bf16 %v495_v31 }
 0x21f   :  { %1407 = vtanh.f32 %v471_v46 }
 0x226   :  { %v1402_v47 = vpop.eup %1401 }
 0x227   :  { %v1404_v48 = vpop.eup %1403  ;;  %v464_v49 = vadd.f32 1.0, %v1402_v47 }
 0x228   :  { %v468_v50 = vadd.f32 1.0, %v1404_v48  ;;  %v1406_v52 = vpop.eup %1405 }
 0x229   :  { %v465_v51 = vmul.f32 0.5, %v464_v49  ;;  %v1408_v55 = vpop.eup %1407 }
 0x22a   :  { %v469_v53 = vmul.f32 0.5, %v468_v50  ;;  %v473_v58 = vadd.f32 1.0, %v1408_v55 }
 0x22b   :  { %v476_v54 = vmul.f32 %v1406_v52, %v465_v51 }
 0x22c   :  { %v475_v56 = vmul.f32 %v469_v53, %v1774_v40  ;;  %v474_v60 = vmul.f32 0.5, %v473_v58  ;;  %v494_v40 = vld [vmem:[#allocation4 + $0x20] sm:$0xff] }
 0x22d   :  { %v496_v43 = vunpack.c.l.bf16 %v494_v40  ;;  %v497_v33 = vunpack.c.h.bf16 %v494_v40 }
 0x22e   :  { %v1819_v57 = vadd.f32 %v476_v54, %v475_v56  ;;  %v499_v54 = vunpack.c.h.bf16 %v495_v31 }
 0x230   :  { %1409 = vtanh.f32 %v1819_v57 }
 0x23a   :  { %v1410_v61 = vpop.eup %1409 }
 0x23b   :  { %v479_v62 = vmul.f32 %v1410_v61, %v474_v60 }
 0x23d   :  { %v490_v63 = vmul.f32 %v1326_v59, %v479_v62  ;;  %v500_v30 = vpack.c.bf16 %v479_v62, %v479_v62 }
 0x23f   :  { %492 = vst [vmem:[#allocation9 + $0x8] sm:$0xff] %v490_v63  ;;  %534 = vmatmul.mubr.bf16.vlgmr.msra.gmra.mrb[8].mxu0 %v500_v30  ;;  %575 = vmatmul.mubr.bf16.vlgmr.msra.gmra.mrb[8].mxu1 %v500_v30 }
 0x240   :  { %627 = vmatpush1.bf16.msra.mxu0 %v1635_v2  ;;  %668 = vmatpush1.bf16.msra.mxu1 %v1645_v6 }
 0x241   :  { %628 = vmatprep.subr.bf16.mxu0 %v1638_v3  ;;  %669 = vmatprep.subr.bf16.mxu1 %v1651_v8 }
 0x242   :  { %658 = vmatprep.mubr.bf16.mxu0 %v1579_v0  ;;  %699 = vmatprep.mubr.bf16.mxu1 %v1579_v0 }
 0x244   :  { %629 = vmatpush1.bf16.msra.mxu0 %v1643_v5  ;;  %670 = vmatpush1.bf16.msra.mxu1 %v1654_v9 }
 0x245   :  { %630 = vmatprep.subr.bf16.mxu0 %v1648_v7  ;;  %671 = vmatprep.subr.bf16.mxu1 %v1663_v12 }
 0x248   :  { %631 = vmatpush1.bf16.msra.mxu0 %v1658_v10  ;;  %672 = vmatpush1.bf16.msra.mxu1 %v1666_v13 }
 0x249   :  { %632 = vmatprep.subr.bf16.mxu0 %v1661_v11  ;;  %673 = vmatprep.subr.bf16.mxu1 %v1672_v15 }
 0x24c   :  { %633 = vmatpush1.bf16.msra.mxu0 %v1670_v14  ;;  %674 = vmatpush1.bf16.msra.mxu1 %v1680_v18 }
 0x24d   :  { %634 = vmatprep.subr.bf16.mxu0 %v1675_v16  ;;  %675 = vmatprep.subr.bf16.mxu1 %v1684_v19 }
 0x250   :  { %635 = vmatpush1.bf16.msra.mxu0 %v1678_v17  ;;  %676 = vmatpush1.bf16.msra.mxu1 %v1690_v21 }
 0x251   :  { %636 = vmatprep.subr.bf16.mxu0 %v1687_v20  ;;  %677 = vmatprep.subr.bf16.mxu1 %v1696_v23 }
 0x254   :  { %637 = vmatpush1.bf16.msra.mxu0 %v1694_v22  ;;  %678 = vmatpush1.bf16.msra.mxu1 %v1707_v26 }
 0x255   :  { %638 = vmatprep.subr.bf16.mxu0 %v1699_v24  ;;  %679 = vmatprep.subr.bf16.mxu1 %v1715_v28 }
 0x258   :  { %639 = vmatpush1.bf16.msra.mxu0 %v1713_v27  ;;  %680 = vmatpush1.bf16.msra.mxu1 %v1723_v34 }
 0x259   :  { %640 = vmatprep.subr.bf16.mxu0 %v1720_v32  ;;  %681 = vmatprep.subr.bf16.mxu1 %v1729_v36 }
 0x25c   :  { %641 = vmatpush1.bf16.msra.mxu0 %v1727_v35  ;;  %682 = vmatpush1.bf16.msra.mxu1 %v1733_v37 }
 0x25d   :  { %751 = vmatprep.subr.bf16.mxu0 %v1633_v1  ;;  %792 = vmatprep.subr.bf16.mxu1 %v1641_v4 }
 0x312   :  { %v535_v38 = vpop.f32.mrb[8].mxu0  ;;  %v576_v39 = vpop.f32.mrb[8].mxu1 }
 0x313   :  { %v583_v41 = vadd.f32 %v535_v38, %v496_v43  ;;  %v537_v44 = vpop.f32.mrb[9].mxu0  ;;  %v578_v45 = vpop.f32.mrb[9].mxu1  ;;  %v585_v53 = vadd.f32 %v576_v39, %v498_v42 }
 0x314   :  { %v584_v46 = vadd.f32 %v537_v44, %v497_v33  ;;  %v539_v47 = vpop.f32.mrb[10].mxu0  ;;  %v580_v48 = vpop.f32.mrb[10].mxu1  ;;  %v586_v56 = vadd.f32 %v578_v45, %v499_v54 }
 0x315   :  { %v587_v49 = vmul.f32 0.5, %v583_v41  ;;  %v540_v50 = vpop.f32.mrb[11].mxu0  ;;  %v581_v51 = vpop.f32.mrb[11].mxu1  ;;  %v1306_v48 = vsel %vm1305_vm5, 1.0, %v1580_v29 }
 0x316   :  { %v591_v52 = vmul.f32 0.5, %v584_v46  ;;  %v596_v55 = vmul.f32 0.5, %v586_v56  ;;  %v1861_v39 = vpop.permute.xlu0 %1328  ;;  %v619_v50 = vld [vmem:[#allocation4 + $0x30] sm:$0xff] }
 0x317   :  { %1411 = vtanh.f32 %v587_v49  ;;  %v1330_v42 = vunpack.i.l.bf16 %v1861_v39  ;;  %v621_v51 = vunpack.c.l.bf16 %v619_v50 }
 0x318   :  { %1413 = vtanh.f32 %v591_v52  ;;  %v620_v52 = vld [vmem:[#allocation4 + $0x38] sm:$0xff] }
 0x319   :  { %1415 = vtanh.f32 %v585_v53  ;;  %v622_v53 = vunpack.c.h.bf16 %v619_v50 }
 0x31a   :  { %1417 = vtanh.f32 %v596_v55 }
 0x321   :  { %v1412_v58 = vpop.eup %1411 }
 0x322   :  { %v1414_v59 = vpop.eup %1413  ;;  %v589_v60 = vadd.f32 1.0, %v1412_v58  ;;  %v623_v58 = vunpack.c.l.bf16 %v620_v52 }
 0x323   :  { %v593_v61 = vadd.f32 1.0, %v1414_v59  ;;  %v1416_v63 = vpop.eup %1415 }
 0x324   :  { %v590_v62 = vmul.f32 0.5, %v589_v60  ;;  %v1418_v31 = vpop.eup %1417 }
 0x325   :  { %v594_v30 = vmul.f32 0.5, %v593_v61  ;;  %v598_v38 = vadd.f32 1.0, %v1418_v31 }
 0x326   :  { %v601_v40 = vmul.f32 %v1416_v63, %v590_v62 }
 0x327   :  { %v600_v43 = vmul.f32 %v594_v30, %v1819_v57  ;;  %v599_v41 = vmul.f32 0.5, %v598_v38  ;;  %v1304_v57 = vsel %vm1303_vm4, 1.0, %v1580_v29 }
 0x328   :  { %v1333_v49 = vpack.i.bf16 %v1306_v48, %v1304_v57 }
 0x329   :  { %v1858_v33 = vadd.f32 %v601_v40, %v600_v43 }
 0x32a   :  { %1334 = vperm.xlu1 %1332, %v1333_v49  }
 0x32b   :  { %1419 = vtanh.f32 %v1858_v33 }
 0x335   :  { %v1420_v44 = vpop.eup %1419 }
 0x336   :  { %v604_v45 = vmul.f32 %v1420_v44, %v599_v41  ;;  %v624_v41 = vunpack.c.h.bf16 %v620_v52 }
 0x338   :  { %v615_v46 = vmul.f32 %v1330_v42, %v604_v45  ;;  %v625_v47 = vpack.c.bf16 %v604_v45, %v604_v45 }
 0x33a   :  { %617 = vst [vmem:[#allocation9 + $0x10] sm:$0xff] %v615_v46  ;;  %659 = vmatmul.mubr.bf16.vlgmr.msra.gmra.mrb[12].mxu0 %v625_v47  ;;  %700 = vmatmul.mubr.bf16.vlgmr.msra.gmra.mrb[12].mxu1 %v625_v47 }
 0x33b   :  { %752 = vmatpush1.bf16.msra.mxu0 %v1635_v2  ;;  %793 = vmatpush1.bf16.msra.mxu1 %v1645_v6 }
 0x33c   :  { %753 = vmatprep.subr.bf16.mxu0 %v1638_v3  ;;  %794 = vmatprep.subr.bf16.mxu1 %v1651_v8 }
 0x33d   :  { %783 = vmatprep.mubr.bf16.mxu0 %v1579_v0  ;;  %824 = vmatprep.mubr.bf16.mxu1 %v1579_v0 }
 0x33f   :  { %754 = vmatpush1.bf16.msra.mxu0 %v1643_v5  ;;  %795 = vmatpush1.bf16.msra.mxu1 %v1654_v9 }
 0x340   :  { %755 = vmatprep.subr.bf16.mxu0 %v1648_v7  ;;  %796 = vmatprep.subr.bf16.mxu1 %v1663_v12 }
 0x343   :  { %756 = vmatpush1.bf16.msra.mxu0 %v1658_v10  ;;  %797 = vmatpush1.bf16.msra.mxu1 %v1666_v13 }
 0x344   :  { %757 = vmatprep.subr.bf16.mxu0 %v1661_v11  ;;  %798 = vmatprep.subr.bf16.mxu1 %v1672_v15 }
 0x347   :  { %758 = vmatpush1.bf16.msra.mxu0 %v1670_v14  ;;  %799 = vmatpush1.bf16.msra.mxu1 %v1680_v18 }
 0x348   :  { %759 = vmatprep.subr.bf16.mxu0 %v1675_v16  ;;  %800 = vmatprep.subr.bf16.mxu1 %v1684_v19 }
 0x34b   :  { %760 = vmatpush1.bf16.msra.mxu0 %v1678_v17  ;;  %801 = vmatpush1.bf16.msra.mxu1 %v1690_v21 }
 0x34c   :  { %761 = vmatprep.subr.bf16.mxu0 %v1687_v20  ;;  %802 = vmatprep.subr.bf16.mxu1 %v1696_v23 }
 0x34f   :  { %762 = vmatpush1.bf16.msra.mxu0 %v1694_v22  ;;  %803 = vmatpush1.bf16.msra.mxu1 %v1707_v26 }
 0x350   :  { %763 = vmatprep.subr.bf16.mxu0 %v1699_v24  ;;  %804 = vmatprep.subr.bf16.mxu1 %v1715_v28 }
 0x353   :  { %764 = vmatpush1.bf16.msra.mxu0 %v1713_v27  ;;  %805 = vmatpush1.bf16.msra.mxu1 %v1723_v34 }
 0x354   :  { %765 = vmatprep.subr.bf16.mxu0 %v1720_v32  ;;  %806 = vmatprep.subr.bf16.mxu1 %v1729_v36 }
 0x357   :  { %766 = vmatpush1.bf16.msra.mxu0 %v1727_v35  ;;  %807 = vmatpush1.bf16.msra.mxu1 %v1733_v37 }
 0x358   :  { %876 = vmatprep.subr.bf16.mxu0 %v1633_v1  ;;  %917 = vmatprep.subr.bf16.mxu1 %v1641_v4 }
 0x40d   :  { %v660_v54 = vpop.f32.mrb[12].mxu0  ;;  %v701_v56 = vpop.f32.mrb[12].mxu1 }
 0x40e   :  { %v708_v55 = vadd.f32 %v660_v54, %v621_v51  ;;  %v662_v59 = vpop.f32.mrb[13].mxu0  ;;  %v703_v60 = vpop.f32.mrb[13].mxu1  ;;  %v710_v38 = vadd.f32 %v701_v56, %v623_v58 }
 0x40f   :  { %v709_v61 = vadd.f32 %v662_v59, %v622_v53  ;;  %v664_v62 = vpop.f32.mrb[14].mxu0  ;;  %v705_v63 = vpop.f32.mrb[14].mxu1  ;;  %v711_v42 = vadd.f32 %v703_v60, %v624_v41 }
 0x410   :  { %v712_v30 = vmul.f32 0.5, %v708_v55  ;;  %v665_v40 = vpop.f32.mrb[15].mxu0  ;;  %v706_v43 = vpop.f32.mrb[15].mxu1  ;;  %v1331_v55 = vunpack.i.h.bf16 %v1861_v39 }
 0x411   :  { %v716_v31 = vmul.f32 0.5, %v709_v61  ;;  %v721_v44 = vmul.f32 0.5, %v711_v42 }
 0x412   :  { %1421 = vtanh.f32 %v712_v30 }
 0x413   :  { %1423 = vtanh.f32 %v716_v31 }
 0x414   :  { %1425 = vtanh.f32 %v710_v38 }
 0x415   :  { %1427 = vtanh.f32 %v721_v44 }
 0x41c   :  { %v1422_v45 = vpop.eup %1421 }
 0x41d   :  { %v1424_v46 = vpop.eup %1423  ;;  %v714_v47 = vadd.f32 1.0, %v1422_v45 }
 0x41e   :  { %v718_v57 = vadd.f32 1.0, %v1424_v46  ;;  %v1426_v49 = vpop.eup %1425 }
 0x41f   :  { %v715_v48 = vmul.f32 0.5, %v714_v47  ;;  %v1428_v52 = vpop.eup %1427 }
 0x420   :  { %v719_v50 = vmul.f32 0.5, %v718_v57  ;;  %v723_v56 = vadd.f32 1.0, %v1428_v52 }
 0x421   :  { %v726_v51 = vmul.f32 %v1426_v49, %v715_v48 }
 0x422   :  { %v725_v53 = vmul.f32 %v719_v50, %v1858_v33  ;;  %v724_v58 = vmul.f32 0.5, %v723_v56 }
 0x424   :  { %v1903_v54 = vadd.f32 %v726_v51, %v725_v53 }
 0x426   :  { %1429 = vtanh.f32 %v1903_v54 }
 0x430   :  { %v1430_v59 = vpop.eup %1429 }
 0x431   :  { %v729_v60 = vmul.f32 %v1430_v59, %v724_v58  ;;  %v1945_v59 = vpop.permute.xlu1 %1334 }
 0x433   :  { %v740_v61 = vmul.f32 %v1331_v55, %v729_v60  ;;  %v750_v62 = vpack.c.bf16 %v729_v60, %v729_v60 }
 0x435   :  { %742 = vst [vmem:[#allocation9 + $0x18] sm:$0xff] %v740_v61  ;;  %784 = vmatmul.mubr.bf16.vlgmr.msra.gmra.mrb[16].mxu0 %v750_v62  ;;  %825 = vmatmul.mubr.bf16.vlgmr.msra.gmra.mrb[16].mxu1 %v750_v62  ;;  %v1336_v61 = vunpack.i.l.bf16 %v1945_v59 }
 0x436   :  { %877 = vmatpush1.bf16.msra.mxu0 %v1635_v2  ;;  %918 = vmatpush1.bf16.msra.mxu1 %v1645_v6  ;;  %v744_v2 = vld [vmem:[#allocation4 + $0x40] sm:$0xff] }
 0x437   :  { %878 = vmatprep.subr.bf16.mxu0 %v1638_v3  ;;  %919 = vmatprep.subr.bf16.mxu1 %v1651_v8  ;;  %v746_v3 = vunpack.c.l.bf16 %v744_v2  ;;  %v747_v6 = vunpack.c.h.bf16 %v744_v2 }
 0x438   :  { %908 = vmatprep.mubr.bf16.mxu0 %v1579_v0  ;;  %949 = vmatprep.mubr.bf16.mxu1 %v1579_v0 }
 0x43a   :  { %879 = vmatpush1.bf16.msra.mxu0 %v1643_v5  ;;  %920 = vmatpush1.bf16.msra.mxu1 %v1654_v9  ;;  %v745_v5 = vld [vmem:[#allocation4 + $0x48] sm:$0xff] }
 0x43b   :  { %880 = vmatprep.subr.bf16.mxu0 %v1648_v7  ;;  %921 = vmatprep.subr.bf16.mxu1 %v1663_v12  ;;  %v748_v33 = vunpack.c.l.bf16 %v745_v5 }
 0x43e   :  { %881 = vmatpush1.bf16.msra.mxu0 %v1658_v10  ;;  %922 = vmatpush1.bf16.msra.mxu1 %v1666_v13 }
 0x43f   :  { %882 = vmatprep.subr.bf16.mxu0 %v1661_v11  ;;  %923 = vmatprep.subr.bf16.mxu1 %v1672_v15 }
 0x442   :  { %883 = vmatpush1.bf16.msra.mxu0 %v1670_v14  ;;  %924 = vmatpush1.bf16.msra.mxu1 %v1680_v18 }
 0x443   :  { %884 = vmatprep.subr.bf16.mxu0 %v1675_v16  ;;  %925 = vmatprep.subr.bf16.mxu1 %v1684_v19 }
 0x446   :  { %885 = vmatpush1.bf16.msra.mxu0 %v1678_v17  ;;  %926 = vmatpush1.bf16.msra.mxu1 %v1690_v21 }
 0x447   :  { %886 = vmatprep.subr.bf16.mxu0 %v1687_v20  ;;  %927 = vmatprep.subr.bf16.mxu1 %v1696_v23 }
 0x44a   :  { %887 = vmatpush1.bf16.msra.mxu0 %v1694_v22  ;;  %928 = vmatpush1.bf16.msra.mxu1 %v1707_v26 }
 0x44b   :  { %888 = vmatprep.subr.bf16.mxu0 %v1699_v24  ;;  %929 = vmatprep.subr.bf16.mxu1 %v1715_v28 }
 0x44e   :  { %889 = vmatpush1.bf16.msra.mxu0 %v1713_v27  ;;  %930 = vmatpush1.bf16.msra.mxu1 %v1723_v34 }
 0x44f   :  { %890 = vmatprep.subr.bf16.mxu0 %v1720_v32  ;;  %931 = vmatprep.subr.bf16.mxu1 %v1729_v36 }
 0x452   :  { %891 = vmatpush1.bf16.msra.mxu0 %v1727_v35  ;;  %932 = vmatpush1.bf16.msra.mxu1 %v1733_v37 }
 0x453   :  { %1001 = vmatprep.subr.bf16.mxu0 %v1633_v1  ;;  %1042 = vmatprep.subr.bf16.mxu1 %v1641_v4  ;;  %v749_v4 = vunpack.c.h.bf16 %v745_v5 }
 0x508   :  { %v785_v7 = vpop.f32.mrb[16].mxu0  ;;  %v826_v9 = vpop.f32.mrb[16].mxu1 }
 0x509   :  { %v833_v10 = vadd.f32 %v785_v7, %v746_v3  ;;  %v787_v39 = vpop.f32.mrb[17].mxu0  ;;  %v828_v63 = vpop.f32.mrb[17].mxu1  ;;  %v835_v1 = vadd.f32 %v826_v9, %v748_v33  ;;  %v1954_v7 = vld [vmem:[#allocation7 + $0x24] ss:$16 sps:$4 sm:$0xff]   ;;  %v1960_v9 = vld [vmem:[#allocation7 + $0x20] ss:$16 sps:$4 sm:$0xff]  }
 0x50a   :  { %v834_v30 = vadd.f32 %v787_v39, %v747_v6  ;;  %v789_v40 = vpop.f32.mrb[18].mxu0  ;;  %v830_v43 = vpop.f32.mrb[18].mxu1  ;;  %v836_v44 = vadd.f32 %v828_v63, %v749_v4  ;;  %v1948_v6 = vld [vmem:[#allocation7] ss:$16 sps:$4 sm:$0xff]   ;;  %v1966_v33 = vld [vmem:[#allocation7 + $0x44] ss:$16 sps:$4 sm:$0xff]  }
 0x50b   :  { %v837_v31 = vmul.f32 0.5, %v833_v10  ;;  %v790_v38 = vpop.f32.mrb[19].mxu0  ;;  %v831_v41 = vpop.f32.mrb[19].mxu1  ;;  %v1963_v10 = vld [vmem:[#allocation7 + $0x28] ss:$16 sps:$4 sm:$0xff]  }
 0x50c   :  { %v841_v42 = vmul.f32 0.5, %v834_v30  ;;  %v846_v45 = vmul.f32 0.5, %v836_v44  ;;  %v1970_v39 = vld [vmem:[#allocation7 + $0x40] ss:$16 sps:$4 sm:$0xff]  }
 0x50d   :  { %1431 = vtanh.f32 %v837_v31 }
 0x50e   :  { %1433 = vtanh.f32 %v841_v42 }
 0x50f   :  { %1435 = vtanh.f32 %v835_v1 }
 0x510   :  { %1437 = vtanh.f32 %v846_v45 }
 0x517   :  { %v1432_v46 = vpop.eup %1431 }
 0x518   :  { %v1434_v47 = vpop.eup %1433  ;;  %v839_v57 = vadd.f32 1.0, %v1432_v46 }
 0x519   :  { %v843_v48 = vadd.f32 1.0, %v1434_v47  ;;  %v1436_v50 = vpop.eup %1435  ;;  %v1337_v47 = vunpack.i.h.bf16 %v1945_v59  ;;  %v1485_v59 = vld [vmem:[#allocation7 + $0x60] ss:$16 sps:$4 sm:$0xff]  }
 0x51a   :  { %v840_v49 = vmul.f32 0.5, %v839_v57  ;;  %v1438_v55 = vpop.eup %1437 }
 0x51b   :  { %v844_v51 = vmul.f32 0.5, %v843_v48  ;;  %v848_v58 = vadd.f32 1.0, %v1438_v55  ;;  %v1483_v55 = vld [vmem:[#allocation7 + $0x64] ss:$16 sps:$4 sm:$0xff]  }
 0x51c   :  { %v851_v53 = vmul.f32 %v1436_v50, %v840_v49 }
 0x51d   :  { %v850_v52 = vmul.f32 %v844_v51, %v1903_v54  ;;  %v849_v60 = vmul.f32 0.5, %v848_v58  ;;  %v1951_v54 = vld [vmem:[#allocation7 + $0x8] ss:$16 sps:$4 sm:$0xff]   ;;  %v1484_v58 = vld [vmem:[#allocation7 + $0x6c] ss:$16 sps:$4 sm:$0xff]  }
 0x51f   :  { %v1942_v56 = vadd.f32 %v851_v53, %v850_v52  ;;  %v1480_v53 = vld [vmem:[#allocation7 + $0x2c] ss:$16 sps:$4 sm:$0xff]  }
 0x520   :  { %v1481_v52 = vld [vmem:[#allocation7 + $0x4c] ss:$16 sps:$4 sm:$0xff]  }
 0x521   :  { %1439 = vtanh.f32 %v1942_v56 }
 0x52b   :  { %v1440_v62 = vpop.eup %1439 }
 0x52c   :  { %v854_v2 = vmul.f32 %v1440_v62, %v849_v60  ;;  %v1486_v60 = vld [vmem:[#allocation7 + $0x68] ss:$16 sps:$4 sm:$0xff]   ;;  %v1489_v62 = vld [vmem:[#allocation7 + $0x80] ss:$16 sps:$4 sm:$0xff]  }
 0x52e   :  { %v865_v3 = vmul.f32 %v1336_v61, %v854_v2  ;;  %v875_v5 = vpack.c.bf16 %v854_v2, %v854_v2  ;;  %v1488_v61 = vld [vmem:[#allocation7 + $0x8c] ss:$16 sps:$4 sm:$0xff]   ;;  %v1490_v2 = vld [vmem:[#allocation7 + $0x88] ss:$16 sps:$4 sm:$0xff]  }
 0x530   :  { %867 = vst [vmem:[#allocation9 + $0x20] sm:$0xff] %v865_v3  ;;  %909 = vmatmul.mubr.bf16.vlgmr.msra.gmra.mrb[20].mxu0 %v875_v5  ;;  %950 = vmatmul.mubr.bf16.vlgmr.msra.gmra.mrb[20].mxu1 %v875_v5  ;;  %v1491_v3 = vld [vmem:[#allocation7 + $0xa4] ss:$16 sps:$4 sm:$0xff]   ;;  %v1492_v5 = vld [vmem:[#allocation7 + $0xac] ss:$16 sps:$4 sm:$0xff]  }
 0x531   :  { %1002 = vmatpush1.bf16.msra.mxu0 %v1948_v6  ;;  %1043 = vmatpush1.bf16.msra.mxu1 %v1951_v54 }
 0x532   :  { %1003 = vmatprep.subr.bf16.mxu0 %v1954_v7  ;;  %1044 = vmatprep.subr.bf16.mxu1 %v1651_v8  ;;  %v1478_v8 = vld [vmem:[#allocation7 + $0x4] ss:$16 sps:$4 sm:$0xff]  }
 0x533   :  { %1033 = vmatprep.mubr.bf16.mxu0 %v1579_v0  ;;  %1074 = vmatprep.mubr.bf16.mxu1 %v1579_v0 }
 0x535   :  { %1004 = vmatpush1.bf16.msra.mxu0 %v1960_v9  ;;  %1045 = vmatpush1.bf16.msra.mxu1 %v1963_v10 }
 0x536   :  { %1005 = vmatprep.subr.bf16.mxu0 %v1966_v33  ;;  %1046 = vmatprep.subr.bf16.mxu1 %v1663_v12  ;;  %v1308_v12 = vsel %vm1307_vm6, 1.0, %v1580_v29 }
 0x539   :  { %1006 = vmatpush1.bf16.msra.mxu0 %v1970_v39  ;;  %1047 = vmatpush1.bf16.msra.mxu1 %v1666_v13  ;;  %v1310_v13 = vsel %vm1309_vm7, 1.0, %v1580_v29 }
 0x53a   :  { %1007 = vmatprep.subr.bf16.mxu0 %v1661_v11  ;;  %1048 = vmatprep.subr.bf16.mxu1 %v1672_v15  ;;  %v1479_v11 = vld [vmem:[#allocation7 + $0xc] ss:$16 sps:$4 sm:$0xff]   ;;  %v869_v15 = vld [vmem:[#allocation4 + $0x50] sm:$0xff] }
 0x53d   :  { %1008 = vmatpush1.bf16.msra.mxu0 %v1670_v14  ;;  %1049 = vmatpush1.bf16.msra.mxu1 %v1680_v18  ;;  %v1338_v14 = vpack.i.bf16 %v1310_v13, %v1308_v12  ;;  %v872_v18 = vunpack.c.h.bf16 %v869_v15  ;;  %v1502_v12 = vld [vmem:[#allocation7 + $0xe8] ss:$16 sps:$4 sm:$0xff]   ;;  %v994_v13 = vld [vmem:[#allocation4 + $0x60] sm:$0xff] }
 0x53e   :  { %1009 = vmatprep.subr.bf16.mxu0 %v1675_v16  ;;  %1050 = vmatprep.subr.bf16.mxu1 %v1684_v19  ;;  %v871_v16 = vunpack.c.l.bf16 %v869_v15  ;;  %v995_v15 = vld [vmem:[#allocation4 + $0x68] sm:$0xff] }
 0x53f   :  { %1339 = vperm.xlu1 %1332, %v1338_v14   ;;  %v996_v14 = vunpack.c.l.bf16 %v994_v13 }
 0x541   :  { %1010 = vmatpush1.bf16.msra.mxu0 %v1678_v17  ;;  %1051 = vmatpush1.bf16.msra.mxu1 %v1690_v21  ;;  %v870_v17 = vld [vmem:[#allocation4 + $0x58] sm:$0xff] }
 0x542   :  { %1011 = vmatprep.subr.bf16.mxu0 %v1687_v20  ;;  %1052 = vmatprep.subr.bf16.mxu1 %v1696_v23 }
 0x545   :  { %1012 = vmatpush1.bf16.msra.mxu0 %v1694_v22  ;;  %1053 = vmatpush1.bf16.msra.mxu1 %v1707_v26  ;;  %v873_v22 = vunpack.c.l.bf16 %v870_v17 }
 0x546   :  { %1013 = vmatprep.subr.bf16.mxu0 %v1699_v24  ;;  %1054 = vmatprep.subr.bf16.mxu1 %v1715_v28 }
 0x549   :  { %1014 = vmatpush1.bf16.msra.mxu0 %v1713_v27  ;;  %1055 = vmatpush1.bf16.msra.mxu1 %v1723_v34 }
 0x54a   :  { %1015 = vmatprep.subr.bf16.mxu0 %v1720_v32  ;;  %1056 = vmatprep.subr.bf16.mxu1 %v1729_v36  ;;  %v874_v36 = vunpack.c.h.bf16 %v870_v17 }
 0x54d   :  { %1016 = vmatpush1.bf16.msra.mxu0 %v1727_v35  ;;  %1057 = vmatpush1.bf16.msra.mxu1 %v1733_v37 }
 0x54e   :  { %1126 = vmatprep.subr.bf16.mxu0 %v1478_v8  ;;  %1167 = vmatprep.subr.bf16.mxu1 %v1479_v11  ;;  %v1500_v8 = vld [vmem:[#allocation7 + $0xec] ss:$16 sps:$4 sm:$0xff]   ;;  %v1501_v11 = vld [vmem:[#allocation7 + $0xe0] ss:$16 sps:$4 sm:$0xff]  }
 0x603   :  { %v910_v19 = vpop.f32.mrb[20].mxu0  ;;  %v951_v20 = vpop.f32.mrb[20].mxu1 }
 0x604   :  { %v958_v21 = vadd.f32 %v910_v19, %v871_v16  ;;  %v912_v23 = vpop.f32.mrb[21].mxu0  ;;  %v953_v24 = vpop.f32.mrb[21].mxu1  ;;  %v960_v29 = vadd.f32 %v951_v20, %v873_v22  ;;  %v997_v16 = vunpack.c.h.bf16 %v994_v13  ;;  %v998_v20 = vunpack.c.l.bf16 %v995_v15 }
 0x605   :  { %v959_v26 = vadd.f32 %v912_v23, %v872_v18  ;;  %v914_v27 = vpop.f32.mrb[22].mxu0  ;;  %v955_v28 = vpop.f32.mrb[22].mxu1  ;;  %v961_v37 = vadd.f32 %v953_v24, %v874_v36 }
 0x606   :  { %v962_v25 = vmul.f32 0.5, %v958_v21  ;;  %v915_v32 = vpop.f32.mrb[23].mxu0  ;;  %v956_v34 = vpop.f32.mrb[23].mxu1 }
 0x607   :  { %v966_v35 = vmul.f32 0.5, %v959_v26  ;;  %v971_v63 = vmul.f32 0.5, %v961_v37 }
 0x608   :  { %1441 = vtanh.f32 %v962_v25 }
 0x609   :  { %1443 = vtanh.f32 %v966_v35  ;;  %v999_v35 = vunpack.c.h.bf16 %v995_v15 }
 0x60a   :  { %1445 = vtanh.f32 %v960_v29 }
 0x60b   :  { %1447 = vtanh.f32 %v971_v63 }
 0x612   :  { %v1442_v30 = vpop.eup %1441 }
 0x613   :  { %v1444_v40 = vpop.eup %1443  ;;  %v964_v43 = vadd.f32 1.0, %v1442_v30 }
 0x614   :  { %v968_v31 = vadd.f32 1.0, %v1444_v40  ;;  %v1446_v41 = vpop.eup %1445 }
 0x615   :  { %v965_v38 = vmul.f32 0.5, %v964_v43  ;;  %v1448_v45 = vpop.eup %1447 }
 0x616   :  { %v969_v42 = vmul.f32 0.5, %v968_v31  ;;  %v973_v46 = vadd.f32 1.0, %v1448_v45 }
 0x617   :  { %v976_v1 = vmul.f32 %v1446_v41, %v965_v38 }
 0x618   :  { %v975_v4 = vmul.f32 %v969_v42, %v1942_v56  ;;  %v974_v57 = vmul.f32 0.5, %v973_v46  ;;  %v1482_v56 = vld [vmem:[#allocation7 + $0x48] ss:$16 sps:$4 sm:$0xff]   ;;  %v1340_v46 = vpop.permute.xlu1 %1339 }
 0x61a   :  { %v1999_v44 = vadd.f32 %v976_v1, %v975_v4 }
 0x61c   :  { %1449 = vtanh.f32 %v1999_v44 }
 0x626   :  { %v1450_v48 = vpop.eup %1449 }
 0x627   :  { %v979_v49 = vmul.f32 %v1450_v48, %v974_v57  ;;  %v1341_v57 = vunpack.i.l.bf16 %v1340_v46 }
 0x629   :  { %v990_v50 = vmul.f32 %v1337_v47, %v979_v49  ;;  %v1000_v51 = vpack.c.bf16 %v979_v49, %v979_v49 }
 0x62b   :  { %992 = vst [vmem:[#allocation9 + $0x28] sm:$0xff] %v990_v50  ;;  %1034 = vmatmul.mubr.bf16.vlgmr.msra.gmra.mrb[24].mxu0 %v1000_v51  ;;  %1075 = vmatmul.mubr.bf16.vlgmr.msra.gmra.mrb[24].mxu1 %v1000_v51 }
 0x62c   :  { %1127 = vmatpush1.bf16.msra.mxu0 %v1948_v6  ;;  %1168 = vmatpush1.bf16.msra.mxu1 %v1951_v54  ;;  %v1493_v6 = vld [vmem:[#allocation7 + $0xa0] ss:$16 sps:$4 sm:$0xff]   ;;  %v1494_v54 = vld [vmem:[#allocation7 + $0xa8] ss:$16 sps:$4 sm:$0xff]  }
 0x62d   :  { %1128 = vmatprep.subr.bf16.mxu0 %v1954_v7  ;;  %1169 = vmatprep.subr.bf16.mxu1 %v1480_v53  ;;  %v1495_v7 = vld [vmem:[#allocation7 + $0xc4] ss:$16 sps:$4 sm:$0xff]  }
 0x62e   :  { %1158 = vmatprep.mubr.bf16.mxu0 %v1579_v0  ;;  %1199 = vmatprep.mubr.bf16.mxu1 %v1579_v0  ;;  %v1487_v0 = vld [vmem:[#allocation7 + $0x84] ss:$16 sps:$4 sm:$0xff]  }
 0x62f   :  { %v1119_v53 = vld [vmem:[#allocation4 + $0x70] sm:$0xff] }
 0x630   :  { %1129 = vmatpush1.bf16.msra.mxu0 %v1960_v9  ;;  %1170 = vmatpush1.bf16.msra.mxu1 %v1963_v10  ;;  %v1496_v9 = vld [vmem:[#allocation7 + $0xcc] ss:$16 sps:$4 sm:$0xff]   ;;  %v1497_v10 = vld [vmem:[#allocation7 + $0xc0] ss:$16 sps:$4 sm:$0xff]  }
 0x631   :  { %1130 = vmatprep.subr.bf16.mxu0 %v1966_v33  ;;  %1171 = vmatprep.subr.bf16.mxu1 %v1481_v52  ;;  %v1498_v33 = vld [vmem:[#allocation7 + $0xc8] ss:$16 sps:$4 sm:$0xff]   ;;  %v1121_v52 = vunpack.c.l.bf16 %v1119_v53 }
 0x634   :  { %1131 = vmatpush1.bf16.msra.mxu0 %v1970_v39  ;;  %1172 = vmatpush1.bf16.msra.mxu1 %v1482_v56  ;;  %v1499_v39 = vld [vmem:[#allocation7 + $0xe4] ss:$16 sps:$4 sm:$0xff]   ;;  %v1120_v56 = vld [vmem:[#allocation4 + $0x78] sm:$0xff] }
 0x635   :  { %1132 = vmatprep.subr.bf16.mxu0 %v1483_v55  ;;  %1173 = vmatprep.subr.bf16.mxu1 %v1484_v58  ;;  %v1122_v55 = vunpack.c.h.bf16 %v1119_v53 }
 0x638   :  { %1133 = vmatpush1.bf16.msra.mxu0 %v1485_v59  ;;  %1174 = vmatpush1.bf16.msra.mxu1 %v1486_v60  ;;  %v1123_v60 = vunpack.c.l.bf16 %v1120_v56 }
 0x639   :  { %1134 = vmatprep.subr.bf16.mxu0 %v1487_v0  ;;  %1175 = vmatprep.subr.bf16.mxu1 %v1488_v61 }
 0x63c   :  { %1135 = vmatpush1.bf16.msra.mxu0 %v1489_v62  ;;  %1176 = vmatpush1.bf16.msra.mxu1 %v1490_v2 }
 0x63d   :  { %1136 = vmatprep.subr.bf16.mxu0 %v1491_v3  ;;  %1177 = vmatprep.subr.bf16.mxu1 %v1492_v5 }
 0x640   :  { %1137 = vmatpush1.bf16.msra.mxu0 %v1493_v6  ;;  %1178 = vmatpush1.bf16.msra.mxu1 %v1494_v54 }
 0x641   :  { %1138 = vmatprep.subr.bf16.mxu0 %v1495_v7  ;;  %1179 = vmatprep.subr.bf16.mxu1 %v1496_v9 }
 0x644   :  { %1139 = vmatpush1.bf16.msra.mxu0 %v1497_v10  ;;  %1180 = vmatpush1.bf16.msra.mxu1 %v1498_v33  ;;  %v1124_v10 = vunpack.c.h.bf16 %v1120_v56 }
 0x645   :  { %1140 = vmatprep.subr.bf16.mxu0 %v1499_v39  ;;  %1181 = vmatprep.subr.bf16.mxu1 %v1500_v8 }
 0x648   :  { %1141 = vmatpush1.bf16.msra.mxu0 %v1501_v11  ;;  %1182 = vmatpush1.bf16.msra.mxu1 %v1502_v12 }
 0x6fe   :  { %v1035_v17 = vpop.f32.mrb[24].mxu0  ;;  %v1076_v18 = vpop.f32.mrb[24].mxu1 }
 0x6ff   :  { %v1083_v19 = vadd.f32 %v1035_v17, %v996_v14  ;;  %v1037_v21 = vpop.f32.mrb[25].mxu0  ;;  %v1078_v22 = vpop.f32.mrb[25].mxu1  ;;  %v1085_v34 = vadd.f32 %v1076_v18, %v998_v20 }
 0x700   :  { %v1084_v23 = vadd.f32 %v1037_v21, %v997_v16  ;;  %v1039_v24 = vpop.f32.mrb[26].mxu0  ;;  %v1080_v26 = vpop.f32.mrb[26].mxu1  ;;  %v1086_v29 = vadd.f32 %v1078_v22, %v999_v35 }
 0x701   :  { %v1087_v27 = vmul.f32 0.5, %v1083_v19  ;;  %v1040_v28 = vpop.f32.mrb[27].mxu0  ;;  %v1081_v25 = vpop.f32.mrb[27].mxu1  ;;  %v1342_v24 = vunpack.i.h.bf16 %v1340_v46 }
 0x702   :  { %v1091_v32 = vmul.f32 0.5, %v1084_v23  ;;  %v1096_v36 = vmul.f32 0.5, %v1086_v29 }
 0x703   :  { %1451 = vtanh.f32 %v1087_v27 }
 0x704   :  { %1453 = vtanh.f32 %v1091_v32 }
 0x705   :  { %1455 = vtanh.f32 %v1085_v34 }
 0x706   :  { %1457 = vtanh.f32 %v1096_v36 }
 0x70d   :  { %v1452_v37 = vpop.eup %1451 }
 0x70e   :  { %v1454_v63 = vpop.eup %1453  ;;  %v1089_v30 = vadd.f32 1.0, %v1452_v37 }
 0x70f   :  { %v1093_v40 = vadd.f32 1.0, %v1454_v63  ;;  %v1456_v31 = vpop.eup %1455 }
 0x710   :  { %v1090_v43 = vmul.f32 0.5, %v1089_v30  ;;  %v1458_v4 = vpop.eup %1457 }
 0x711   :  { %v1094_v38 = vmul.f32 0.5, %v1093_v40  ;;  %v1098_v45 = vadd.f32 1.0, %v1458_v4 }
 0x712   :  { %v1101_v41 = vmul.f32 %v1456_v31, %v1090_v43 }
 0x713   :  { %v1100_v42 = vmul.f32 %v1094_v38, %v1999_v44  ;;  %v1099_v47 = vmul.f32 0.5, %v1098_v45 }
 0x715   :  { %v1102_v1 = vadd.f32 %v1101_v41, %v1100_v42 }
 0x717   :  { %1459 = vtanh.f32 %v1102_v1 }
 0x721   :  { %v1460_v48 = vpop.eup %1459 }
 0x722   :  { %v1104_v49 = vmul.f32 %v1460_v48, %v1099_v47 }
 0x724   :  { %v1115_v50 = vmul.f32 %v1341_v57, %v1104_v49  ;;  %v1125_v51 = vpack.c.bf16 %v1104_v49, %v1104_v49 }
 0x726   :  { %1117 = vst [vmem:[#allocation9 + $0x30] sm:$0xff] %v1115_v50  ;;  %1159 = vmatmul.mubr.bf16.vlgmr.msra.gmra.mrb[28].mxu0 %v1125_v51  ;;  %1200 = vmatmul.mubr.bf16.vlgmr.msra.gmra.mrb[28].mxu1 %v1125_v51 }
 0x7f9   :  { %v1160_v58 = vpop.f32.mrb[28].mxu0  ;;  %v1201_v44 = vpop.f32.mrb[28].mxu1 }
 0x7fa   :  { %v1208_v59 = vadd.f32 %v1160_v58, %v1121_v52  ;;  %v1162_v0 = vpop.f32.mrb[29].mxu0  ;;  %v1203_v61 = vpop.f32.mrb[29].mxu1  ;;  %v1210_v9 = vadd.f32 %v1201_v44, %v1123_v60 }
 0x7fb   :  { %v1209_v62 = vadd.f32 %v1162_v0, %v1122_v55  ;;  %v1164_v2 = vpop.f32.mrb[30].mxu0  ;;  %v1205_v3 = vpop.f32.mrb[30].mxu1  ;;  %v1211_v33 = vadd.f32 %v1203_v61, %v1124_v10 }
 0x7fc   :  { %v1212_v5 = vmul.f32 0.5, %v1208_v59  ;;  %v1165_v6 = vpop.f32.mrb[31].mxu0  ;;  %v1206_v54 = vpop.f32.mrb[31].mxu1 }
 0x7fd   :  { %v1216_v7 = vmul.f32 0.5, %v1209_v62  ;;  %v1221_v39 = vmul.f32 0.5, %v1211_v33 }
 0x7fe   :  { %1461 = vtanh.f32 %v1212_v5 }
 0x7ff   :  { %1463 = vtanh.f32 %v1216_v7 }
 0x800   :  { %1465 = vtanh.f32 %v1210_v9 }
 0x801   :  { %1467 = vtanh.f32 %v1221_v39 }
 0x808   :  { %v1462_v8 = vpop.eup %1461 }
 0x809   :  { %v1464_v11 = vpop.eup %1463  ;;  %v1214_v12 = vadd.f32 1.0, %v1462_v8 }
 0x80a   :  { %v1218_v13 = vadd.f32 1.0, %v1464_v11  ;;  %v1466_v15 = vpop.eup %1465 }
 0x80b   :  { %v1215_v14 = vmul.f32 0.5, %v1214_v12  ;;  %v1468_v20 = vpop.eup %1467 }
 0x80c   :  { %v1219_v16 = vmul.f32 0.5, %v1218_v13  ;;  %v1223_v21 = vadd.f32 1.0, %v1468_v20 }
 0x80d   :  { %v1226_v17 = vmul.f32 %v1466_v15, %v1215_v14 }
 0x80e   :  { %v1225_v18 = vmul.f32 %v1219_v16, %v1102_v1  ;;  %v1224_v22 = vmul.f32 0.5, %v1223_v21 }
 0x810   :  { %v1227_v19 = vadd.f32 %v1226_v17, %v1225_v18 }
 0x812   :  { %1469 = vtanh.f32 %v1227_v19 }
 0x81c   :  { %v1470_v23 = vpop.eup %1469 }
 0x81d   :  { %v1229_v26 = vmul.f32 %v1470_v23, %v1224_v22 }
 0x81f   :  { %v1240_v27 = vmul.f32 %v1342_v24, %v1229_v26 }
 0x821   :  { %1242 = vst [vmem:[#allocation9 + $0x38] sm:$0xff] %v1240_v27 }
 0x822   :  { %1558 = shalt.err (!%p1555_p6)
}
 0x823   :  { %s1559_s15 = scalar_lea.hbm %s2028_s3, 1024 }
 0x824   :  { %p1560_p7 = scmp.ne.s32.totalorder %s2028_s3, %s1559_s15  ;;  %p1563_p8 = scmp.lt.u32.totalorder %s1559_s15, %s2028_s3 }
 0x826   :  { %p1565_p9 = pnand %p1563_p8, %p1560_p7 }
 0x828   :  { %1568 = shalt.err (!%p1565_p9)
}
 0x829   :  { %s1583_s20 = smov 128   ;;  %s1584_s21 = smov 8  }
 0x82a   :  { %1256 = dma.vmem_to_hbm [thread:$0]  %s1251_s11, 1024, %s2028_s3, [#allocation6], %s1583_s20, %s1583_s20, %s1584_s21  }
 0x82b   :  { %1573 = dma.done.wait [#allocation6], 1024  }
 0x82c   :  { %1574 = vsyncadd [#allocation6], 4294966272 }
 0x82d   :  { %1260 = vsyncpa [#allocation5], 1 }
 0x82e   :  { %1261 = vsyncpa [#allocation8], 1 }
 0x82f   :  { %1262 = vsyncpa [#allocation6], 1 }

</bundles_post_ra>
